<compile_context>
chip_gen: v6e
topology: v6e:2x2x1
jax: 0.10.0
libtpu: 0.0.40
codegen_flags: <defaults>
</compile_context>

<pallas_src>
import functools
import math

import jax
import jax.numpy as jnp
from jax import lax
from jax.experimental import pallas as pl
from jax.experimental.pallas import tpu as pltpu


def _round_up(n, m):
    return (n + m - 1) // m * m


def _ds(start, size, stride):
    if stride == 1:
        return pl.ds(start, size)
    return pl.ds(start, size, stride)


# ----------------------------------------------------------------------------
# Pallas kernel: one batch element per grid step.
# ----------------------------------------------------------------------------
def _conv_taps_matmul(img_ref, w_ref, *, kh, kw, sh, sw, ho, wo):
    """sum over taps of  tap(img) @ w[tap]  ->  (ho*wo, Np) float32.

    img_ref : (Hp, Wp, C)     zero-padded NHWC image (one batch element)
    w_ref   : (kh*kw, C, Np)  per-tap weights, gates fused along the lane axis
    """
    c = img_ref.shape[-1]
    acc = None
    for i in range(kh):
        for j in range(kw):
            tap = img_ref[_ds(i, ho, sh), _ds(j, wo, sw), :]   # (ho, wo, C)
            tap = tap.reshape(ho * wo, c)                      # (P, C)
            part = jnp.dot(tap, w_ref[i * kw + j],
                           preferred_element_type=jnp.float32)
            acc = part if acc is None else acc + part
    return acc


def _convgru_cell_kernel(xpad_ref, hpad_ref, wih_ref, whh_ref,
                         bih_ref, bhh_ref, out_ref, *,
                         kh, kw, sh, sw, rkh, rkw, ho, wo, ch):
    # xpad_ref : (Hp,  Wp,  Cin)  padded input image
    # hpad_ref : (Hop, Wop, Ch)   padded hidden state ("same" padding)
    # wih_ref  : (kh*kw,  Cin, Np) fused input-to-hidden weights  (z|r|n|pad)
    # whh_ref  : (rkh*rkw, Ch, Np) fused hidden-to-hidden weights (z|r|n|pad)
    # bih_ref  : (1, Np)           fused biases
    # bhh_ref  : (1, Np)
    # out_ref  : (P, Ch)           new hidden state (spatially flattened)
    p = ho * wo

    # Two fused convolutions (in-kernel tap extraction + gate-fused matmuls).
    ih = _conv_taps_matmul(xpad_ref, wih_ref,
                           kh=kh, kw=kw, sh=sh, sw=sw, ho=ho, wo=wo)
    hh = _conv_taps_matmul(hpad_ref, whh_ref,
                           kh=rkh, kw=rkw, sh=1, sw=1, ho=ho, wo=wo)

    # One broadcast bias add per conv result (f32, lane-dense width Np).
    ih = ih + bih_ref[...].astype(jnp.float32)
    hh = hh + bhh_ref[...].astype(jnp.float32)

    # GRU gating in f32 (z | r | n occupy lane ranges [0,Ch), [Ch,2Ch), [2Ch,3Ch)).
    z = jax.nn.sigmoid(ih[:, :ch] + hh[:, :ch])
    r = jax.nn.sigmoid(ih[:, ch:2 * ch] + hh[:, ch:2 * ch])
    n = jnp.tanh(ih[:, 2 * ch:3 * ch] + r * hh[:, 2 * ch:3 * ch])

    # Previous hidden state == centre tap of the "same"-padded hidden image.
    hprev = hpad_ref[pl.ds(rkh // 2, ho), pl.ds(rkw // 2, wo), :]
    hprev = hprev.reshape(p, ch).astype(jnp.float32)

    out_ref[...] = ((1.0 - z) * n + z * hprev).astype(out_ref.dtype)


# ----------------------------------------------------------------------------
# Plain-JAX glue: parameter packing and the pallas_call wrapper.
# ----------------------------------------------------------------------------
def _pack_conv_weight(w_oihw, n_pad):
    """torch conv weight (3*Ch, C, KH, KW) -> (KH*KW, C, Np), gates fused on lanes."""
    c3, c_in, kh, kw = w_oihw.shape
    w = jnp.transpose(w_oihw, (2, 3, 1, 0))          # (KH, KW, C, 3*Ch)
    w = w.reshape(kh * kw, c_in, c3)
    if n_pad > c3:
        w = jnp.pad(w, ((0, 0), (0, 0), (0, n_pad - c3)))
    return w


def _pack_bias(b, n_pad):
    c3 = b.shape[0]
    if n_pad > c3:
        b = jnp.pad(b, (0, n_pad - c3))
    return b.reshape(1, n_pad)


def convgru2d_cell_pallas(x, hx, w_ih, b_ih, w_hh, b_hh,
                          *, stride=(1, 1), padding=(0, 0)):
    """Equivalent of ConvGRU2DCell.forward(x, hx).  x/hx/output are NCHW."""
    B, Cin, H, W = x.shape
    c3, _, KH, KW = w_ih.shape
    Ch = c3 // 3
    RKH, RKW = w_hh.shape[2], w_hh.shape[3]
    sh, sw = stride
    ph, pw = padding
    # Like the torch module, the recurrent conv assumes odd kernel sizes.
    rph, rpw = RKH // 2, RKW // 2

    Ho = (H - KH + 2 * ph) // sh + 1
    Wo = (W - KW + 2 * pw) // sw + 1
    P = Ho * Wo

    if hx is None:
        hx = jnp.zeros((B, Ch, Ho, Wo), x.dtype)

    # NHWC + spatial zero-padding; taps are extracted inside the kernel, so no
    # im2col matrix is ever materialised in HBM.
    x_pad = jnp.pad(jnp.transpose(x, (0, 2, 3, 1)),
                    ((0, 0), (ph, ph), (pw, pw), (0, 0)))
    h_pad = jnp.pad(jnp.transpose(hx, (0, 2, 3, 1)),
                    ((0, 0), (rph, rph), (rpw, rpw), (0, 0)))
    Hp, Wp = x_pad.shape[1], x_pad.shape[2]
    Hop, Wop = h_pad.shape[1], h_pad.shape[2]

    # Gate-fused, lane-padded parameters (z|r|n packed along the lane axis).
    Np = _round_up(3 * Ch, 128)
    wih_g = _pack_conv_weight(w_ih, Np).astype(x.dtype)
    whh_g = _pack_conv_weight(w_hh, Np).astype(x.dtype)
    bih_g = _pack_bias(b_ih, Np).astype(jnp.float32)
    bhh_g = _pack_bias(b_hh, Np).astype(jnp.float32)

    kernel = functools.partial(
        _convgru_cell_kernel, kh=KH, kw=KW, sh=sh, sw=sw,
        rkh=RKH, rkw=RKW, ho=Ho, wo=Wo, ch=Ch)

    out_flat = pl.pallas_call(
        kernel,
        out_shape=jax.ShapeDtypeStruct((B, P, Ch), x.dtype),
        grid=(B,),
        in_specs=[
            pl.BlockSpec((None, Hp, Wp, Cin), lambda b: (b, 0, 0, 0)),
            pl.BlockSpec((None, Hop, Wop, Ch), lambda b: (b, 0, 0, 0)),
            pl.BlockSpec((KH * KW, Cin, Np), lambda b: (0, 0, 0)),
            pl.BlockSpec((RKH * RKW, Ch, Np), lambda b: (0, 0, 0)),
            pl.BlockSpec((1, Np), lambda b: (0, 0)),
            pl.BlockSpec((1, Np), lambda b: (0, 0)),
        ],
        out_specs=pl.BlockSpec((None, P, Ch), lambda b: (b, 0, 0)),
        compiler_params=pltpu.CompilerParams(
            dimension_semantics=("parallel",)),
    )(x_pad, h_pad, wih_g, whh_g, bih_g, bhh_g)

    out = out_flat.reshape(B, Ho, Wo, Ch)
    return jnp.transpose(out, (0, 3, 1, 2))


# ----------------------------------------------------------------------------
# Deterministic parameter init (matches shapes / init style of __init__).
# ----------------------------------------------------------------------------
def _xavier_uniform_conv(key, shape):
    fan_in = shape[1] * shape[2] * shape[3]
    fan_out = shape[0] * shape[2] * shape[3]
    bound = math.sqrt(6.0 / (fan_in + fan_out))
    return jax.random.uniform(key, shape, jnp.float32, -bound, bound)


def _orthogonal_conv(key, shape):
    rows = shape[0]
    cols = int(math.prod(shape[1:]))
    n_max, n_min = max(rows, cols), min(rows, cols)
    a = jax.random.normal(key, (n_max, n_min), jnp.float32)
    q, r = jnp.linalg.qr(a)
    q = q * jnp.sign(jnp.diagonal(r))
    if rows < cols:
        q = q.T
    return q.reshape(shape)


# ----------------------------------------------------------------------------
# Pure-JAX reference (mirrors the PyTorch forward) for validation.
# ----------------------------------------------------------------------------
def convgru2d_cell_ref(x, hx, w_ih, b_ih, w_hh, b_hh, stride, padding, rpad):
    Ch = w_ih.shape[0] // 3
    dn = ("NCHW", "OIHW", "NCHW")
    ih = lax.conv_general_dilated(
        x, w_ih, stride, [(padding[0],) * 2, (padding[1],) * 2],
        dimension_numbers=dn) + b_ih[None, :, None, None]
    hh = lax.conv_general_dilated(
        hx, w_hh, (1, 1), [(rpad[0],) * 2, (rpad[1],) * 2],
        dimension_numbers=dn) + b_hh[None, :, None, None]
    z = jax.nn.sigmoid(ih[:, :Ch] + hh[:, :Ch])
    r = jax.nn.sigmoid(ih[:, Ch:2 * Ch] + hh[:, Ch:2 * Ch])
    n = jnp.tanh(ih[:, 2 * Ch:] + r * hh[:, 2 * Ch:])
    return (1.0 - z) * n + z * hx


if __name__ == "__main__":
    key = jax.random.PRNGKey(0)
    k_x, k_ih, k_hh, k_h0 = jax.random.split(key, 4)

    # Module config: input_channels=4, hidden_channels=32, kernel_size=(3,3),
    # stride=(1,1), padding=(1,1), recurrent_kernel_size=(3,3).
    B, Cin, H, W = 2, 4, 16, 16
    Ch = 32
    kernel_size, stride, padding, rkernel = (3, 3), (1, 1), (1, 1), (3, 3)
    rpad = (rkernel[0] // 2, rkernel[1] // 2)

    # Parameters (deterministic; same init style as reset_parameters()).
    w_ih = _xavier_uniform_conv(k_ih, (3 * Ch, Cin, *kernel_size))
    w_hh = _orthogonal_conv(k_hh, (3 * Ch, Ch, *rkernel))
    b_ih = jnp.zeros((3 * Ch,), jnp.float32)
    b_hh = jnp.zeros((3 * Ch,), jnp.float32)

    Ho = (H - kernel_size[0] + 2 * padding[0]) // stride[0] + 1
    Wo = (W - kernel_size[1] + 2 * padding[1]) // stride[1] + 1

    x = jax.random.normal(k_x, (B, Cin, H, W), jnp.float32)
    hx = jax.random.normal(k_h0, (B, Ch, Ho, Wo), jnp.float32)

    out = convgru2d_cell_pallas(x, hx, w_ih, b_ih, w_hh, b_hh,
                                stride=stride, padding=padding)
    out = jax.block_until_ready(out)

    ref = convgru2d_cell_ref(x, hx, w_ih, b_ih, w_hh, b_hh,
                             stride, padding, rpad)
    ref = jax.block_until_ready(ref)

    assert out.shape == (B, Ch, Ho, Wo), out.shape
    assert jnp.allclose(out, ref, atol=1e-3, rtol=1e-3), (
        float(jnp.max(jnp.abs(out - ref))))

    print("KERNEL_OK")
</pallas_src>

<mosaic_0001>
module attributes {stable_mosaic.version = 11 : i64} {
  func.func @_convgru_cell_kernel(%arg0: i32, %arg1: memref<1x18x18x4xf32, #tpu.memory_space<vmem>>, %arg2: memref<1x18x18x32xf32, #tpu.memory_space<vmem>>, %arg3: memref<9x4x128xf32, #tpu.memory_space<vmem>>, %arg4: memref<9x32x128xf32, #tpu.memory_space<vmem>>, %arg5: memref<1x128xf32, #tpu.memory_space<vmem>>, %arg6: memref<1x128xf32, #tpu.memory_space<vmem>>, %arg7: memref<1x256x32xf32, #tpu.memory_space<vmem>>) attributes {dimension_semantics = [#tpu.dimension_semantics<parallel>], iteration_bounds = array<i64: 2>, scalar_prefetch = 0 : i64, scratch_operands = 0 : i64, tpu.core_type = #tpu.core_type<tc>, window_params = [{transform_indices = @transform_0, window_bounds = array<i64: 1, 18, 18, 4>}, {transform_indices = @transform_1, window_bounds = array<i64: 1, 18, 18, 32>}, {pipeline_mode = #tpu.pipeline_mode<synchronous>, transform_indices = @transform_2, window_bounds = array<i64: 9, 4, 128>}, {pipeline_mode = #tpu.pipeline_mode<synchronous>, transform_indices = @transform_3, window_bounds = array<i64: 9, 32, 128>}, {pipeline_mode = #tpu.pipeline_mode<synchronous>, transform_indices = @transform_4, window_bounds = array<i64: 1, 128>}, {pipeline_mode = #tpu.pipeline_mode<synchronous>, transform_indices = @transform_5, window_bounds = array<i64: 1, 128>}, {transform_indices = @transform_6, window_bounds = array<i64: 1, 256, 32>}]} {
    %c0 = arith.constant 0 : index
    %c0_0 = arith.constant 0 : index
    %c0_1 = arith.constant 0 : index
    %c0_2 = arith.constant 0 : index
    %0 = vector.load %arg1[%c0, %c0_0, %c0_1, %c0_2] : memref<1x18x18x4xf32, #tpu.memory_space<vmem>>, vector<1x16x16x4xf32>
    %1 = vector.shape_cast %0 : vector<1x16x16x4xf32> to vector<16x16x4xf32>
    %2 = vector.shape_cast %1 : vector<16x16x4xf32> to vector<256x4xf32>
    %c0_3 = arith.constant 0 : index
    %c0_4 = arith.constant 0 : index
    %c0_5 = arith.constant 0 : index
    %3 = vector.load %arg3[%c0_3, %c0_4, %c0_5] : memref<9x4x128xf32, #tpu.memory_space<vmem>>, vector<1x4x128xf32>
    %4 = vector.shape_cast %3 : vector<1x4x128xf32> to vector<4x128xf32>
    %cst = arith.constant dense<0.000000e+00> : vector<256x128xf32>
    %5 = tpu.matmul %2, %4, %cst {dimension_numbers = #tpu.dot_dimension_numbers<[1], [0], [0], [1], [0, 0, 1, 1], [], []>} : vector<256x4xf32>, vector<4x128xf32>, vector<256x128xf32> -> vector<256x128xf32>
    %c0_6 = arith.constant 0 : index
    %c0_7 = arith.constant 0 : index
    %c1 = arith.constant 1 : index
    %c0_8 = arith.constant 0 : index
    %6 = vector.load %arg1[%c0_6, %c0_7, %c1, %c0_8] : memref<1x18x18x4xf32, #tpu.memory_space<vmem>>, vector<1x16x16x4xf32>
    %7 = vector.shape_cast %6 : vector<1x16x16x4xf32> to vector<16x16x4xf32>
    %8 = vector.shape_cast %7 : vector<16x16x4xf32> to vector<256x4xf32>
    %c1_9 = arith.constant 1 : index
    %c0_10 = arith.constant 0 : index
    %c0_11 = arith.constant 0 : index
    %9 = vector.load %arg3[%c1_9, %c0_10, %c0_11] : memref<9x4x128xf32, #tpu.memory_space<vmem>>, vector<1x4x128xf32>
    %10 = vector.shape_cast %9 : vector<1x4x128xf32> to vector<4x128xf32>
    %cst_12 = arith.constant dense<0.000000e+00> : vector<256x128xf32>
    %11 = tpu.matmul %8, %10, %cst_12 {dimension_numbers = #tpu.dot_dimension_numbers<[1], [0], [0], [1], [0, 0, 1, 1], [], []>} : vector<256x4xf32>, vector<4x128xf32>, vector<256x128xf32> -> vector<256x128xf32>
    %12 = arith.addf %5, %11 : vector<256x128xf32>
    %c0_13 = arith.constant 0 : index
    %c0_14 = arith.constant 0 : index
    %c2 = arith.constant 2 : index
    %c0_15 = arith.constant 0 : index
    %13 = vector.load %arg1[%c0_13, %c0_14, %c2, %c0_15] : memref<1x18x18x4xf32, #tpu.memory_space<vmem>>, vector<1x16x16x4xf32>
    %14 = vector.shape_cast %13 : vector<1x16x16x4xf32> to vector<16x16x4xf32>
    %15 = vector.shape_cast %14 : vector<16x16x4xf32> to vector<256x4xf32>
    %c2_16 = arith.constant 2 : index
    %c0_17 = arith.constant 0 : index
    %c0_18 = arith.constant 0 : index
    %16 = vector.load %arg3[%c2_16, %c0_17, %c0_18] : memref<9x4x128xf32, #tpu.memory_space<vmem>>, vector<1x4x128xf32>
    %17 = vector.shape_cast %16 : vector<1x4x128xf32> to vector<4x128xf32>
    %cst_19 = arith.constant dense<0.000000e+00> : vector<256x128xf32>
    %18 = tpu.matmul %15, %17, %cst_19 {dimension_numbers = #tpu.dot_dimension_numbers<[1], [0], [0], [1], [0, 0, 1, 1], [], []>} : vector<256x4xf32>, vector<4x128xf32>, vector<256x128xf32> -> vector<256x128xf32>
    %19 = arith.addf %12, %18 : vector<256x128xf32>
    %c0_20 = arith.constant 0 : index
    %c1_21 = arith.constant 1 : index
    %c0_22 = arith.constant 0 : index
    %c0_23 = arith.constant 0 : index
    %20 = vector.load %arg1[%c0_20, %c1_21, %c0_22, %c0_23] : memref<1x18x18x4xf32, #tpu.memory_space<vmem>>, vector<1x16x16x4xf32>
    %21 = vector.shape_cast %20 : vector<1x16x16x4xf32> to vector<16x16x4xf32>
    %22 = vector.shape_cast %21 : vector<16x16x4xf32> to vector<256x4xf32>
    %c3 = arith.constant 3 : index
    %c0_24 = arith.constant 0 : index
    %c0_25 = arith.constant 0 : index
    %23 = vector.load %arg3[%c3, %c0_24, %c0_25] : memref<9x4x128xf32, #tpu.memory_space<vmem>>, vector<1x4x128xf32>
    %24 = vector.shape_cast %23 : vector<1x4x128xf32> to vector<4x128xf32>
    %cst_26 = arith.constant dense<0.000000e+00> : vector<256x128xf32>
    %25 = tpu.matmul %22, %24, %cst_26 {dimension_numbers = #tpu.dot_dimension_numbers<[1], [0], [0], [1], [0, 0, 1, 1], [], []>} : vector<256x4xf32>, vector<4x128xf32>, vector<256x128xf32> -> vector<256x128xf32>
    %26 = arith.addf %19, %25 : vector<256x128xf32>
    %c0_27 = arith.constant 0 : index
    %c1_28 = arith.constant 1 : index
    %c1_29 = arith.constant 1 : index
    %c0_30 = arith.constant 0 : index
    %27 = vector.load %arg1[%c0_27, %c1_28, %c1_29, %c0_30] : memref<1x18x18x4xf32, #tpu.memory_space<vmem>>, vector<1x16x16x4xf32>
    %28 = vector.shape_cast %27 : vector<1x16x16x4xf32> to vector<16x16x4xf32>
    %29 = vector.shape_cast %28 : vector<16x16x4xf32> to vector<256x4xf32>
    %c4 = arith.constant 4 : index
    %c0_31 = arith.constant 0 : index
    %c0_32 = arith.constant 0 : index
    %30 = vector.load %arg3[%c4, %c0_31, %c0_32] : memref<9x4x128xf32, #tpu.memory_space<vmem>>, vector<1x4x128xf32>
    %31 = vector.shape_cast %30 : vector<1x4x128xf32> to vector<4x128xf32>
    %cst_33 = arith.constant dense<0.000000e+00> : vector<256x128xf32>
    %32 = tpu.matmul %29, %31, %cst_33 {dimension_numbers = #tpu.dot_dimension_numbers<[1], [0], [0], [1], [0, 0, 1, 1], [], []>} : vector<256x4xf32>, vector<4x128xf32>, vector<256x128xf32> -> vector<256x128xf32>
    %33 = arith.addf %26, %32 : vector<256x128xf32>
    %c0_34 = arith.constant 0 : index
    %c1_35 = arith.constant 1 : index
    %c2_36 = arith.constant 2 : index
    %c0_37 = arith.constant 0 : index
    %34 = vector.load %arg1[%c0_34, %c1_35, %c2_36, %c0_37] : memref<1x18x18x4xf32, #tpu.memory_space<vmem>>, vector<1x16x16x4xf32>
    %35 = vector.shape_cast %34 : vector<1x16x16x4xf32> to vector<16x16x4xf32>
    %36 = vector.shape_cast %35 : vector<16x16x4xf32> to vector<256x4xf32>
    %c5 = arith.constant 5 : index
    %c0_38 = arith.constant 0 : index
    %c0_39 = arith.constant 0 : index
    %37 = vector.load %arg3[%c5, %c0_38, %c0_39] : memref<9x4x128xf32, #tpu.memory_space<vmem>>, vector<1x4x128xf32>
    %38 = vector.shape_cast %37 : vector<1x4x128xf32> to vector<4x128xf32>
    %cst_40 = arith.constant dense<0.000000e+00> : vector<256x128xf32>
    %39 = tpu.matmul %36, %38, %cst_40 {dimension_numbers = #tpu.dot_dimension_numbers<[1], [0], [0], [1], [0, 0, 1, 1], [], []>} : vector<256x4xf32>, vector<4x128xf32>, vector<256x128xf32> -> vector<256x128xf32>
    %40 = arith.addf %33, %39 : vector<256x128xf32>
    %c0_41 = arith.constant 0 : index
    %c2_42 = arith.constant 2 : index
    %c0_43 = arith.constant 0 : index
    %c0_44 = arith.constant 0 : index
    %41 = vector.load %arg1[%c0_41, %c2_42, %c0_43, %c0_44] : memref<1x18x18x4xf32, #tpu.memory_space<vmem>>, vector<1x16x16x4xf32>
    %42 = vector.shape_cast %41 : vector<1x16x16x4xf32> to vector<16x16x4xf32>
    %43 = vector.shape_cast %42 : vector<16x16x4xf32> to vector<256x4xf32>
    %c6 = arith.constant 6 : index
    %c0_45 = arith.constant 0 : index
    %c0_46 = arith.constant 0 : index
    %44 = vector.load %arg3[%c6, %c0_45, %c0_46] : memref<9x4x128xf32, #tpu.memory_space<vmem>>, vector<1x4x128xf32>
    %45 = vector.shape_cast %44 : vector<1x4x128xf32> to vector<4x128xf32>
    %cst_47 = arith.constant dense<0.000000e+00> : vector<256x128xf32>
    %46 = tpu.matmul %43, %45, %cst_47 {dimension_numbers = #tpu.dot_dimension_numbers<[1], [0], [0], [1], [0, 0, 1, 1], [], []>} : vector<256x4xf32>, vector<4x128xf32>, vector<256x128xf32> -> vector<256x128xf32>
    %47 = arith.addf %40, %46 : vector<256x128xf32>
    %c0_48 = arith.constant 0 : index
    %c2_49 = arith.constant 2 : index
    %c1_50 = arith.constant 1 : index
    %c0_51 = arith.constant 0 : index
    %48 = vector.load %arg1[%c0_48, %c2_49, %c1_50, %c0_51] : memref<1x18x18x4xf32, #tpu.memory_space<vmem>>, vector<1x16x16x4xf32>
    %49 = vector.shape_cast %48 : vector<1x16x16x4xf32> to vector<16x16x4xf32>
    %50 = vector.shape_cast %49 : vector<16x16x4xf32> to vector<256x4xf32>
    %c7 = arith.constant 7 : index
    %c0_52 = arith.constant 0 : index
    %c0_53 = arith.constant 0 : index
    %51 = vector.load %arg3[%c7, %c0_52, %c0_53] : memref<9x4x128xf32, #tpu.memory_space<vmem>>, vector<1x4x128xf32>
    %52 = vector.shape_cast %51 : vector<1x4x128xf32> to vector<4x128xf32>
    %cst_54 = arith.constant dense<0.000000e+00> : vector<256x128xf32>
    %53 = tpu.matmul %50, %52, %cst_54 {dimension_numbers = #tpu.dot_dimension_numbers<[1], [0], [0], [1], [0, 0, 1, 1], [], []>} : vector<256x4xf32>, vector<4x128xf32>, vector<256x128xf32> -> vector<256x128xf32>
    %54 = arith.addf %47, %53 : vector<256x128xf32>
    %c0_55 = arith.constant 0 : index
    %c2_56 = arith.constant 2 : index
    %c2_57 = arith.constant 2 : index
    %c0_58 = arith.constant 0 : index
    %55 = vector.load %arg1[%c0_55, %c2_56, %c2_57, %c0_58] : memref<1x18x18x4xf32, #tpu.memory_space<vmem>>, vector<1x16x16x4xf32>
    %56 = vector.shape_cast %55 : vector<1x16x16x4xf32> to vector<16x16x4xf32>
    %57 = vector.shape_cast %56 : vector<16x16x4xf32> to vector<256x4xf32>
    %c8 = arith.constant 8 : index
    %c0_59 = arith.constant 0 : index
    %c0_60 = arith.constant 0 : index
    %58 = vector.load %arg3[%c8, %c0_59, %c0_60] : memref<9x4x128xf32, #tpu.memory_space<vmem>>, vector<1x4x128xf32>
    %59 = vector.shape_cast %58 : vector<1x4x128xf32> to vector<4x128xf32>
    %cst_61 = arith.constant dense<0.000000e+00> : vector<256x128xf32>
    %60 = tpu.matmul %57, %59, %cst_61 {dimension_numbers = #tpu.dot_dimension_numbers<[1], [0], [0], [1], [0, 0, 1, 1], [], []>} : vector<256x4xf32>, vector<4x128xf32>, vector<256x128xf32> -> vector<256x128xf32>
    %61 = arith.addf %54, %60 : vector<256x128xf32>
    %c0_62 = arith.constant 0 : index
    %c0_63 = arith.constant 0 : index
    %c0_64 = arith.constant 0 : index
    %c0_65 = arith.constant 0 : index
    %62 = vector.load %arg2[%c0_62, %c0_63, %c0_64, %c0_65] : memref<1x18x18x32xf32, #tpu.memory_space<vmem>>, vector<1x16x16x32xf32>
    %63 = vector.shape_cast %62 : vector<1x16x16x32xf32> to vector<16x16x32xf32>
    %64 = vector.shape_cast %63 : vector<16x16x32xf32> to vector<256x32xf32>
    %c0_66 = arith.constant 0 : index
    %c0_67 = arith.constant 0 : index
    %c0_68 = arith.constant 0 : index
    %65 = vector.load %arg4[%c0_66, %c0_67, %c0_68] : memref<9x32x128xf32, #tpu.memory_space<vmem>>, vector<1x32x128xf32>
    %66 = vector.shape_cast %65 : vector<1x32x128xf32> to vector<32x128xf32>
    %cst_69 = arith.constant dense<0.000000e+00> : vector<256x128xf32>
    %67 = tpu.matmul %64, %66, %cst_69 {dimension_numbers = #tpu.dot_dimension_numbers<[1], [0], [0], [1], [0, 0, 1, 1], [], []>} : vector<256x32xf32>, vector<32x128xf32>, vector<256x128xf32> -> vector<256x128xf32>
    %c0_70 = arith.constant 0 : index
    %c0_71 = arith.constant 0 : index
    %c1_72 = arith.constant 1 : index
    %c0_73 = arith.constant 0 : index
    %68 = vector.load %arg2[%c0_70, %c0_71, %c1_72, %c0_73] : memref<1x18x18x32xf32, #tpu.memory_space<vmem>>, vector<1x16x16x32xf32>
    %69 = vector.shape_cast %68 : vector<1x16x16x32xf32> to vector<16x16x32xf32>
    %70 = vector.shape_cast %69 : vector<16x16x32xf32> to vector<256x32xf32>
    %c1_74 = arith.constant 1 : index
    %c0_75 = arith.constant 0 : index
    %c0_76 = arith.constant 0 : index
    %71 = vector.load %arg4[%c1_74, %c0_75, %c0_76] : memref<9x32x128xf32, #tpu.memory_space<vmem>>, vector<1x32x128xf32>
    %72 = vector.shape_cast %71 : vector<1x32x128xf32> to vector<32x128xf32>
    %cst_77 = arith.constant dense<0.000000e+00> : vector<256x128xf32>
    %73 = tpu.matmul %70, %72, %cst_77 {dimension_numbers = #tpu.dot_dimension_numbers<[1], [0], [0], [1], [0, 0, 1, 1], [], []>} : vector<256x32xf32>, vector<32x128xf32>, vector<256x128xf32> -> vector<256x128xf32>
    %74 = arith.addf %67, %73 : vector<256x128xf32>
    %c0_78 = arith.constant 0 : index
    %c0_79 = arith.constant 0 : index
    %c2_80 = arith.constant 2 : index
    %c0_81 = arith.constant 0 : index
    %75 = vector.load %arg2[%c0_78, %c0_79, %c2_80, %c0_81] : memref<1x18x18x32xf32, #tpu.memory_space<vmem>>, vector<1x16x16x32xf32>
    %76 = vector.shape_cast %75 : vector<1x16x16x32xf32> to vector<16x16x32xf32>
    %77 = vector.shape_cast %76 : vector<16x16x32xf32> to vector<256x32xf32>
    %c2_82 = arith.constant 2 : index
    %c0_83 = arith.constant 0 : index
    %c0_84 = arith.constant 0 : index
    %78 = vector.load %arg4[%c2_82, %c0_83, %c0_84] : memref<9x32x128xf32, #tpu.memory_space<vmem>>, vector<1x32x128xf32>
    %79 = vector.shape_cast %78 : vector<1x32x128xf32> to vector<32x128xf32>
    %cst_85 = arith.constant dense<0.000000e+00> : vector<256x128xf32>
    %80 = tpu.matmul %77, %79, %cst_85 {dimension_numbers = #tpu.dot_dimension_numbers<[1], [0], [0], [1], [0, 0, 1, 1], [], []>} : vector<256x32xf32>, vector<32x128xf32>, vector<256x128xf32> -> vector<256x128xf32>
    %81 = arith.addf %74, %80 : vector<256x128xf32>
    %c0_86 = arith.constant 0 : index
    %c1_87 = arith.constant 1 : index
    %c0_88 = arith.constant 0 : index
    %c0_89 = arith.constant 0 : index
    %82 = vector.load %arg2[%c0_86, %c1_87, %c0_88, %c0_89] : memref<1x18x18x32xf32, #tpu.memory_space<vmem>>, vector<1x16x16x32xf32>
    %83 = vector.shape_cast %82 : vector<1x16x16x32xf32> to vector<16x16x32xf32>
    %84 = vector.shape_cast %83 : vector<16x16x32xf32> to vector<256x32xf32>
    %c3_90 = arith.constant 3 : index
    %c0_91 = arith.constant 0 : index
    %c0_92 = arith.constant 0 : index
    %85 = vector.load %arg4[%c3_90, %c0_91, %c0_92] : memref<9x32x128xf32, #tpu.memory_space<vmem>>, vector<1x32x128xf32>
    %86 = vector.shape_cast %85 : vector<1x32x128xf32> to vector<32x128xf32>
    %cst_93 = arith.constant dense<0.000000e+00> : vector<256x128xf32>
    %87 = tpu.matmul %84, %86, %cst_93 {dimension_numbers = #tpu.dot_dimension_numbers<[1], [0], [0], [1], [0, 0, 1, 1], [], []>} : vector<256x32xf32>, vector<32x128xf32>, vector<256x128xf32> -> vector<256x128xf32>
    %88 = arith.addf %81, %87 : vector<256x128xf32>
    %c0_94 = arith.constant 0 : index
    %c1_95 = arith.constant 1 : index
    %c1_96 = arith.constant 1 : index
    %c0_97 = arith.constant 0 : index
    %89 = vector.load %arg2[%c0_94, %c1_95, %c1_96, %c0_97] : memref<1x18x18x32xf32, #tpu.memory_space<vmem>>, vector<1x16x16x32xf32>
    %90 = vector.shape_cast %89 : vector<1x16x16x32xf32> to vector<16x16x32xf32>
    %91 = vector.shape_cast %90 : vector<16x16x32xf32> to vector<256x32xf32>
    %c4_98 = arith.constant 4 : index
    %c0_99 = arith.constant 0 : index
    %c0_100 = arith.constant 0 : index
    %92 = vector.load %arg4[%c4_98, %c0_99, %c0_100] : memref<9x32x128xf32, #tpu.memory_space<vmem>>, vector<1x32x128xf32>
    %93 = vector.shape_cast %92 : vector<1x32x128xf32> to vector<32x128xf32>
    %cst_101 = arith.constant dense<0.000000e+00> : vector<256x128xf32>
    %94 = tpu.matmul %91, %93, %cst_101 {dimension_numbers = #tpu.dot_dimension_numbers<[1], [0], [0], [1], [0, 0, 1, 1], [], []>} : vector<256x32xf32>, vector<32x128xf32>, vector<256x128xf32> -> vector<256x128xf32>
    %95 = arith.addf %88, %94 : vector<256x128xf32>
    %c0_102 = arith.constant 0 : index
    %c1_103 = arith.constant 1 : index
    %c2_104 = arith.constant 2 : index
    %c0_105 = arith.constant 0 : index
    %96 = vector.load %arg2[%c0_102, %c1_103, %c2_104, %c0_105] : memref<1x18x18x32xf32, #tpu.memory_space<vmem>>, vector<1x16x16x32xf32>
    %97 = vector.shape_cast %96 : vector<1x16x16x32xf32> to vector<16x16x32xf32>
    %98 = vector.shape_cast %97 : vector<16x16x32xf32> to vector<256x32xf32>
    %c5_106 = arith.constant 5 : index
    %c0_107 = arith.constant 0 : index
    %c0_108 = arith.constant 0 : index
    %99 = vector.load %arg4[%c5_106, %c0_107, %c0_108] : memref<9x32x128xf32, #tpu.memory_space<vmem>>, vector<1x32x128xf32>
    %100 = vector.shape_cast %99 : vector<1x32x128xf32> to vector<32x128xf32>
    %cst_109 = arith.constant dense<0.000000e+00> : vector<256x128xf32>
    %101 = tpu.matmul %98, %100, %cst_109 {dimension_numbers = #tpu.dot_dimension_numbers<[1], [0], [0], [1], [0, 0, 1, 1], [], []>} : vector<256x32xf32>, vector<32x128xf32>, vector<256x128xf32> -> vector<256x128xf32>
    %102 = arith.addf %95, %101 : vector<256x128xf32>
    %c0_110 = arith.constant 0 : index
    %c2_111 = arith.constant 2 : index
    %c0_112 = arith.constant 0 : index
    %c0_113 = arith.constant 0 : index
    %103 = vector.load %arg2[%c0_110, %c2_111, %c0_112, %c0_113] : memref<1x18x18x32xf32, #tpu.memory_space<vmem>>, vector<1x16x16x32xf32>
    %104 = vector.shape_cast %103 : vector<1x16x16x32xf32> to vector<16x16x32xf32>
    %105 = vector.shape_cast %104 : vector<16x16x32xf32> to vector<256x32xf32>
    %c6_114 = arith.constant 6 : index
    %c0_115 = arith.constant 0 : index
    %c0_116 = arith.constant 0 : index
    %106 = vector.load %arg4[%c6_114, %c0_115, %c0_116] : memref<9x32x128xf32, #tpu.memory_space<vmem>>, vector<1x32x128xf32>
    %107 = vector.shape_cast %106 : vector<1x32x128xf32> to vector<32x128xf32>
    %cst_117 = arith.constant dense<0.000000e+00> : vector<256x128xf32>
    %108 = tpu.matmul %105, %107, %cst_117 {dimension_numbers = #tpu.dot_dimension_numbers<[1], [0], [0], [1], [0, 0, 1, 1], [], []>} : vector<256x32xf32>, vector<32x128xf32>, vector<256x128xf32> -> vector<256x128xf32>
    %109 = arith.addf %102, %108 : vector<256x128xf32>
    %c0_118 = arith.constant 0 : index
    %c2_119 = arith.constant 2 : index
    %c1_120 = arith.constant 1 : index
    %c0_121 = arith.constant 0 : index
    %110 = vector.load %arg2[%c0_118, %c2_119, %c1_120, %c0_121] : memref<1x18x18x32xf32, #tpu.memory_space<vmem>>, vector<1x16x16x32xf32>
    %111 = vector.shape_cast %110 : vector<1x16x16x32xf32> to vector<16x16x32xf32>
    %112 = vector.shape_cast %111 : vector<16x16x32xf32> to vector<256x32xf32>
    %c7_122 = arith.constant 7 : index
    %c0_123 = arith.constant 0 : index
    %c0_124 = arith.constant 0 : index
    %113 = vector.load %arg4[%c7_122, %c0_123, %c0_124] : memref<9x32x128xf32, #tpu.memory_space<vmem>>, vector<1x32x128xf32>
    %114 = vector.shape_cast %113 : vector<1x32x128xf32> to vector<32x128xf32>
    %cst_125 = arith.constant dense<0.000000e+00> : vector<256x128xf32>
    %115 = tpu.matmul %112, %114, %cst_125 {dimension_numbers = #tpu.dot_dimension_numbers<[1], [0], [0], [1], [0, 0, 1, 1], [], []>} : vector<256x32xf32>, vector<32x128xf32>, vector<256x128xf32> -> vector<256x128xf32>
    %116 = arith.addf %109, %115 : vector<256x128xf32>
    %c0_126 = arith.constant 0 : index
    %c2_127 = arith.constant 2 : index
    %c2_128 = arith.constant 2 : index
    %c0_129 = arith.constant 0 : index
    %117 = vector.load %arg2[%c0_126, %c2_127, %c2_128, %c0_129] : memref<1x18x18x32xf32, #tpu.memory_space<vmem>>, vector<1x16x16x32xf32>
    %118 = vector.shape_cast %117 : vector<1x16x16x32xf32> to vector<16x16x32xf32>
    %119 = vector.shape_cast %118 : vector<16x16x32xf32> to vector<256x32xf32>
    %c8_130 = arith.constant 8 : index
    %c0_131 = arith.constant 0 : index
    %c0_132 = arith.constant 0 : index
    %120 = vector.load %arg4[%c8_130, %c0_131, %c0_132] : memref<9x32x128xf32, #tpu.memory_space<vmem>>, vector<1x32x128xf32>
    %121 = vector.shape_cast %120 : vector<1x32x128xf32> to vector<32x128xf32>
    %cst_133 = arith.constant dense<0.000000e+00> : vector<256x128xf32>
    %122 = tpu.matmul %119, %121, %cst_133 {dimension_numbers = #tpu.dot_dimension_numbers<[1], [0], [0], [1], [0, 0, 1, 1], [], []>} : vector<256x32xf32>, vector<32x128xf32>, vector<256x128xf32> -> vector<256x128xf32>
    %123 = arith.addf %116, %122 : vector<256x128xf32>
    %c0_134 = arith.constant 0 : index
    %c0_135 = arith.constant 0 : index
    %124 = vector.load %arg5[%c0_134, %c0_135] : memref<1x128xf32, #tpu.memory_space<vmem>>, vector<1x128xf32>
    %125 = vector.broadcast %124 : vector<1x128xf32> to vector<256x128xf32>
    %126 = arith.addf %61, %125 : vector<256x128xf32>
    %c0_136 = arith.constant 0 : index
    %c0_137 = arith.constant 0 : index
    %127 = vector.load %arg6[%c0_136, %c0_137] : memref<1x128xf32, #tpu.memory_space<vmem>>, vector<1x128xf32>
    %128 = vector.broadcast %127 : vector<1x128xf32> to vector<256x128xf32>
    %129 = arith.addf %123, %128 : vector<256x128xf32>
    %130 = vector.extract_strided_slice %126 {offsets = [0, 0], sizes = [256, 32], strides = [1, 1]} : vector<256x128xf32> to vector<256x32xf32>
    %131 = vector.extract_strided_slice %129 {offsets = [0, 0], sizes = [256, 32], strides = [1, 1]} : vector<256x128xf32> to vector<256x32xf32>
    %132 = arith.addf %130, %131 : vector<256x32xf32>
    %133 = arith.negf %132 : vector<256x32xf32>
    %134 = math.exp %133 : vector<256x32xf32>
    %cst_138 = arith.constant 1.000000e+00 : f32
    %135 = vector.broadcast %cst_138 : f32 to vector<256x32xf32>
    %136 = arith.addf %135, %134 : vector<256x32xf32>
    %137 = arith.divf %135, %136 : vector<256x32xf32>
    %138 = vector.extract_strided_slice %126 {offsets = [0, 32], sizes = [256, 32], strides = [1, 1]} : vector<256x128xf32> to vector<256x32xf32>
    %139 = vector.extract_strided_slice %129 {offsets = [0, 32], sizes = [256, 32], strides = [1, 1]} : vector<256x128xf32> to vector<256x32xf32>
    %140 = arith.addf %138, %139 : vector<256x32xf32>
    %141 = arith.negf %140 : vector<256x32xf32>
    %142 = math.exp %141 : vector<256x32xf32>
    %cst_139 = arith.constant 1.000000e+00 : f32
    %143 = vector.broadcast %cst_139 : f32 to vector<256x32xf32>
    %144 = arith.addf %143, %142 : vector<256x32xf32>
    %145 = arith.divf %143, %144 : vector<256x32xf32>
    %146 = vector.extract_strided_slice %126 {offsets = [0, 64], sizes = [256, 32], strides = [1, 1]} : vector<256x128xf32> to vector<256x32xf32>
    %147 = vector.extract_strided_slice %129 {offsets = [0, 64], sizes = [256, 32], strides = [1, 1]} : vector<256x128xf32> to vector<256x32xf32>
    %148 = arith.mulf %145, %147 : vector<256x32xf32>
    %149 = arith.addf %146, %148 : vector<256x32xf32>
    %150 = math.tanh %149 : vector<256x32xf32>
    %c0_140 = arith.constant 0 : index
    %c1_141 = arith.constant 1 : index
    %c1_142 = arith.constant 1 : index
    %c0_143 = arith.constant 0 : index
    %151 = vector.load %arg2[%c0_140, %c1_141, %c1_142, %c0_143] : memref<1x18x18x32xf32, #tpu.memory_space<vmem>>, vector<1x16x16x32xf32>
    %152 = vector.shape_cast %151 : vector<1x16x16x32xf32> to vector<16x16x32xf32>
    %153 = vector.shape_cast %152 : vector<16x16x32xf32> to vector<256x32xf32>
    %cst_144 = arith.constant 1.000000e+00 : f32
    %154 = vector.broadcast %cst_144 : f32 to vector<256x32xf32>
    %155 = arith.subf %154, %137 : vector<256x32xf32>
    %156 = arith.mulf %155, %150 : vector<256x32xf32>
    %157 = arith.mulf %137, %153 : vector<256x32xf32>
    %158 = arith.addf %156, %157 : vector<256x32xf32>
    %c0_145 = arith.constant 0 : index
    %c0_146 = arith.constant 0 : index
    %c0_147 = arith.constant 0 : index
    %159 = vector.load %arg7[%c0_145, %c0_146, %c0_147] : memref<1x256x32xf32, #tpu.memory_space<vmem>>, vector<1x256x32xf32>
    %160 = vector.shape_cast %159 : vector<1x256x32xf32> to vector<256x32xf32>
    %161 = vector.shape_cast %158 : vector<256x32xf32> to vector<1x256x32xf32>
    tpu.vector_store %arg7[%c0_145, %c0_146, %c0_147], %161 {strides = array<i32>} : memref<1x256x32xf32, #tpu.memory_space<vmem>>, vector<1x256x32xf32>,
    return
  }
  func.func @transform_0(%arg0: i32) -> (i32, i32, i32, i32) {
    %c0_i32 = arith.constant 0 : i32
    %c0_i32_0 = arith.constant 0 : i32
    %c0_i32_1 = arith.constant 0 : i32
    %c0_i32_2 = arith.constant 0 : i32
    return %arg0, %c0_i32, %c0_i32_0, %c0_i32_1 : i32, i32, i32, i32
  }
  func.func @transform_1(%arg0: i32) -> (i32, i32, i32, i32) {
    %c0_i32 = arith.constant 0 : i32
    %c0_i32_0 = arith.constant 0 : i32
    %c0_i32_1 = arith.constant 0 : i32
    %c0_i32_2 = arith.constant 0 : i32
    return %arg0, %c0_i32, %c0_i32_0, %c0_i32_1 : i32, i32, i32, i32
  }
  func.func @transform_2(%arg0: i32) -> (i32, i32, i32) {
    %c0_i32 = arith.constant 0 : i32
    %c0_i32_0 = arith.constant 0 : i32
    %c0_i32_1 = arith.constant 0 : i32
    %c0_i32_2 = arith.constant 0 : i32
    return %c0_i32, %c0_i32_0, %c0_i32_1 : i32, i32, i32
  }
  func.func @transform_3(%arg0: i32) -> (i32, i32, i32) {
    %c0_i32 = arith.constant 0 : i32
    %c0_i32_0 = arith.constant 0 : i32
    %c0_i32_1 = arith.constant 0 : i32
    %c0_i32_2 = arith.constant 0 : i32
    return %c0_i32, %c0_i32_0, %c0_i32_1 : i32, i32, i32
  }
  func.func @transform_4(%arg0: i32) -> (i32, i32) {
    %c0_i32 = arith.constant 0 : i32
    %c0_i32_0 = arith.constant 0 : i32
    %c0_i32_1 = arith.constant 0 : i32
    return %c0_i32, %c0_i32_0 : i32, i32
  }
  func.func @transform_5(%arg0: i32) -> (i32, i32) {
    %c0_i32 = arith.constant 0 : i32
    %c0_i32_0 = arith.constant 0 : i32
    %c0_i32_1 = arith.constant 0 : i32
    return %c0_i32, %c0_i32_0 : i32, i32
  }
  func.func @transform_6(%arg0: i32) -> (i32, i32, i32) {
    %c0_i32 = arith.constant 0 : i32
    %c0_i32_0 = arith.constant 0 : i32
    %c0_i32_1 = arith.constant 0 : i32
    return %arg0, %c0_i32, %c0_i32_0 : i32, i32, i32
  }
}

</mosaic_0001>

<bundles_post_ra>
// kernel: tpu_custom_call.1
= control target key start
LH: loop header
LB: loop body
LE: loop exit
PB: predicated region body
PF: predicated region fallthrough
CT: control target
= control target key end

     0   :  { %s11091_s21 = smov 0   ;;  %s14555_s0 = inlined_call_operand.vmem [shape: f32[2,18,18,4], index: 0, kind: input, shape index: {}]   ;;  %s14556_s1 = inlined_call_operand.vmem [shape: f32[2,18,18,32], index: 1, kind: input, shape index: {}]   ;;  %s14557_s2 = inlined_call_operand.vmem [shape: f32[9,4,128], index: 2, kind: input, shape index: {}]   ;;  %s14558_s3 = inlined_call_operand.vmem [shape: f32[9,32,128], index: 3, kind: input, shape index: {}]   ;;  %s14559_s4 = inlined_call_operand.vmem [shape: f32[1,128], index: 4, kind: input, shape index: {}]   ;;  %s14560_s5 = inlined_call_operand.vmem [shape: f32[1,128], index: 5, kind: input, shape index: {}]   ;;  %s14561_s6 = inlined_call_operand.vmem [shape: f32[2,256,32], index: 6, kind: output, shape index: {}]  }
   0x1 LB: > { %s8178_s22 = sadd.s32 4294967295, %s11051_s21   ;;  %p8182_p0 = scmp.ge.s32.totalorder %s11051_s21, 1  ;;  %s11051_s21 = sphi %s11091_s21, %s16_s21  }
   0x2   : > { %p222_p1 = scmp.lt.s32.totalorder %s11051_s21, 3 }
   0x4   : > { %p223_p2 = pnand %p8182_p0, %p222_p1 }
   0x6   : > { %226 = sbr.rel (%p223_p2) target bundleno = 1163 (0x48b), region = 44 }
   0xb   : > { %v8187_v0 = vld [vmem:[%s14557_s2 + $0x4] sm:$0xf]  ;;  %vm436_vm0 = vcmask 1043456   ;;  %v304_v1 = vld [vmem:[%s14557_s2] sm:$0xf]  ;;  %p257_p3 = scmp.lt.s32.totalorder %s8178_s22, 1 }
   0xc   : > { %9854 = vmatprep.subr.msk.mxu0 %vm436_vm0, %v8187_v0  ;;  %9904 = vmatprep.subr.msk.mxu1 %vm436_vm0, %v304_v1  ;;  %v8254_v2 = vld [vmem:[%s14557_s2 + $0x8] sm:$0xf]  ;;  %v8320_v3 = vld [vmem:[%s14557_s2 + $0xc] sm:$0xf]  ;;  %vm339_vm1 = vcmask 31744   ;;  %vm3794_vm2 = vcmask 261120  }
   0xd   : > { %9855 = vmatpush3.msk.msra.mxu0 %vm436_vm0, %v8187_v0  ;;  %s14848_s22 = smov (!%p257_p3, %s8178_s22), 1  ;;  %9905 = vmatpush3.msk.msra.mxu1 %vm436_vm0, %v304_v1  ;;  %v11144_v10 = vld [vmem:[%s14557_s2 + $0x10] sm:$0xf]  ;;  %v11149_v11 = vld [vmem:[%s14557_s2 + $0x14] sm:$0xf]  ;;  %s11053_s16 = smov 96  }
   0xe   : > { %9954 = vmatprep.subr.msk.mxu0 %vm436_vm0, %v8254_v2  ;;  %10004 = vmatprep.subr.msk.mxu1 %vm436_vm0, %v8320_v3  ;;  %s10808_s7 = smul.u32 432, %s14848_s22  ;;  %s11054_s19 = smov 32  }
   0xf   : > { %s11055_s20 = smov 64   ;;  %s9232_s23 = sshll.u32 %s14848_s22, 8 }
  0x10   : > { %s11125_s10 = scalar_lea.vmem %s14555_s0, %s10808_s7  ;;  %s12053_s15 = scalar_lea.vmem %s14556_s1, %s10808_s7 }
  0x11   : > { %v305_v4 = vld [vmem:[%s11125_s10 + $0x1] sm:$0xff]  ;;  %v306_v6 = vld [vmem:[%s11125_s10 + $0x9] sm:$0xff]  ;;  %v11134_v8 = vld [vmem:[%s11125_s10 + $0x19] sm:$0xff]  ;;  %s14393_s26 = scalar_lea.vmem %s14561_s6, %s9232_s23 }
  0x12   : > { %v272_v5 = vld [vmem:[%s11125_s10] sm:$0xff]  ;;  %9856 = vmatprep.mubr.msk.f32.mxu0 %vm339_vm1, %v305_v4  ;;  %v273_v7 = vld [vmem:[%s11125_s10 + $0x8] sm:$0xff]  ;;  %v11137_v9 = vld [vmem:[%s11125_s10 + $0x18] sm:$0xff] }
  0x13   : > { %9906 = vmatprep.mubr.msk.f32.mxu1 %vm339_vm1, %v272_v5  ;;  %9857 = vmatmul.mubr.msk.f32.vlgmr.msra.gmra.mxu0 %vm339_vm1, %v306_v6  ;;  %v11154_v12 = vld [vmem:[%s11125_s10 + $0x21] sm:$0xff]  ;;  %v11164_v14 = vld [vmem:[%s11125_s10 + $0x31] sm:$0xff]  ;;  %v11182_v16 = vld [vmem:[%s11125_s10 + $0x39] sm:$0xff] }
  0x14   : > { %9907 = vmatmul.mubr.msk.f32.vlgmr.msra.gmra.mxu1 %vm339_vm1, %v273_v7  ;;  %9955 = vmatpush3.msk.msra.mxu0 %vm436_vm0, %v8254_v2  ;;  %v11157_v13 = vld [vmem:[%s11125_s10 + $0x20] sm:$0xff]  ;;  %v11167_v15 = vld [vmem:[%s11125_s10 + $0x30] sm:$0xff]  ;;  %v11185_v17 = vld [vmem:[%s11125_s10 + $0x38] sm:$0xff] }
  0x15   : > { %10005 = vmatpush3.msk.msra.mxu1 %vm436_vm0, %v8320_v3  ;;  %9859 = vmatprep.mubr.msk.f32.mxu0 %vm339_vm1, %v11134_v8  ;;  %14621 = vst [vmem:[#allocation2_spill] sm:$0xff] %v11185_v17  ;;  %v11188_v18 = vld [vmem:[%s11125_s10 + $0x49] sm:$0xff]  ;;  %v11202_v20 = vld [vmem:[%s11125_s10 + $0x51] sm:$0xff]  ;;  %v11208_v22 = vld [vmem:[%s11125_s10 + $0x61] sm:$0xff] }
  0x16   : > { %9909 = vmatprep.mubr.msk.f32.mxu1 %vm339_vm1, %v11137_v9  ;;  %10054 = vmatprep.subr.msk.mxu0 %vm436_vm0, %v11144_v10  ;;  %v11191_v19 = vld [vmem:[%s11125_s10 + $0x48] sm:$0xff]  ;;  %v11205_v21 = vld [vmem:[%s11125_s10 + $0x50] sm:$0xff]  ;;  %v11211_v23 = vld [vmem:[%s11125_s10 + $0x60] sm:$0xff] }
  0x17   : > { %10104 = vmatprep.subr.msk.mxu1 %vm436_vm0, %v11149_v11  ;;  %9860 = vmatmul.mubr.msk.f32.gmra.mxu0 %vm339_vm1, %v11154_v12  ;;  %14622 = vst [vmem:[#allocation3_spill] sm:$0xff] %v11191_v19  ;;  %14623 = vst [vmem:[#allocation4_spill] sm:$0xff] %v11205_v21  ;;  %v11222_v24 = vld [vmem:[%s11125_s10 + $0x69] sm:$0xff]  ;;  %v11228_v26 = vld [vmem:[%s11125_s10 + $0x79] sm:$0xff] }
  0x18   : > { %9910 = vmatmul.mubr.msk.f32.gmra.mxu1 %vm339_vm1, %v11157_v13  ;;  %9862 = vmatprep.mubr.msk.f32.mxu0 %vm339_vm1, %v11164_v14  ;;  %14624 = vst [vmem:[#allocation5_spill] sm:$0xff] %v11211_v23  ;;  %v11225_v25 = vld [vmem:[%s11125_s10 + $0x68] sm:$0xff]  ;;  %v11231_v27 = vld [vmem:[%s11125_s10 + $0x78] sm:$0xff]  ;;  %v11245_v29 = vld [vmem:[%s11125_s10 + $0x80] sm:$0xff] }
  0x19   : > { %9912 = vmatprep.mubr.msk.f32.mxu1 %vm339_vm1, %v11167_v15  ;;  %14625 = vst [vmem:[#allocation6_spill] sm:$0xff] %v11225_v25  ;;  %14626 = vst [vmem:[#allocation7_spill] sm:$0xff] %v11231_v27  ;;  %v11242_v28 = vld [vmem:[%s11125_s10 + $0x81] sm:$0xff]  ;;  %v11248_v30 = vld [vmem:[%s11125_s10 + $0x91] sm:$0xff] }
  0x1a   : > { %14627 = vst [vmem:[#allocation8_spill] sm:$0xff] %v11245_v29  ;;  %v11251_v31 = vld [vmem:[%s11125_s10 + $0x90] sm:$0xff]  ;;  %v11262_v32 = vld [vmem:[%s11125_s10 + $0x99] sm:$0xff]  ;;  %v11271_v35 = vld [vmem:[%s11125_s10 + $0xa8] sm:$0xff] }
  0x1b   : > { %9863 = vmatmul.mubr.msk.f32.gmra.mxu0 %vm339_vm1, %v11182_v16  ;;  %14628 = vst [vmem:[#allocation9_spill] sm:$0xff] %v11251_v31  ;;  %v11265_v33 = vld [vmem:[%s11125_s10 + $0x98] sm:$0xff]  ;;  %v11268_v34 = vld [vmem:[%s11125_s10 + $0xa9] sm:$0xff]  ;;  %14630 = vst [vmem:[#allocation11_spill] sm:$0xff] %v11271_v35 }
  0x1c   : > { %9913 = vmatmul.mubr.msk.f32.gmra.mxu1 %vm339_vm1, %v11185_v17  ;;  %9865 = vmatprep.mubr.msk.f32.mxu0 %vm339_vm1, %v11188_v18  ;;  %14629 = vst [vmem:[#allocation10_spill] sm:$0xff] %v11265_v33  ;;  %v11282_v36 = vld [vmem:[%s11125_s10 + $0xb1] sm:$0xff]  ;;  %v11288_v38 = vld [vmem:[%s11125_s10 + $0xc1] sm:$0xff]  ;;  %v11302_v40 = vld [vmem:[%s11125_s10 + $0xc9] sm:$0xff] }
  0x1d   : > { %9915 = vmatprep.mubr.msk.f32.mxu1 %vm339_vm1, %v11191_v19  ;;  %v11285_v37 = vld [vmem:[%s11125_s10 + $0xb0] sm:$0xff]  ;;  %v11291_v39 = vld [vmem:[%s11125_s10 + $0xc0] sm:$0xff]  ;;  %v11305_v41 = vld [vmem:[%s11125_s10 + $0xc8] sm:$0xff] }
  0x1e   : > { %14631 = vst [vmem:[#allocation12_spill] sm:$0xff] %v11285_v37  ;;  %14632 = vst [vmem:[#allocation13_spill] sm:$0xff] %v11291_v39  ;;  %v11308_v42 = vld [vmem:[%s11125_s10 + $0xd9] sm:$0xff]  ;;  %v11322_v44 = vld [vmem:[%s11125_s10 + $0xe1] sm:$0xff] }
  0x1f   : > { %9866 = vmatmul.mubr.msk.f32.gmra.mxu0 %vm339_vm1, %v11202_v20  ;;  %14633 = vst [vmem:[#allocation14_spill] sm:$0xff] %v11305_v41  ;;  %v11311_v43 = vld [vmem:[%s11125_s10 + $0xd8] sm:$0xff]  ;;  %v11325_v45 = vld [vmem:[%s11125_s10 + $0xe0] sm:$0xff]  ;;  %v11331_v47 = vld [vmem:[%s11125_s10 + $0xf0] sm:$0xff] }
  0x20   : > { %9916 = vmatmul.mubr.msk.f32.gmra.mxu1 %vm339_vm1, %v11205_v21  ;;  %9868 = vmatprep.mubr.msk.f32.mxu0 %vm339_vm1, %v11208_v22  ;;  %14634 = vst [vmem:[#allocation15_spill] sm:$0xff] %v11311_v43  ;;  %14635 = vst [vmem:[#allocation16_spill] sm:$0xff] %v11325_v45  ;;  %v11328_v46 = vld [vmem:[%s11125_s10 + $0xf1] sm:$0xff]  ;;  %v11342_v48 = vld [vmem:[%s11125_s10 + $0xf9] sm:$0xff] }
  0x21   : > { %9918 = vmatprep.mubr.msk.f32.mxu1 %vm339_vm1, %v11211_v23  ;;  %14636 = vst [vmem:[#allocation17_spill] sm:$0xff] %v11331_v47  ;;  %v11345_v49 = vld [vmem:[%s11125_s10 + $0xf8] sm:$0xff]  ;;  %v11348_v50 = vld [vmem:[%s11125_s10 + $0x109] sm:$0xff]  ;;  %v11368_v54 = vld [vmem:[%s11125_s10 + $0x121] sm:$0xff] }
  0x22   : > { %14637 = vst [vmem:[#allocation18_spill] sm:$0xff] %v11345_v49  ;;  %v11351_v51 = vld [vmem:[%s11125_s10 + $0x108] sm:$0xff]  ;;  %v11362_v52 = vld [vmem:[%s11125_s10 + $0x111] sm:$0xff]  ;;  %v11371_v55 = vld [vmem:[%s11125_s10 + $0x120] sm:$0xff] }
  0x23   : > { %9869 = vmatmul.mubr.msk.f32.gmra.mxu0 %vm339_vm1, %v11222_v24  ;;  %14638 = vst [vmem:[#allocation19_spill] sm:$0xff] %v11351_v51  ;;  %v11365_v53 = vld [vmem:[%s11125_s10 + $0x110] sm:$0xff]  ;;  %14640 = vst [vmem:[#allocation21_spill] sm:$0xff] %v11371_v55  ;;  %v11385_v57 = vld [vmem:[%s11125_s10 + $0x128] sm:$0xff] }
  0x24   : > { %9919 = vmatmul.mubr.msk.f32.gmra.mxu1 %vm339_vm1, %v11225_v25  ;;  %9871 = vmatprep.mubr.msk.f32.mxu0 %vm339_vm1, %v11228_v26  ;;  %14639 = vst [vmem:[#allocation20_spill] sm:$0xff] %v11365_v53  ;;  %v11382_v56 = vld [vmem:[%s11125_s10 + $0x129] sm:$0xff]  ;;  %14641 = vst [vmem:[#allocation22_spill] sm:$0xff] %v11385_v57  ;;  %v11388_v58 = vld [vmem:[%s11125_s10 + $0x139] sm:$0xff] }
  0x25   : > { %9921 = vmatprep.mubr.msk.f32.mxu1 %vm339_vm1, %v11231_v27  ;;  %v11391_v59 = vld [vmem:[%s11125_s10 + $0x138] sm:$0xff]  ;;  %v11402_v60 = vld [vmem:[%s11125_s10 + $0x141] sm:$0xff]  ;;  %v11411_v63 = vld [vmem:[%s11125_s10 + $0x150] sm:$0xff] }
  0x26   : > { %14642 = vst [vmem:[#allocation23_spill] sm:$0xff] %v11391_v59  ;;  %v11405_v61 = vld [vmem:[%s11125_s10 + $0x140] sm:$0xff]  ;;  %v11408_v62 = vld [vmem:[%s11125_s10 + $0x151] sm:$0xff]  ;;  %14644 = vst [vmem:[#allocation25_spill] sm:$0xff] %v11411_v63 }
  0x27   : > { %9872 = vmatmul.mubr.msk.f32.gmra.mxu0 %vm339_vm1, %v11242_v28  ;;  %14643 = vst [vmem:[#allocation24_spill] sm:$0xff] %v11405_v61  ;;  %v11422_v0 = vld [vmem:[%s11125_s10 + $0x159] sm:$0xff]  ;;  %v11428_v2 = vld [vmem:[%s11125_s10 + $0x169] sm:$0xff]  ;;  %v11442_v4 = vld [vmem:[%s11125_s10 + $0x171] sm:$0xff] }
  0x28   : > { %9922 = vmatmul.mubr.msk.f32.gmra.mxu1 %vm339_vm1, %v11245_v29  ;;  %9874 = vmatprep.mubr.msk.f32.mxu0 %vm339_vm1, %v11248_v30  ;;  %v11425_v1 = vld [vmem:[%s11125_s10 + $0x158] sm:$0xff]  ;;  %14646 = vst [vmem:[#allocation27_spill] sm:$0xff] %v11428_v2  ;;  %v11431_v3 = vld [vmem:[%s11125_s10 + $0x168] sm:$0xff]  ;;  %14648 = vst [vmem:[#allocation29_spill] sm:$0xff] %v11442_v4 }
  0x29   : > { %9924 = vmatprep.mubr.msk.f32.mxu1 %vm339_vm1, %v11251_v31  ;;  %14645 = vst [vmem:[#allocation26_spill] sm:$0xff] %v11425_v1  ;;  %14647 = vst [vmem:[#allocation28_spill] sm:$0xff] %v11431_v3  ;;  %v11445_v5 = vld [vmem:[%s11125_s10 + $0x170] sm:$0xff]  ;;  %v989_v6 = vld [vmem:[%s11125_s10 + $0x2] sm:$0xff] }
  0x2a   : > { %v990_v7 = vld [vmem:[%s11125_s10 + $0xa] sm:$0xff] }
  0x2b   : > { %9875 = vmatmul.mubr.msk.f32.gmra.mxu0 %vm339_vm1, %v11262_v32 }
  0x2c   : > { %9925 = vmatmul.mubr.msk.f32.gmra.mxu1 %vm339_vm1, %v11265_v33  ;;  %9877 = vmatprep.mubr.msk.f32.mxu0 %vm339_vm1, %v11268_v34 }
  0x2d   : > { %9927 = vmatprep.mubr.msk.f32.mxu1 %vm339_vm1, %v11271_v35 }
  0x2f   : > { %9878 = vmatmul.mubr.msk.f32.gmra.mxu0 %vm339_vm1, %v11282_v36 }
  0x30   : > { %9928 = vmatmul.mubr.msk.f32.gmra.mxu1 %vm339_vm1, %v11285_v37  ;;  %9880 = vmatprep.mubr.msk.f32.mxu0 %vm339_vm1, %v11288_v38 }
  0x31   : > { %9930 = vmatprep.mubr.msk.f32.mxu1 %vm339_vm1, %v11291_v39 }
  0x33   : > { %9881 = vmatmul.mubr.msk.f32.gmra.mxu0 %vm339_vm1, %v11302_v40 }
  0x34   : > { %9931 = vmatmul.mubr.msk.f32.gmra.mxu1 %vm339_vm1, %v11305_v41  ;;  %9883 = vmatprep.mubr.msk.f32.mxu0 %vm339_vm1, %v11308_v42 }
  0x35   : > { %9933 = vmatprep.mubr.msk.f32.mxu1 %vm339_vm1, %v11311_v43 }
  0x37   : > { %9884 = vmatmul.mubr.msk.f32.gmra.mxu0 %vm339_vm1, %v11322_v44 }
  0x38   : > { %9934 = vmatmul.mubr.msk.f32.gmra.mxu1 %vm339_vm1, %v11325_v45  ;;  %9886 = vmatprep.mubr.msk.f32.mxu0 %vm339_vm1, %v11328_v46 }
  0x39   : > { %9936 = vmatprep.mubr.msk.f32.mxu1 %vm339_vm1, %v11331_v47 }
  0x3b   : > { %9887 = vmatmul.mubr.msk.f32.gmra.mxu0 %vm339_vm1, %v11342_v48 }
  0x3c   : > { %9937 = vmatmul.mubr.msk.f32.gmra.mxu1 %vm339_vm1, %v11345_v49  ;;  %9889 = vmatprep.mubr.msk.f32.mxu0 %vm339_vm1, %v11348_v50 }
  0x3d   : > { %9939 = vmatprep.mubr.msk.f32.mxu1 %vm339_vm1, %v11351_v51 }
  0x3f   : > { %9890 = vmatmul.mubr.msk.f32.gmra.mxu0 %vm339_vm1, %v11362_v52 }
  0x40   : > { %9940 = vmatmul.mubr.msk.f32.gmra.mxu1 %vm339_vm1, %v11365_v53  ;;  %9892 = vmatprep.mubr.msk.f32.mxu0 %vm339_vm1, %v11368_v54 }
  0x41   : > { %9942 = vmatprep.mubr.msk.f32.mxu1 %vm339_vm1, %v11371_v55 }
  0x43   : > { %9893 = vmatmul.mubr.msk.f32.gmra.mxu0 %vm339_vm1, %v11382_v56 }
  0x44   : > { %9943 = vmatmul.mubr.msk.f32.gmra.mxu1 %vm339_vm1, %v11385_v57  ;;  %9895 = vmatprep.mubr.msk.f32.mxu0 %vm339_vm1, %v11388_v58 }
  0x45   : > { %9945 = vmatprep.mubr.msk.f32.mxu1 %vm339_vm1, %v11391_v59 }
  0x47   : > { %9896 = vmatmul.mubr.msk.f32.gmra.mxu0 %vm339_vm1, %v11402_v60 }
  0x48   : > { %9946 = vmatmul.mubr.msk.f32.gmra.mxu1 %vm339_vm1, %v11405_v61  ;;  %9898 = vmatprep.mubr.msk.f32.mxu0 %vm339_vm1, %v11408_v62 }
  0x49   : > { %9948 = vmatprep.mubr.msk.f32.mxu1 %vm339_vm1, %v11411_v63 }
  0x4b   : > { %9899 = vmatmul.mubr.msk.f32.gmra.mxu0 %vm339_vm1, %v11422_v0 }
  0x4c   : > { %9949 = vmatmul.mubr.msk.f32.gmra.mxu1 %vm339_vm1, %v11425_v1  ;;  %9901 = vmatprep.mubr.msk.f32.mxu0 %vm339_vm1, %v11428_v2  ;;  %v11457_v2 = vld [vmem:[%s11125_s10 + $0x1a] sm:$0xff] }
  0x4d   : > { %9951 = vmatprep.mubr.msk.f32.mxu1 %vm339_vm1, %v11431_v3 }
  0x4f   : > { %9902 = vmatmul.mubr.msk.f32.gmra.mxu0 %vm339_vm1, %v11442_v4  ;;  %v11465_v4 = vld [vmem:[%s14557_s2 + $0x18] sm:$0xf] }
  0x50   : > { %9952 = vmatmul.mubr.msk.f32.gmra.mxu1 %vm339_vm1, %v11445_v5  ;;  %9956 = vmatprep.mubr.msk.f32.mxu0 %vm339_vm1, %v989_v6  ;;  %v11470_v6 = vld [vmem:[%s14557_s2 + $0x1c] sm:$0xf] }
  0x51   : > { %10006 = vmatprep.mubr.msk.f32.mxu1 %vm339_vm1, %v11137_v9  ;;  %v11477_v9 = vld [vmem:[%s11125_s10 + $0x22] sm:$0xff] }
  0x53   : > { %9957 = vmatmul.mubr.msk.f32.vlgmr.msra.gmra.mxu0 %vm339_vm1, %v990_v7  ;;  %v11513_v7 = vld [vmem:[%s11125_s10 + $0x52] sm:$0xff] }
  0x54   : > { %10007 = vmatmul.mubr.msk.f32.vlgmr.msra.gmra.mxu1 %vm339_vm1, %v11157_v13  ;;  %10055 = vmatpush3.msk.msra.mxu0 %vm436_vm0, %v11144_v10  ;;  %v11484_v13 = vld [vmem:[%s11125_s10 + $0x32] sm:$0xff]  ;;  %v11499_v10 = vld [vmem:[%s11125_s10 + $0x3a] sm:$0xff] }
  0x55   : > { %10105 = vmatpush3.msk.msra.mxu1 %vm436_vm0, %v11149_v11  ;;  %9959 = vmatprep.mubr.msk.f32.mxu0 %vm339_vm1, %v11457_v2  ;;  %v11502_v11 = vld [vmem:[%s11125_s10 + $0x4a] sm:$0xff] }
  0x56   : > { %10009 = vmatprep.mubr.msk.f32.mxu1 %vm339_vm1, %v11167_v15  ;;  %10154 = vmatprep.subr.msk.mxu0 %vm436_vm0, %v11465_v4 }
  0x57   : > { %10204 = vmatprep.subr.msk.mxu1 %vm436_vm0, %v11470_v6  ;;  %9960 = vmatmul.mubr.msk.f32.gmra.mxu0 %vm339_vm1, %v11477_v9 }
  0x58   : > { %10010 = vmatmul.mubr.msk.f32.gmra.mxu1 %vm339_vm1, %v11185_v17  ;;  %9962 = vmatprep.mubr.msk.f32.mxu0 %vm339_vm1, %v11484_v13  ;;  %v11670_v17 = vld [vmem:[%s11125_s10 + $0x16a] sm:$0xff] }
  0x59   : > { %10012 = vmatprep.mubr.msk.f32.mxu1 %vm339_vm1, %v11191_v19  ;;  %v11516_v19 = vld [vmem:[%s11125_s10 + $0x62] sm:$0xff] }
  0x5b   : > { %9963 = vmatmul.mubr.msk.f32.gmra.mxu0 %vm339_vm1, %v11499_v10 }
  0x5c   : > { %10013 = vmatmul.mubr.msk.f32.gmra.mxu1 %vm339_vm1, %v11205_v21  ;;  %9965 = vmatprep.mubr.msk.f32.mxu0 %vm339_vm1, %v11502_v11  ;;  %v11527_v21 = vld [vmem:[%s11125_s10 + $0x6a] sm:$0xff] }
  0x5d   : > { %10015 = vmatprep.mubr.msk.f32.mxu1 %vm339_vm1, %v11211_v23  ;;  %v11530_v23 = vld [vmem:[%s11125_s10 + $0x7a] sm:$0xff] }
  0x5f   : > { %9966 = vmatmul.mubr.msk.f32.gmra.mxu0 %vm339_vm1, %v11513_v7 }
  0x60   : > { %10016 = vmatmul.mubr.msk.f32.gmra.mxu1 %vm339_vm1, %v11225_v25  ;;  %9968 = vmatprep.mubr.msk.f32.mxu0 %vm339_vm1, %v11516_v19  ;;  %v11541_v25 = vld [vmem:[%s11125_s10 + $0x82] sm:$0xff] }
  0x61   : > { %10018 = vmatprep.mubr.msk.f32.mxu1 %vm339_vm1, %v11231_v27  ;;  %v11544_v27 = vld [vmem:[%s11125_s10 + $0x92] sm:$0xff] }
  0x63   : > { %9969 = vmatmul.mubr.msk.f32.gmra.mxu0 %vm339_vm1, %v11527_v21 }
  0x64   : > { %10019 = vmatmul.mubr.msk.f32.gmra.mxu1 %vm339_vm1, %v11245_v29  ;;  %9971 = vmatprep.mubr.msk.f32.mxu0 %vm339_vm1, %v11530_v23  ;;  %v11555_v29 = vld [vmem:[%s11125_s10 + $0x9a] sm:$0xff] }
  0x65   : > { %10021 = vmatprep.mubr.msk.f32.mxu1 %vm339_vm1, %v11251_v31  ;;  %v11558_v31 = vld [vmem:[%s11125_s10 + $0xaa] sm:$0xff] }
  0x67   : > { %9972 = vmatmul.mubr.msk.f32.gmra.mxu0 %vm339_vm1, %v11541_v25 }
  0x68   : > { %10022 = vmatmul.mubr.msk.f32.gmra.mxu1 %vm339_vm1, %v11265_v33  ;;  %9974 = vmatprep.mubr.msk.f32.mxu0 %vm339_vm1, %v11544_v27  ;;  %v11569_v33 = vld [vmem:[%s11125_s10 + $0xb2] sm:$0xff] }
  0x69   : > { %10024 = vmatprep.mubr.msk.f32.mxu1 %vm339_vm1, %v11271_v35  ;;  %v11572_v35 = vld [vmem:[%s11125_s10 + $0xc2] sm:$0xff] }
  0x6b   : > { %9975 = vmatmul.mubr.msk.f32.gmra.mxu0 %vm339_vm1, %v11555_v29 }
  0x6c   : > { %10025 = vmatmul.mubr.msk.f32.gmra.mxu1 %vm339_vm1, %v11285_v37  ;;  %9977 = vmatprep.mubr.msk.f32.mxu0 %vm339_vm1, %v11558_v31  ;;  %v11583_v37 = vld [vmem:[%s11125_s10 + $0xca] sm:$0xff] }
  0x6d   : > { %10027 = vmatprep.mubr.msk.f32.mxu1 %vm339_vm1, %v11291_v39  ;;  %v11586_v39 = vld [vmem:[%s11125_s10 + $0xda] sm:$0xff] }
  0x6f   : > { %9978 = vmatmul.mubr.msk.f32.gmra.mxu0 %vm339_vm1, %v11569_v33 }
  0x70   : > { %10028 = vmatmul.mubr.msk.f32.gmra.mxu1 %vm339_vm1, %v11305_v41  ;;  %9980 = vmatprep.mubr.msk.f32.mxu0 %vm339_vm1, %v11572_v35  ;;  %v11597_v41 = vld [vmem:[%s11125_s10 + $0xe2] sm:$0xff] }
  0x71   : > { %10030 = vmatprep.mubr.msk.f32.mxu1 %vm339_vm1, %v11311_v43  ;;  %v11600_v43 = vld [vmem:[%s11125_s10 + $0xf2] sm:$0xff] }
  0x73   : > { %9981 = vmatmul.mubr.msk.f32.gmra.mxu0 %vm339_vm1, %v11583_v37 }
  0x74   : > { %10031 = vmatmul.mubr.msk.f32.gmra.mxu1 %vm339_vm1, %v11325_v45  ;;  %9983 = vmatprep.mubr.msk.f32.mxu0 %vm339_vm1, %v11586_v39  ;;  %v11611_v45 = vld [vmem:[%s11125_s10 + $0xfa] sm:$0xff] }
  0x75   : > { %10033 = vmatprep.mubr.msk.f32.mxu1 %vm339_vm1, %v11331_v47  ;;  %v11614_v47 = vld [vmem:[%s11125_s10 + $0x10a] sm:$0xff] }
  0x77   : > { %9984 = vmatmul.mubr.msk.f32.gmra.mxu0 %vm339_vm1, %v11597_v41 }
  0x78   : > { %10034 = vmatmul.mubr.msk.f32.gmra.mxu1 %vm339_vm1, %v11345_v49  ;;  %9986 = vmatprep.mubr.msk.f32.mxu0 %vm339_vm1, %v11600_v43  ;;  %v11625_v49 = vld [vmem:[%s11125_s10 + $0x112] sm:$0xff] }
  0x79   : > { %10036 = vmatprep.mubr.msk.f32.mxu1 %vm339_vm1, %v11351_v51  ;;  %v11628_v51 = vld [vmem:[%s11125_s10 + $0x122] sm:$0xff] }
  0x7b   : > { %9987 = vmatmul.mubr.msk.f32.gmra.mxu0 %vm339_vm1, %v11611_v45 }
  0x7c   : > { %10037 = vmatmul.mubr.msk.f32.gmra.mxu1 %vm339_vm1, %v11365_v53  ;;  %9989 = vmatprep.mubr.msk.f32.mxu0 %vm339_vm1, %v11614_v47  ;;  %v11642_v53 = vld [vmem:[%s11125_s10 + $0x13a] sm:$0xff] }
  0x7d   : > { %10039 = vmatprep.mubr.msk.f32.mxu1 %vm339_vm1, %v11371_v55  ;;  %v11639_v55 = vld [vmem:[%s11125_s10 + $0x12a] sm:$0xff] }
  0x7f   : > { %9990 = vmatmul.mubr.msk.f32.gmra.mxu0 %vm339_vm1, %v11625_v49 }
  0x80   : > { %10040 = vmatmul.mubr.msk.f32.gmra.mxu1 %vm339_vm1, %v11385_v57  ;;  %9992 = vmatprep.mubr.msk.f32.mxu0 %vm339_vm1, %v11628_v51  ;;  %v11653_v57 = vld [vmem:[%s11125_s10 + $0x142] sm:$0xff] }
  0x81   : > { %10042 = vmatprep.mubr.msk.f32.mxu1 %vm339_vm1, %v11391_v59  ;;  %v11656_v59 = vld [vmem:[%s11125_s10 + $0x152] sm:$0xff] }
  0x83   : > { %9993 = vmatmul.mubr.msk.f32.gmra.mxu0 %vm339_vm1, %v11639_v55 }
  0x84   : > { %10043 = vmatmul.mubr.msk.f32.gmra.mxu1 %vm339_vm1, %v11405_v61  ;;  %9995 = vmatprep.mubr.msk.f32.mxu0 %vm339_vm1, %v11642_v53  ;;  %v11667_v61 = vld [vmem:[%s11125_s10 + $0x15a] sm:$0xff] }
  0x85   : > { %10045 = vmatprep.mubr.msk.f32.mxu1 %vm339_vm1, %v11411_v63  ;;  %v11673_v63 = vld [vmem:[%s11125_s10 + $0x180] sm:$0xff] }
  0x86   : > { %14649 = vst [vmem:[#allocation30_spill] sm:$0xff] %v11673_v63 }
  0x87   : > { %9996 = vmatmul.mubr.msk.f32.gmra.mxu0 %vm339_vm1, %v11653_v57 }
  0x88   : > { %10046 = vmatmul.mubr.msk.f32.gmra.mxu1 %vm339_vm1, %v11425_v1  ;;  %9998 = vmatprep.mubr.msk.f32.mxu0 %vm339_vm1, %v11656_v59  ;;  %v11684_v1 = vld [vmem:[%s11125_s10 + $0x172] sm:$0xff] }
  0x89   : > { %10048 = vmatprep.mubr.msk.f32.mxu1 %vm339_vm1, %v11431_v3  ;;  %v11687_v3 = vld [vmem:[%s11125_s10 + $0x188] sm:$0xff] }
  0x8a   : > { %14650 = vst [vmem:[#allocation31_spill] sm:$0xff] %v11687_v3 }
  0x8b   : > { %9999 = vmatmul.mubr.msk.f32.gmra.mxu0 %vm339_vm1, %v11667_v61 }
  0x8c   : > { %10049 = vmatmul.mubr.msk.f32.gmra.mxu1 %vm339_vm1, %v11445_v5  ;;  %10001 = vmatprep.mubr.msk.f32.mxu0 %vm339_vm1, %v11670_v17 }
  0x8d   : > { %10051 = vmatprep.mubr.msk.f32.mxu1 %vm339_vm1, %v11673_v63  ;;  %v11704_v63 = vld [vmem:[%s14557_s2 + $0x20] sm:$0xf] }
  0x8f   : > { %10002 = vmatmul.mubr.msk.f32.gmra.mxu0 %vm339_vm1, %v11684_v1 }
  0x90   : > { %10052 = vmatmul.mubr.msk.f32.gmra.mxu1 %vm339_vm1, %v11687_v3  ;;  %10056 = vmatprep.mubr.msk.f32.mxu0 %vm339_vm1, %v11134_v8  ;;  %v11709_v3 = vld [vmem:[%s14558_s3 + $0x38] sm:$0xff]  ;;  %v14651_v8 = vld [vmem:[#allocation27_spill] sm:$0xff] }
  0x91   : > { %10106 = vmatprep.mubr.msk.f32.mxu1 %vm339_vm1, %v11457_v2 }
  0x93   : > { %10057 = vmatmul.mubr.msk.f32.vlgmr.msra.gmra.mxu0 %vm339_vm1, %v11154_v12  ;;  %v11827_v12 = vld [vmem:[%s11125_s10 + $0x181] sm:$0xff] }
  0x94   : > { %10107 = vmatmul.mubr.msk.f32.vlgmr.msra.gmra.mxu1 %vm339_vm1, %v11477_v9  ;;  %10155 = vmatpush3.msk.msra.mxu0 %vm436_vm0, %v11465_v4  ;;  %v11915_v9 = vld [vmem:[%s14558_s3 + $0x58] sm:$0xff] }
  0x95   : > { %10205 = vmatpush3.msk.msra.mxu1 %vm436_vm0, %v11470_v6  ;;  %10059 = vmatprep.mubr.msk.f32.mxu0 %vm339_vm1, %v11164_v14  ;;  %v14659_v6 = vld [vmem:[#allocation8_spill] sm:$0xff] }
  0x96   : > { %10109 = vmatprep.mubr.msk.f32.mxu1 %vm339_vm1, %v11484_v13  ;;  %10254 = vmatprep.subr.msk.mxu0 %vm436_vm0, %v11704_v63 }
  0x97   : > { %10304 = vmatprep.subr.mxu1 %v11709_v3  ;;  %10060 = vmatmul.mubr.msk.f32.gmra.mxu0 %vm339_vm1, %v11182_v16 }
  0x98   : > { %10110 = vmatmul.mubr.msk.f32.gmra.mxu1 %vm339_vm1, %v11499_v10  ;;  %10062 = vmatprep.mubr.msk.f32.mxu0 %vm339_vm1, %v11188_v18 }
  0x99   : > { %10112 = vmatprep.mubr.msk.f32.mxu1 %vm339_vm1, %v11502_v11 }
  0x9b   : > { %10063 = vmatmul.mubr.msk.f32.gmra.mxu0 %vm339_vm1, %v11202_v20 }
  0x9c   : > { %10113 = vmatmul.mubr.msk.f32.gmra.mxu1 %vm339_vm1, %v11513_v7  ;;  %10065 = vmatprep.mubr.msk.f32.mxu0 %vm339_vm1, %v11208_v22 }
  0x9d   : > { %10115 = vmatprep.mubr.msk.f32.mxu1 %vm339_vm1, %v11516_v19 }
  0x9f   : > { %10066 = vmatmul.mubr.msk.f32.gmra.mxu0 %vm339_vm1, %v11222_v24 }
  0xa0   : > { %10116 = vmatmul.mubr.msk.f32.gmra.mxu1 %vm339_vm1, %v11527_v21  ;;  %10068 = vmatprep.mubr.msk.f32.mxu0 %vm339_vm1, %v11228_v26  ;;  %v11830_v21 = vld [vmem:[%s11125_s10 + $0x182] sm:$0xff] }
  0xa1   : > { %10118 = vmatprep.mubr.msk.f32.mxu1 %vm339_vm1, %v11530_v23  ;;  %v14652_v23 = vld [vmem:[#allocation29_spill] sm:$0xff] }
  0xa3   : > { %10069 = vmatmul.mubr.msk.f32.gmra.mxu0 %vm339_vm1, %v11242_v28 }
  0xa4   : > { %10119 = vmatmul.mubr.msk.f32.gmra.mxu1 %vm339_vm1, %v11541_v25  ;;  %10071 = vmatprep.mubr.msk.f32.mxu0 %vm339_vm1, %v11248_v30  ;;  %v11841_v25 = vld [vmem:[%s11125_s10 + $0x189] sm:$0xff] }
  0xa5   : > { %10121 = vmatprep.mubr.msk.f32.mxu1 %vm339_vm1, %v11544_v27  ;;  %v11844_v27 = vld [vmem:[%s11125_s10 + $0x18a] sm:$0xff] }
  0xa7   : > { %10072 = vmatmul.mubr.msk.f32.gmra.mxu0 %vm339_vm1, %v11262_v32 }
  0xa8   : > { %10122 = vmatmul.mubr.msk.f32.gmra.mxu1 %vm339_vm1, %v11555_v29  ;;  %10074 = vmatprep.mubr.msk.f32.mxu0 %vm339_vm1, %v11268_v34 }
  0xa9   : > { %10124 = vmatprep.mubr.msk.f32.mxu1 %vm339_vm1, %v11558_v31  ;;  %v14653_v31 = vld [vmem:[#allocation2_spill] sm:$0xff] }
  0xab   : > { %10075 = vmatmul.mubr.msk.f32.gmra.mxu0 %vm339_vm1, %v11282_v36 }
  0xac   : > { %10125 = vmatmul.mubr.msk.f32.gmra.mxu1 %vm339_vm1, %v11569_v33  ;;  %10077 = vmatprep.mubr.msk.f32.mxu0 %vm339_vm1, %v11288_v38  ;;  %v8686_v33 = vld [vmem:[%s14558_s3 + $0x30] sm:$0xff] }
  0xad   : > { %10127 = vmatprep.mubr.msk.f32.mxu1 %vm339_vm1, %v11572_v35  ;;  %v11864_v35 = vld [vmem:[%s14558_s3 + $0x18] sm:$0xff] }
  0xaf   : > { %10078 = vmatmul.mubr.msk.f32.gmra.mxu0 %vm339_vm1, %v11302_v40 }
  0xb0   : > { %10128 = vmatmul.mubr.msk.f32.gmra.mxu1 %vm339_vm1, %v11583_v37  ;;  %10080 = vmatprep.mubr.msk.f32.mxu0 %vm339_vm1, %v11308_v42 }
  0xb1   : > { %10130 = vmatprep.mubr.msk.f32.mxu1 %vm339_vm1, %v11586_v39  ;;  %v14654_v39 = vld [vmem:[#allocation3_spill] sm:$0xff] }
  0xb3   : > { %10081 = vmatmul.mubr.msk.f32.gmra.mxu0 %vm339_vm1, %v11322_v44 }
  0xb4   : > { %10131 = vmatmul.mubr.msk.f32.gmra.mxu1 %vm339_vm1, %v11597_v41  ;;  %10083 = vmatprep.mubr.msk.f32.mxu0 %vm339_vm1, %v11328_v46 }
  0xb5   : > { %10133 = vmatprep.mubr.msk.f32.mxu1 %vm339_vm1, %v11600_v43 }
  0xb7   : > { %10084 = vmatmul.mubr.msk.f32.gmra.mxu0 %vm339_vm1, %v11342_v48 }
  0xb8   : > { %10134 = vmatmul.mubr.msk.f32.gmra.mxu1 %vm339_vm1, %v11611_v45  ;;  %10086 = vmatprep.mubr.msk.f32.mxu0 %vm339_vm1, %v11348_v50  ;;  %v14655_v45 = vld [vmem:[#allocation4_spill] sm:$0xff] }
  0xb9   : > { %10136 = vmatprep.mubr.msk.f32.mxu1 %vm339_vm1, %v11614_v47  ;;  %v8685_v47 = vld [vmem:[%s14558_s3 + $0x28] sm:$0xff] }
  0xbb   : > { %10087 = vmatmul.mubr.msk.f32.gmra.mxu0 %vm339_vm1, %v11362_v52 }
  0xbc   : > { %10137 = vmatmul.mubr.msk.f32.gmra.mxu1 %vm339_vm1, %v11625_v49  ;;  %10089 = vmatprep.mubr.msk.f32.mxu0 %vm339_vm1, %v11368_v54 }
  0xbd   : > { %10139 = vmatprep.mubr.msk.f32.mxu1 %vm339_vm1, %v11628_v51 }
  0xbf   : > { %10090 = vmatmul.mubr.msk.f32.gmra.mxu0 %vm339_vm1, %v11382_v56 }
  0xc0   : > { %10140 = vmatmul.mubr.msk.f32.gmra.mxu1 %vm339_vm1, %v11639_v55  ;;  %10092 = vmatprep.mubr.msk.f32.mxu0 %vm339_vm1, %v11388_v58 }
  0xc1   : > { %10142 = vmatprep.mubr.msk.f32.mxu1 %vm339_vm1, %v11642_v53 }
  0xc3   : > { %10093 = vmatmul.mubr.msk.f32.gmra.mxu0 %vm339_vm1, %v11402_v60 }
  0xc4   : > { %10143 = vmatmul.mubr.msk.f32.gmra.mxu1 %vm339_vm1, %v11653_v57  ;;  %10095 = vmatprep.mubr.msk.f32.mxu0 %vm339_vm1, %v11408_v62 }
  0xc5   : > { %10145 = vmatprep.mubr.msk.f32.mxu1 %vm339_vm1, %v11656_v59  ;;  %v14657_v59 = vld [vmem:[#allocation6_spill] sm:$0xff] }
  0xc7   : > { %10096 = vmatmul.mubr.msk.f32.gmra.mxu0 %vm339_vm1, %v11422_v0 }
  0xc8   : > { %10146 = vmatmul.mubr.msk.f32.gmra.mxu1 %vm339_vm1, %v11667_v61  ;;  %10098 = vmatprep.mubr.msk.f32.mxu0 %vm339_vm1, %v14651_v8  ;;  %v8684_v61 = vld [vmem:[%s14558_s3 + $0x20] sm:$0xff] }
  0xc9   : > { %10148 = vmatprep.mubr.msk.f32.mxu1 %vm339_vm1, %v11670_v17 }
  0xcb   : > { %10099 = vmatmul.mubr.msk.f32.gmra.mxu0 %vm339_vm1, %v14652_v23 }
  0xcc   : > { %10149 = vmatmul.mubr.msk.f32.gmra.mxu1 %vm339_vm1, %v11684_v1  ;;  %10101 = vmatprep.mubr.msk.f32.mxu0 %vm339_vm1, %v11827_v12 }
  0xcd   : > { %10151 = vmatprep.mubr.msk.f32.mxu1 %vm339_vm1, %v11830_v21 }
  0xcf   : > { %10102 = vmatmul.mubr.msk.f32.gmra.mxu0 %vm339_vm1, %v11841_v25 }
  0xd0   : > { %10152 = vmatmul.mubr.msk.f32.gmra.mxu1 %vm339_vm1, %v11844_v27  ;;  %10156 = vmatprep.mubr.msk.f32.mxu0 %vm339_vm1, %v11167_v15 }
  0xd1   : > { %10206 = vmatprep.mubr.msk.f32.mxu1 %vm339_vm1, %v11164_v14 }
  0xd3   : > { %v9858_v17 = vpop.f32.mrf.mxu0  ;;  %10157 = vmatmul.mubr.msk.f32.vlgmr.msra.gmra.mxu0 %vm339_vm1, %v14653_v31 }
  0xd4   : > { %v9908_v29 = vpop.f32.mrf.mxu1  ;;  %10207 = vmatmul.mubr.msk.f32.vlgmr.msra.gmra.mxu1 %vm339_vm1, %v11182_v16  ;;  %10255 = vmatpush3.msk.msra.mxu0 %vm436_vm0, %v11704_v63 }
  0xd5   : > { %v11866_v15 = vadd.f32 %v9908_v29, %v9858_v17  ;;  %10305 = vmatpush3.msra.mxu1 %v11709_v3  ;;  %v506_v14 = vpop.f32.mrf.mxu0  ;;  %10159 = vmatprep.mubr.msk.f32.mxu0 %vm339_vm1, %v14654_v39  ;;  %v14660_v17 = vld [vmem:[#allocation9_spill] sm:$0xff] }
  0xd6   : > { %v830_v37 = vpop.f32.mrf.mxu1  ;;  %10209 = vmatprep.mubr.msk.f32.mxu1 %vm339_vm1, %v11188_v18  ;;  %10306 = vmatprep.subr.mxu1 %v8686_v33  ;;  %v14656_v18 = vld [vmem:[#allocation5_spill] sm:$0xff] }
  0xd7   : > { %v11875_v16 = vadd.f32 %v830_v37, %v506_v14  ;;  %10360 = vmatprep.subr.mxu0 %v11864_v35  ;;  %v9861_v41 = vpop.f32.mrf.mxu0  ;;  %10160 = vmatmul.mubr.msk.f32.gmra.mxu0 %vm339_vm1, %v14655_v45  ;;  %v14661_v37 = vld [vmem:[#allocation10_spill] sm:$0xff] }
  0xd8   : > { %v9911_v43 = vpop.f32.mrf.mxu1  ;;  %10210 = vmatmul.mubr.msk.f32.gmra.mxu1 %vm339_vm1, %v11202_v20  ;;  %10162 = vmatprep.mubr.msk.f32.mxu0 %vm339_vm1, %v14656_v18 }
  0xd9   : > { %v11885_v49 = vadd.f32 %v9911_v43, %v9861_v41  ;;  %10212 = vmatprep.mubr.msk.f32.mxu1 %vm339_vm1, %v11208_v22  ;;  %v516_v51 = vpop.f32.mrf.mxu0  ;;  %10307 = vmatpush3.msra.mxu1 %v8686_v33  ;;  %v14658_v22 = vld [vmem:[#allocation7_spill] sm:$0xff] }
  0xda   : > { %v840_v53 = vpop.f32.mrf.mxu1  ;;  %10308 = vmatprep.subr.mxu1 %v8685_v47  ;;  %v14662_v41 = vld [vmem:[#allocation11_spill] sm:$0xff] }
  0xdb   : > { %v11891_v55 = vadd.f32 %v840_v53, %v516_v51  ;;  %v9864_v57 = vpop.f32.mrf.mxu0  ;;  %10163 = vmatmul.mubr.msk.f32.gmra.mxu0 %vm339_vm1, %v14657_v59  ;;  %10309 = vmatpush3.msra.mxu1 %v8685_v47  ;;  %v14663_v51 = vld [vmem:[#allocation12_spill] sm:$0xff]  ;;  %v14664_v53 = vld [vmem:[#allocation13_spill] sm:$0xff] }
  0xdc   : > { %v9914_v20 = vpop.f32.mrf.mxu1  ;;  %10213 = vmatmul.mubr.msk.f32.gmra.mxu1 %vm339_vm1, %v11222_v24  ;;  %10165 = vmatprep.mubr.msk.f32.mxu0 %vm339_vm1, %v14658_v22  ;;  %v14665_v22 = vld [vmem:[#allocation14_spill] sm:$0xff] }
  0xdd   : > { %v11900_v63 = vadd.f32 %v9914_v20, %v9864_v57  ;;  %10215 = vmatprep.mubr.msk.f32.mxu1 %vm339_vm1, %v11228_v26  ;;  %v526_v1 = vpop.f32.mrf.mxu0  ;;  %10310 = vmatprep.subr.mxu1 %v8684_v61 }
  0xde   : > { %v850_v2 = vpop.f32.mrf.mxu1  ;;  %10311 = vmatpush3.msra.mxu1 %v8684_v61 }
  0xdf   : > { %v11906_v3 = vadd.f32 %v850_v2, %v526_v1  ;;  %v9867_v4 = vpop.f32.mrf.mxu0  ;;  %10166 = vmatmul.mubr.msk.f32.gmra.mxu0 %vm339_vm1, %v14659_v6  ;;  %10416 = vmatprep.subr.mxu1 %v11915_v9  ;;  %v14666_v1 = vld [vmem:[#allocation15_spill] sm:$0xff] }
  0xe0   : > { %v9917_v24 = vpop.f32.mrf.mxu1  ;;  %10216 = vmatmul.mubr.msk.f32.gmra.mxu1 %vm339_vm1, %v11242_v28  ;;  %10168 = vmatprep.mubr.msk.f32.mxu0 %vm339_vm1, %v14660_v17  ;;  %v14667_v17 = vld [vmem:[#allocation16_spill] sm:$0xff] }
  0xe1   : > { %v11917_v26 = vadd.f32 %v9917_v24, %v9867_v4  ;;  %10218 = vmatprep.mubr.msk.f32.mxu1 %vm339_vm1, %v11248_v30  ;;  %v536_v29 = vpop.f32.mrf.mxu0 }
  0xe2   : > { %v860_v31 = vpop.f32.mrf.mxu1 }
  0xe3   : > { %v11923_v33 = vadd.f32 %v860_v31, %v536_v29  ;;  %v9870_v28 = vpop.f32.mrf.mxu0  ;;  %10169 = vmatmul.mubr.msk.f32.gmra.mxu0 %vm339_vm1, %v14661_v37  ;;  %v14668_v29 = vld [vmem:[#allocation17_spill] sm:$0xff] }
  0xe4   : > { %v9920_v14 = vpop.f32.mrf.mxu1  ;;  %10219 = vmatmul.mubr.msk.f32.gmra.mxu1 %vm339_vm1, %v11262_v32  ;;  %10171 = vmatprep.mubr.msk.f32.mxu0 %vm339_vm1, %v14662_v41  ;;  %v14669_v41 = vld [vmem:[#allocation18_spill] sm:$0xff] }
  0xe5   : > { %v11930_v39 = vadd.f32 %v9920_v14, %v9870_v28  ;;  %10221 = vmatprep.mubr.msk.f32.mxu1 %vm339_vm1, %v11268_v34  ;;  %v546_v30 = vpop.f32.mrf.mxu0 }
  0xe6   : > { %v870_v43 = vpop.f32.mrf.mxu1 }
  0xe7   : > { %v11936_v45 = vadd.f32 %v870_v43, %v546_v30  ;;  %v9873_v47 = vpop.f32.mrf.mxu0  ;;  %10172 = vmatmul.mubr.msk.f32.gmra.mxu0 %vm339_vm1, %v14663_v51  ;;  %v14670_v30 = vld [vmem:[#allocation19_spill] sm:$0xff] }
  0xe8   : > { %v9923_v18 = vpop.f32.mrf.mxu1  ;;  %10222 = vmatmul.mubr.msk.f32.gmra.mxu1 %vm339_vm1, %v11282_v36  ;;  %10174 = vmatprep.mubr.msk.f32.mxu0 %vm339_vm1, %v14664_v53  ;;  %v14671_v53 = vld [vmem:[#allocation20_spill] sm:$0xff] }
  0xe9   : > { %v11942_v32 = vadd.f32 %v9923_v18, %v9873_v47  ;;  %10224 = vmatprep.mubr.msk.f32.mxu1 %vm339_vm1, %v11288_v38  ;;  %v556_v34 = vpop.f32.mrf.mxu0 }
  0xea   : > { %v880_v57 = vpop.f32.mrf.mxu1 }
  0xeb   : > { %v11948_v20 = vadd.f32 %v880_v57, %v556_v34  ;;  %v9876_v59 = vpop.f32.mrf.mxu0  ;;  %10175 = vmatmul.mubr.msk.f32.gmra.mxu0 %vm339_vm1, %v14665_v22  ;;  %v14672_v34 = vld [vmem:[#allocation21_spill] sm:$0xff] }
  0xec   : > { %v9926_v61 = vpop.f32.mrf.mxu1  ;;  %10225 = vmatmul.mubr.msk.f32.gmra.mxu1 %vm339_vm1, %v11302_v40  ;;  %10177 = vmatprep.mubr.msk.f32.mxu0 %vm339_vm1, %v14666_v1  ;;  %v14673_v1 = vld [vmem:[#allocation22_spill] sm:$0xff] }
  0xed   : > { %v11954_v36 = vadd.f32 %v9926_v61, %v9876_v59  ;;  %10227 = vmatprep.mubr.msk.f32.mxu1 %vm339_vm1, %v11308_v42  ;;  %v566_v38 = vpop.f32.mrf.mxu0 }
  0xee   : > { %v890_v2 = vpop.f32.mrf.mxu1 }
  0xef   : > { %v11960_v4 = vadd.f32 %v890_v2, %v566_v38  ;;  %v9879_v24 = vpop.f32.mrf.mxu0  ;;  %10178 = vmatmul.mubr.msk.f32.gmra.mxu0 %vm339_vm1, %v14667_v17  ;;  %v14674_v38 = vld [vmem:[#allocation23_spill] sm:$0xff] }
  0xf0   : > { %v9929_v6 = vpop.f32.mrf.mxu1  ;;  %10228 = vmatmul.mubr.msk.f32.gmra.mxu1 %vm339_vm1, %v11322_v44  ;;  %10180 = vmatprep.mubr.msk.f32.mxu0 %vm339_vm1, %v14668_v29  ;;  %v14675_v29 = vld [vmem:[#allocation24_spill] sm:$0xff] }
  0xf1   : > { %v11966_v40 = vadd.f32 %v9929_v6, %v9879_v24  ;;  %10230 = vmatprep.mubr.msk.f32.mxu1 %vm339_vm1, %v11328_v46  ;;  %v576_v42 = vpop.f32.mrf.mxu0 }
  0xf2   : > { %v900_v31 = vpop.f32.mrf.mxu1 }
  0xf3   : > { %v11972_v28 = vadd.f32 %v900_v31, %v576_v42  ;;  %v9882_v14 = vpop.f32.mrf.mxu0  ;;  %10181 = vmatmul.mubr.msk.f32.gmra.mxu0 %vm339_vm1, %v14669_v41  ;;  %v14676_v42 = vld [vmem:[#allocation25_spill] sm:$0xff] }
  0xf4   : > { %v9932_v37 = vpop.f32.mrf.mxu1  ;;  %10231 = vmatmul.mubr.msk.f32.gmra.mxu1 %vm339_vm1, %v11342_v48  ;;  %10183 = vmatprep.mubr.msk.f32.mxu0 %vm339_vm1, %v14670_v30  ;;  %v14677_v30 = vld [vmem:[#allocation26_spill] sm:$0xff] }
  0xf5   : > { %v11978_v44 = vadd.f32 %v9932_v37, %v9882_v14  ;;  %10233 = vmatprep.mubr.msk.f32.mxu1 %vm339_vm1, %v11348_v50  ;;  %v586_v46 = vpop.f32.mrf.mxu0 }
  0xf6   : > { %v910_v43 = vpop.f32.mrf.mxu1 }
  0xf7   : > { %v11984_v47 = vadd.f32 %v910_v43, %v586_v46  ;;  %v9885_v18 = vpop.f32.mrf.mxu0  ;;  %10184 = vmatmul.mubr.msk.f32.gmra.mxu0 %vm339_vm1, %v14671_v53  ;;  %v14678_v46 = vld [vmem:[#allocation28_spill] sm:$0xff] }
  0xf8   : > { %v9935_v51 = vpop.f32.mrf.mxu1  ;;  %10234 = vmatmul.mubr.msk.f32.gmra.mxu1 %vm339_vm1, %v11362_v52  ;;  %10186 = vmatprep.mubr.msk.f32.mxu0 %vm339_vm1, %v14672_v34  ;;  %v14679_v34 = vld [vmem:[#allocation30_spill] sm:$0xff] }
  0xf9   : > { %v11990_v48 = vadd.f32 %v9935_v51, %v9885_v18  ;;  %10236 = vmatprep.mubr.msk.f32.mxu1 %vm339_vm1, %v11368_v54  ;;  %v596_v50 = vpop.f32.mrf.mxu0 }
  0xfa   : > { %v920_v57 = vpop.f32.mrf.mxu1 }
  0xfb   : > { %v11996_v59 = vadd.f32 %v920_v57, %v596_v50  ;;  %v9888_v61 = vpop.f32.mrf.mxu0  ;;  %10187 = vmatmul.mubr.msk.f32.gmra.mxu0 %vm339_vm1, %v14673_v1  ;;  %v8516_v57 = vld [vmem:[%s11125_s10 + $0x198] sm:$0xff]  ;;  %v14680_v1 = vld [vmem:[#allocation31_spill] sm:$0xff] }
  0xfc   : > { %v9938_v22 = vpop.f32.mrf.mxu1  ;;  %10237 = vmatmul.mubr.msk.f32.gmra.mxu1 %vm339_vm1, %v11382_v56  ;;  %10189 = vmatprep.mubr.msk.f32.mxu0 %vm339_vm1, %v14674_v38  ;;  %v8517_v38 = vld [vmem:[%s11125_s10 + $0x1a0] sm:$0xff] }
  0xfd   : > { %v12002_v52 = vadd.f32 %v9938_v22, %v9888_v61  ;;  %10239 = vmatprep.mubr.msk.f32.mxu1 %vm339_vm1, %v11388_v58  ;;  %v606_v54 = vpop.f32.mrf.mxu0  ;;  %v8582_v61 = vld [vmem:[%s11125_s10 + $0x199] sm:$0xff] }
  0xfe   : > { %v930_v2 = vpop.f32.mrf.mxu1 }
  0xff   : > { %v12008_v24 = vadd.f32 %v930_v2, %v606_v54  ;;  %v9891_v6 = vpop.f32.mrf.mxu0  ;;  %10190 = vmatmul.mubr.msk.f32.gmra.mxu0 %vm339_vm1, %v14675_v29  ;;  %v8583_v54 = vld [vmem:[%s11125_s10 + $0x1a1] sm:$0xff] }
 0x100   : > { %v9941_v17 = vpop.f32.mrf.mxu1  ;;  %10240 = vmatmul.mubr.msk.f32.gmra.mxu1 %vm339_vm1, %v11402_v60  ;;  %10192 = vmatprep.mubr.msk.f32.mxu0 %vm339_vm1, %v14676_v42 }
 0x101   : > { %v12014_v56 = vadd.f32 %v9941_v17, %v9891_v6  ;;  %10242 = vmatprep.mubr.msk.f32.mxu1 %vm339_vm1, %v11408_v62  ;;  %v616_v58 = vpop.f32.mrf.mxu0  ;;  %v3757_v17 = vld [vmem:[%s12053_s15 + $0x1] sm:$0xff] }
 0x102   : > { %v940_v31 = vpop.f32.mrf.mxu1 }
 0x103   : > { %v12020_v14 = vadd.f32 %v940_v31, %v616_v58  ;;  %v9894_v37 = vpop.f32.mrf.mxu0  ;;  %10193 = vmatmul.mubr.msk.f32.gmra.mxu0 %vm339_vm1, %v14677_v30  ;;  %v3758_v31 = vld [vmem:[%s12053_s15 + $0x9] sm:$0xff] }
 0x104   : > { %v9944_v41 = vpop.f32.mrf.mxu1  ;;  %10243 = vmatmul.mubr.msk.f32.gmra.mxu1 %vm339_vm1, %v11422_v0  ;;  %10195 = vmatprep.mubr.msk.f32.mxu0 %vm339_vm1, %v14678_v46  ;;  %v3759_v46 = vld [vmem:[%s12053_s15 + $0x19] sm:$0xff] }
 0x105   : > { %v12026_v60 = vadd.f32 %v9944_v41, %v9894_v37  ;;  %10245 = vmatprep.mubr.msk.f32.mxu1 %vm339_vm1, %v14651_v8  ;;  %v626_v62 = vpop.f32.mrf.mxu0 }
 0x106   : > { %v950_v43 = vpop.f32.mrf.mxu1 }
 0x107   : > { %v12032_v18 = vadd.f32 %v950_v43, %v626_v62  ;;  %v9897_v51 = vpop.f32.mrf.mxu0  ;;  %10196 = vmatmul.mubr.msk.f32.gmra.mxu0 %vm339_vm1, %v11445_v5 }
 0x108   : > { %v9947_v53 = vpop.f32.mrf.mxu1  ;;  %10246 = vmatmul.mubr.msk.f32.gmra.mxu1 %vm339_vm1, %v14652_v23  ;;  %10198 = vmatprep.mubr.msk.f32.mxu0 %vm339_vm1, %v14679_v34  ;;  %v3760_v34 = vld [vmem:[%s12053_s15 + $0x21] sm:$0xff] }
 0x109   : > { %v12038_v0 = vadd.f32 %v9947_v53, %v9897_v51  ;;  %10248 = vmatprep.mubr.msk.f32.mxu1 %vm339_vm1, %v11827_v12  ;;  %v636_v8 = vpop.f32.mrf.mxu0  ;;  %v8754_v51 = vld [vmem:[%s14558_s3 + $0x50] sm:$0xff] }
 0x10a   : > { %v960_v50 = vpop.f32.mrf.mxu1 }
 0x10b   : > { %v12046_v22 = vadd.f32 %v960_v50, %v636_v8  ;;  %v9900_v5 = vpop.f32.mrf.mxu0  ;;  %10199 = vmatmul.mubr.msk.f32.gmra.mxu0 %vm339_vm1, %v14680_v1 }
 0x10c   : > { %v9950_v23 = vpop.f32.mrf.mxu1  ;;  %10249 = vmatmul.mubr.msk.f32.gmra.mxu1 %vm339_vm1, %v11841_v25  ;;  %10201 = vmatprep.mubr.msk.f32.mxu0 %vm339_vm1, %v8516_v57 }
 0x10d   : > { %v12059_v12 = vadd.f32 %v9950_v23, %v9900_v5  ;;  %10251 = vmatprep.mubr.msk.f32.mxu1 %vm339_vm1, %v8582_v61  ;;  %v646_v2 = vpop.f32.mrf.mxu0  ;;  %v3762_v23 = vld [vmem:[%s12053_s15 + $0x39] sm:$0xff] }
 0x10e   : > { %v970_v6 = vpop.f32.mrf.mxu1 }
 0x10f   : > { %v12066_v29 = vadd.f32 %v970_v6, %v646_v2  ;;  %v9903_v42 = vpop.f32.mrf.mxu0  ;;  %10202 = vmatmul.mubr.msk.f32.gmra.mxu0 %vm339_vm1, %v8517_v38  ;;  %v3763_v2 = vld [vmem:[%s12053_s15 + $0x49] sm:$0xff] }
 0x110   : > { %v9953_v58 = vpop.f32.mrf.mxu1  ;;  %10252 = vmatmul.mubr.msk.f32.gmra.mxu1 %vm339_vm1, %v8583_v54  ;;  %10256 = vmatprep.mubr.msk.f32.mxu0 %vm339_vm1, %v11484_v13  ;;  %v3755_v13 = vld [vmem:[%s14558_s3 + $0x10] sm:$0xff]  ;;  %v8624_v54 = vld [vmem:[%s11125_s10 + $0x7a] sm:$0xff] }
 0x111   : > { %v12070_v25 = vadd.f32 %v9953_v58, %v9903_v42  ;;  %10312 = vmatprep.mubr.msk.f32.mxu1 %vm3794_vm2, %v3757_v17  ;;  %v656_v37 = vpop.f32.mrf.mxu0  ;;  %v3753_v42 = vld [vmem:[%s14558_s3] sm:$0xff] }
 0x112   : > { %v980_v41 = vpop.f32.mrf.mxu1  ;;  %v8752_v58 = vld [vmem:[%s14558_s3 + $0x40] sm:$0xff] }
 0x113   : > { %v12076_v30 = vadd.f32 %v980_v41, %v656_v37  ;;  %v9958_v62 = vpop.f32.mrf.mxu0  ;;  %10257 = vmatmul.mubr.msk.f32.vlgmr.msra.gmra.mxu0 %vm339_vm1, %v11499_v10  ;;  %v3761_v10 = vld [vmem:[%s12053_s15 + $0x31] sm:$0xff]  ;;  %v8625_v37 = vld [vmem:[%s11125_s10 + $0x82] sm:$0xff] }
 0x114   : > { %v10008_v43 = vpop.f32.mrf.mxu1  ;;  %10313 = vmatmul.mubr.msk.f32.vlgmr.msra.gmra.mxu1 %vm3794_vm2, %v3758_v31  ;;  %v1348_v53 = vadd.f32 %v9958_v62, %v11866_v15  ;;  %10361 = vmatpush3.msra.mxu0 %v11864_v35  ;;  %v3764_v41 = vld [vmem:[%s12053_s15 + $0x51] sm:$0xff] }
 0x115   : > { %10417 = vmatpush3.msra.mxu1 %v11915_v9  ;;  %v1188_v8 = vpop.f32.mrf.mxu0  ;;  %10259 = vmatprep.mubr.msk.f32.mxu0 %vm339_vm1, %v11502_v11  ;;  %v3754_v11 = vld [vmem:[%s14558_s3 + $0x8] sm:$0xff] }
 0x116   : > { %v1579_v50 = vpop.f32.mrf.mxu1  ;;  %10315 = vmatprep.mubr.msk.f32.mxu1 %vm3794_vm2, %v3759_v46  ;;  %v12096_v57 = vadd.f32 %v10008_v43, %v1348_v53  ;;  %v1347_v61 = vadd.f32 %v1188_v8, %v11875_v16  ;;  %10362 = vmatprep.subr.mxu0 %v3755_v13  ;;  %v8753_v9 = vld [vmem:[%s14558_s3 + $0x48] sm:$0xff]  ;;  %v8626_v43 = vld [vmem:[%s11125_s10 + $0x92] sm:$0xff] }
 0x117   : > { %10418 = vmatprep.subr.mxu1 %v8754_v51  ;;  %v9961_v35 = vpop.f32.mrf.mxu0  ;;  %10260 = vmatmul.mubr.msk.f32.gmra.mxu0 %vm339_vm1, %v11513_v7  ;;  %v8623_v7 = vld [vmem:[%s11125_s10 + $0x6a] sm:$0xff]  ;;  %v12146_v8 = vld [vmem:[%s14558_s3 + $0x78] sm:$0xff] }
 0x118   : > { %v10011_v15 = vpop.f32.mrf.mxu1  ;;  %10316 = vmatmul.mubr.msk.f32.gmra.mxu1 %vm3794_vm2, %v3760_v34  ;;  %v12108_v16 = vadd.f32 %v1579_v50, %v1347_v61  ;;  %v1350_v5 = vadd.f32 %v9961_v35, %v11885_v49  ;;  %10262 = vmatprep.mubr.msk.f32.mxu0 %vm339_vm1, %v11516_v19  ;;  %v12151_v50 = vld [vmem:[%s14558_s3 + $0x98] sm:$0xff]  ;;  %v3766_v35 = vld [vmem:[%s12053_s15 + $0x69] sm:$0xff] }
 0x119   : > { %10318 = vmatprep.mubr.msk.f32.mxu1 %vm3794_vm2, %v3761_v10  ;;  %v1198_v1 = vpop.f32.mrf.mxu0  ;;  %10363 = vmatpush3.msra.mxu0 %v3755_v13  ;;  %v3765_v13 = vld [vmem:[%s12053_s15 + $0x61] sm:$0xff] }
 0x11a   : > { %v1589_v38 = vpop.f32.mrf.mxu1  ;;  %10419 = vmatpush3.msra.mxu1 %v8754_v51  ;;  %v12118_v6 = vadd.f32 %v10011_v15, %v1350_v5  ;;  %v1349_v17 = vadd.f32 %v1198_v1, %v11891_v55  ;;  %10364 = vmatprep.subr.mxu0 %v3754_v11  ;;  %v8627_v61 = vld [vmem:[%s11125_s10 + $0x9a] sm:$0xff] }
 0x11b   : > { %10420 = vmatprep.subr.mxu1 %v8753_v9  ;;  %v9964_v19 = vpop.f32.mrf.mxu0  ;;  %10263 = vmatmul.mubr.msk.f32.gmra.mxu0 %vm339_vm1, %v8623_v7  ;;  %v3767_v5 = vld [vmem:[%s12053_s15 + $0x79] sm:$0xff] }
 0x11c   : > { %v10014_v49 = vpop.f32.mrf.mxu1  ;;  %10319 = vmatmul.mubr.msk.f32.gmra.mxu1 %vm3794_vm2, %v3762_v23  ;;  %v12129_v31 = vadd.f32 %v1589_v38, %v1349_v17  ;;  %v1352_v55 = vadd.f32 %v9964_v19, %v11900_v63  ;;  %10265 = vmatprep.mubr.msk.f32.mxu0 %vm339_vm1, %v8624_v54 }
 0x11d   : > { %10321 = vmatprep.mubr.msk.f32.mxu1 %vm3794_vm2, %v3763_v2  ;;  %v1208_v46 = vpop.f32.mrf.mxu0  ;;  %10365 = vmatpush3.msra.mxu0 %v3754_v11  ;;  %v3768_v2 = vld [vmem:[%s12053_s15 + $0x81] sm:$0xff] }
 0x11e   : > { %v1599_v62 = vpop.f32.mrf.mxu1  ;;  %10421 = vmatpush3.msra.mxu1 %v8753_v9  ;;  %v12138_v51 = vadd.f32 %v10014_v49, %v1352_v55  ;;  %v1351_v53 = vadd.f32 %v1208_v46, %v11906_v3  ;;  %10366 = vmatprep.subr.mxu0 %v3753_v42  ;;  %v8628_v9 = vld [vmem:[%s11125_s10 + $0xaa] sm:$0xff]  ;;  %v8630_v49 = vld [vmem:[%s11125_s10 + $0xc2] sm:$0xff] }
 0x11f   : > { %10422 = vmatprep.subr.mxu1 %v8752_v58  ;;  %v9967_v63 = vpop.f32.mrf.mxu0  ;;  %10266 = vmatmul.mubr.msk.f32.gmra.mxu0 %vm339_vm1, %v8625_v37 }
 0x120   : > { %v10017_v34 = vpop.f32.mrf.mxu1  ;;  %10322 = vmatmul.mubr.msk.f32.gmra.mxu1 %vm3794_vm2, %v3764_v41  ;;  %v12153_v3 = vadd.f32 %v1599_v62, %v1351_v53  ;;  %v1354_v10 = vadd.f32 %v9967_v63, %v11917_v26  ;;  %10268 = vmatprep.mubr.msk.f32.mxu0 %vm339_vm1, %v8626_v43  ;;  %v8631_v62 = vld [vmem:[%s11125_s10 + $0xca] sm:$0xff]  ;;  %v3770_v43 = vld [vmem:[%s12053_s15 + $0x99] sm:$0xff] }
 0x121   : > { %10324 = vmatprep.mubr.msk.f32.mxu1 %vm3794_vm2, %v3765_v13  ;;  %v1218_v15 = vpop.f32.mrf.mxu0  ;;  %10367 = vmatpush3.msra.mxu0 %v3753_v42  ;;  %v3769_v42 = vld [vmem:[%s12053_s15 + $0x91] sm:$0xff]  ;;  %v8632_v53 = vld [vmem:[%s11125_s10 + $0xda] sm:$0xff]  ;;  %v3771_v63 = vld [vmem:[%s12053_s15 + $0xa9] sm:$0xff] }
 0x122   : > { %v1609_v11 = vpop.f32.mrf.mxu1  ;;  %10423 = vmatpush3.msra.mxu1 %v8752_v58  ;;  %v12162_v7 = vadd.f32 %v10017_v34, %v1354_v10  ;;  %v1353_v23 = vadd.f32 %v1218_v15, %v11923_v33  ;;  %10472 = vmatprep.subr.mxu0 %v12146_v8  ;;  %v8629_v33 = vld [vmem:[%s11125_s10 + $0xb2] sm:$0xff] }
 0x123   : > { %10528 = vmatprep.subr.mxu1 %v12151_v50  ;;  %v9970_v26 = vpop.f32.mrf.mxu0  ;;  %10269 = vmatmul.mubr.msk.f32.gmra.mxu0 %vm339_vm1, %v8627_v61 }
 0x124   : > { %v10020_v1 = vpop.f32.mrf.mxu1  ;;  %10325 = vmatmul.mubr.msk.f32.gmra.mxu1 %vm3794_vm2, %v3766_v35  ;;  %v12169_v38 = vadd.f32 %v1609_v11, %v1353_v23  ;;  %v1356_v54 = vadd.f32 %v9970_v26, %v11930_v39  ;;  %10271 = vmatprep.mubr.msk.f32.mxu0 %vm339_vm1, %v8628_v9  ;;  %v8633_v11 = vld [vmem:[%s11125_s10 + $0xe2] sm:$0xff]  ;;  %v3772_v9 = vld [vmem:[%s12053_s15 + $0xb1] sm:$0xff] }
 0x125   : > { %10327 = vmatprep.mubr.msk.f32.mxu1 %vm3794_vm2, %v3767_v5  ;;  %v1228_v17 = vpop.f32.mrf.mxu0  ;;  %v8634_v23 = vld [vmem:[%s11125_s10 + $0xf2] sm:$0xff]  ;;  %v3773_v26 = vld [vmem:[%s12053_s15 + $0xc1] sm:$0xff] }
 0x126   : > { %v1619_v19 = vpop.f32.mrf.mxu1  ;;  %v12178_v58 = vadd.f32 %v10020_v1, %v1356_v54  ;;  %v1355_v55 = vadd.f32 %v1228_v17, %v11936_v45 }
 0x127   : > { %v9973_v37 = vpop.f32.mrf.mxu0  ;;  %10272 = vmatmul.mubr.msk.f32.gmra.mxu0 %vm339_vm1, %v8629_v33 }
 0x128   : > { %v10023_v39 = vpop.f32.mrf.mxu1  ;;  %10328 = vmatmul.mubr.msk.f32.gmra.mxu1 %vm3794_vm2, %v3768_v2  ;;  %v12183_v41 = vadd.f32 %v1619_v19, %v1355_v55  ;;  %v1358_v46 = vadd.f32 %v9973_v37, %v11942_v32  ;;  %10274 = vmatprep.mubr.msk.f32.mxu0 %vm339_vm1, %v8630_v49  ;;  %v8635_v19 = vld [vmem:[%s11125_s10 + $0xfa] sm:$0xff]  ;;  %v3774_v49 = vld [vmem:[%s12053_s15 + $0xc9] sm:$0xff] }
 0x129   : > { %10330 = vmatprep.mubr.msk.f32.mxu1 %vm3794_vm2, %v3769_v42  ;;  %v1238_v13 = vpop.f32.mrf.mxu0  ;;  %v8636_v55 = vld [vmem:[%s11125_s10 + $0x10a] sm:$0xff]  ;;  %v3775_v37 = vld [vmem:[%s12053_s15 + $0xd9] sm:$0xff] }
 0x12a   : > { %v1629_v45 = vpop.f32.mrf.mxu1  ;;  %v12192_v34 = vadd.f32 %v10023_v39, %v1358_v46  ;;  %v1357_v10 = vadd.f32 %v1238_v13, %v11948_v20 }
 0x12b   : > { %v9976_v61 = vpop.f32.mrf.mxu0  ;;  %10275 = vmatmul.mubr.msk.f32.gmra.mxu0 %vm339_vm1, %v8631_v62 }
 0x12c   : > { %v10026_v32 = vpop.f32.mrf.mxu1  ;;  %10331 = vmatmul.mubr.msk.f32.gmra.mxu1 %vm3794_vm2, %v3770_v43  ;;  %v12197_v35 = vadd.f32 %v1629_v45, %v1357_v10  ;;  %v1360_v15 = vadd.f32 %v9976_v61, %v11954_v36  ;;  %10277 = vmatprep.mubr.msk.f32.mxu0 %vm339_vm1, %v8632_v53  ;;  %v8637_v45 = vld [vmem:[%s11125_s10 + $0x112] sm:$0xff]  ;;  %v3776_v53 = vld [vmem:[%s12053_s15 + $0xe1] sm:$0xff] }
 0x12d   : > { %10333 = vmatprep.mubr.msk.f32.mxu1 %vm3794_vm2, %v3771_v63  ;;  %v1248_v5 = vpop.f32.mrf.mxu0  ;;  %v8638_v10 = vld [vmem:[%s11125_s10 + $0x122] sm:$0xff]  ;;  %v3777_v61 = vld [vmem:[%s12053_s15 + $0xf1] sm:$0xff] }
 0x12e   : > { %v1639_v20 = vpop.f32.mrf.mxu1  ;;  %v12206_v1 = vadd.f32 %v10026_v32, %v1360_v15  ;;  %v1359_v54 = vadd.f32 %v1248_v5, %v11960_v4 }
 0x12f   : > { %v9979_v33 = vpop.f32.mrf.mxu0  ;;  %10278 = vmatmul.mubr.msk.f32.gmra.mxu0 %vm339_vm1, %v8633_v11 }
 0x130   : > { %v10029_v36 = vpop.f32.mrf.mxu1  ;;  %10334 = vmatmul.mubr.msk.f32.gmra.mxu1 %vm3794_vm2, %v3772_v9  ;;  %v12211_v2 = vadd.f32 %v1639_v20, %v1359_v54  ;;  %v1362_v17 = vadd.f32 %v9979_v33, %v11966_v40  ;;  %10280 = vmatprep.mubr.msk.f32.mxu0 %vm339_vm1, %v8634_v23  ;;  %v8639_v20 = vld [vmem:[%s11125_s10 + $0x12a] sm:$0xff]  ;;  %v3778_v23 = vld [vmem:[%s12053_s15 + $0xf9] sm:$0xff] }
 0x131   : > { %10336 = vmatprep.mubr.msk.f32.mxu1 %vm3794_vm2, %v3773_v26  ;;  %v1258_v42 = vpop.f32.mrf.mxu0  ;;  %v8640_v54 = vld [vmem:[%s11125_s10 + $0x13a] sm:$0xff]  ;;  %v3779_v33 = vld [vmem:[%s12053_s15 + $0x109] sm:$0xff] }
 0x132   : > { %v1649_v4 = vpop.f32.mrf.mxu1  ;;  %v12220_v39 = vadd.f32 %v10029_v36, %v1362_v17  ;;  %v1361_v46 = vadd.f32 %v1258_v42, %v11972_v28 }
 0x133   : > { %v9982_v62 = vpop.f32.mrf.mxu0  ;;  %10281 = vmatmul.mubr.msk.f32.gmra.mxu0 %vm339_vm1, %v8635_v19 }
 0x134   : > { %v10032_v40 = vpop.f32.mrf.mxu1  ;;  %10337 = vmatmul.mubr.msk.f32.gmra.mxu1 %vm3794_vm2, %v3774_v49  ;;  %v12225_v43 = vadd.f32 %v1649_v4, %v1361_v46  ;;  %v1364_v13 = vadd.f32 %v9982_v62, %v11978_v44  ;;  %10283 = vmatprep.mubr.msk.f32.mxu0 %vm339_vm1, %v8636_v55  ;;  %v8641_v4 = vld [vmem:[%s11125_s10 + $0x142] sm:$0xff]  ;;  %v3780_v55 = vld [vmem:[%s12053_s15 + $0x111] sm:$0xff] }
 0x135   : > { %10339 = vmatprep.mubr.msk.f32.mxu1 %vm3794_vm2, %v3775_v37  ;;  %v1268_v63 = vpop.f32.mrf.mxu0  ;;  %v8642_v46 = vld [vmem:[%s11125_s10 + $0x152] sm:$0xff]  ;;  %v3781_v62 = vld [vmem:[%s12053_s15 + $0x121] sm:$0xff] }
 0x136   : > { %v1659_v28 = vpop.f32.mrf.mxu1  ;;  %v12234_v32 = vadd.f32 %v10032_v40, %v1364_v13  ;;  %v1363_v15 = vadd.f32 %v1268_v63, %v11984_v47 }
 0x137   : > { %v9985_v11 = vpop.f32.mrf.mxu0  ;;  %10284 = vmatmul.mubr.msk.f32.gmra.mxu0 %vm339_vm1, %v8637_v45 }
 0x138   : > { %v10035_v44 = vpop.f32.mrf.mxu1  ;;  %10340 = vmatmul.mubr.msk.f32.gmra.mxu1 %vm3794_vm2, %v3776_v53  ;;  %v12239_v9 = vadd.f32 %v1659_v28, %v1363_v15  ;;  %v1366_v5 = vadd.f32 %v9985_v11, %v11990_v48  ;;  %10286 = vmatprep.mubr.msk.f32.mxu0 %vm339_vm1, %v8638_v10  ;;  %v8643_v28 = vld [vmem:[%s11125_s10 + $0x15a] sm:$0xff]  ;;  %v3782_v10 = vld [vmem:[%s12053_s15 + $0x129] sm:$0xff] }
 0x139   : > { %10342 = vmatprep.mubr.msk.f32.mxu1 %vm3794_vm2, %v3777_v61  ;;  %v1278_v26 = vpop.f32.mrf.mxu0  ;;  %v8644_v15 = vld [vmem:[%s11125_s10 + $0x16a] sm:$0xff]  ;;  %v3783_v11 = vld [vmem:[%s12053_s15 + $0x139] sm:$0xff] }
 0x13a   : > { %v1669_v47 = vpop.f32.mrf.mxu1  ;;  %v12248_v36 = vadd.f32 %v10035_v44, %v1366_v5  ;;  %v1365_v17 = vadd.f32 %v1278_v26, %v11996_v59 }
 0x13b   : > { %v9988_v19 = vpop.f32.mrf.mxu0  ;;  %10287 = vmatmul.mubr.msk.f32.gmra.mxu0 %vm339_vm1, %v8639_v20 }
 0x13c   : > { %v10038_v48 = vpop.f32.mrf.mxu1  ;;  %10343 = vmatmul.mubr.msk.f32.gmra.mxu1 %vm3794_vm2, %v3778_v23  ;;  %v12253_v49 = vadd.f32 %v1669_v47, %v1365_v17  ;;  %v1368_v42 = vadd.f32 %v9988_v19, %v12002_v52  ;;  %10289 = vmatprep.mubr.msk.f32.mxu0 %vm339_vm1, %v8640_v54  ;;  %v8645_v47 = vld [vmem:[%s11125_s10 + $0x172] sm:$0xff]  ;;  %v3784_v54 = vld [vmem:[%s12053_s15 + $0x141] sm:$0xff] }
 0x13d   : > { %10345 = vmatprep.mubr.msk.f32.mxu1 %vm3794_vm2, %v3779_v33  ;;  %v1288_v37 = vpop.f32.mrf.mxu0  ;;  %v3785_v17 = vld [vmem:[%s12053_s15 + $0x151] sm:$0xff] }
 0x13e   : > { %v1679_v59 = vpop.f32.mrf.mxu1  ;;  %v12262_v40 = vadd.f32 %v10038_v48, %v1368_v42  ;;  %v1367_v13 = vadd.f32 %v1288_v37, %v12008_v24  ;;  %v3786_v37 = vld [vmem:[%s12053_s15 + $0x159] sm:$0xff] }
 0x13f   : > { %v9991_v45 = vpop.f32.mrf.mxu0  ;;  %10290 = vmatmul.mubr.msk.f32.gmra.mxu0 %vm339_vm1, %v8641_v4 }
 0x140   : > { %v10041_v52 = vpop.f32.mrf.mxu1  ;;  %10346 = vmatmul.mubr.msk.f32.gmra.mxu1 %vm3794_vm2, %v3780_v55  ;;  %v12267_v53 = vadd.f32 %v1679_v59, %v1367_v13  ;;  %v1370_v63 = vadd.f32 %v9991_v45, %v12014_v56  ;;  %10292 = vmatprep.mubr.msk.f32.mxu0 %vm339_vm1, %v8642_v46  ;;  %v8648_v46 = vld [vmem:[%s11125_s10 + $0x19a] sm:$0xff] }
 0x141   : > { %10348 = vmatprep.mubr.msk.f32.mxu1 %vm3794_vm2, %v3781_v62  ;;  %v1298_v61 = vpop.f32.mrf.mxu0  ;;  %v3787_v62 = vld [vmem:[%s12053_s15 + $0x169] sm:$0xff] }
 0x142   : > { %v1689_v24 = vpop.f32.mrf.mxu1  ;;  %v12276_v44 = vadd.f32 %v10041_v52, %v1370_v63  ;;  %v1369_v5 = vadd.f32 %v1298_v61, %v12020_v14 }
 0x143   : > { %v9994_v20 = vpop.f32.mrf.mxu0  ;;  %10293 = vmatmul.mubr.msk.f32.gmra.mxu0 %vm339_vm1, %v8643_v28  ;;  %v8649_v28 = vld [vmem:[%s11125_s10 + $0x1a2] sm:$0xff] }
 0x144   : > { %v10044_v23 = vpop.f32.mrf.mxu1  ;;  %10349 = vmatmul.mubr.msk.f32.gmra.mxu1 %vm3794_vm2, %v3782_v10  ;;  %v12281_v56 = vadd.f32 %v1689_v24, %v1369_v5  ;;  %v1372_v26 = vadd.f32 %v9994_v20, %v12026_v60  ;;  %10295 = vmatprep.mubr.msk.f32.mxu0 %vm339_vm1, %v8644_v15  ;;  %v3788_v10 = vld [vmem:[%s12053_s15 + $0x171] sm:$0xff]  ;;  %v3721_v24 = vld [vmem:[%s12053_s15] sm:$0xff] }
 0x145   : > { %10351 = vmatprep.mubr.msk.f32.mxu1 %vm3794_vm2, %v3783_v11  ;;  %v1308_v33 = vpop.f32.mrf.mxu0  ;;  %v4437_v15 = vld [vmem:[%s12053_s15 + $0x2] sm:$0xff] }
 0x146   : > { %v1699_v14 = vpop.f32.mrf.mxu1  ;;  %v12289_v19 = vadd.f32 %v10044_v23, %v1372_v26  ;;  %v1371_v48 = vadd.f32 %v1308_v33, %v12032_v18  ;;  %v3722_v26 = vld [vmem:[%s12053_s15 + $0x8] sm:$0xff] }
 0x147   : > { %v9997_v42 = vpop.f32.mrf.mxu0  ;;  %10296 = vmatmul.mubr.msk.f32.gmra.mxu0 %vm339_vm1, %v8645_v47  ;;  %v4438_v47 = vld [vmem:[%s12053_s15 + $0xa] sm:$0xff] }
 0x148   : > { %v10047_v4 = vpop.f32.mrf.mxu1  ;;  %10352 = vmatmul.mubr.msk.f32.gmra.mxu1 %vm3794_vm2, %v3784_v54  ;;  %v12294_v60 = vadd.f32 %v1699_v14, %v1371_v48  ;;  %v1374_v55 = vadd.f32 %v9997_v42, %v12038_v0  ;;  %10298 = vmatprep.mubr.msk.f32.mxu0 %vm339_vm1, %v11830_v21  ;;  %v4439_v48 = vld [vmem:[%s12053_s15 + $0x1a] sm:$0xff] }
 0x149   : > { %10354 = vmatprep.mubr.msk.f32.mxu1 %vm3794_vm2, %v3785_v17  ;;  %v1318_v59 = vpop.f32.mrf.mxu0  ;;  %v12334_v17 = vld [vmem:[%s12053_s15 + $0x18] sm:$0xff] }
 0x14a   : > { %v1709_v18 = vpop.f32.mrf.mxu1  ;;  %v12303_v13 = vadd.f32 %v10047_v4, %v1374_v55  ;;  %v1373_v45 = vadd.f32 %v1318_v59, %v12046_v22  ;;  %v8822_v4 = vld [vmem:[%s14558_s3 + $0x70] sm:$0xff]  ;;  %v12351_v59 = vld [vmem:[%s12053_s15 + $0x20] sm:$0xff] }
 0x14b   : > { %v10000_v52 = vpop.f32.mrf.mxu0  ;;  %10299 = vmatmul.mubr.msk.f32.gmra.mxu0 %vm339_vm1, %v11844_v27  ;;  %v8890_v55 = vld [vmem:[%s14558_s3 + $0x90] sm:$0xff] }
 0x14c   : > { %v10050_v0 = vpop.f32.mrf.mxu1  ;;  %10355 = vmatmul.mubr.msk.f32.gmra.mxu1 %vm3794_vm2, %v3786_v37  ;;  %v12309_v21 = vadd.f32 %v1709_v18, %v1373_v45  ;;  %v1376_v63 = vadd.f32 %v10000_v52, %v12059_v12  ;;  %10301 = vmatprep.mubr.msk.f32.mxu0 %vm339_vm1, %v8648_v46  ;;  %v4440_v18 = vld [vmem:[%s12053_s15 + $0x22] sm:$0xff]  ;;  %v12358_v45 = vld [vmem:[%s12053_s15 + $0x30] sm:$0xff] }
 0x14d   : > { %10357 = vmatprep.mubr.msk.f32.mxu1 %vm3794_vm2, %v3787_v62  ;;  %v1328_v22 = vpop.f32.mrf.mxu0  ;;  %v4441_v52 = vld [vmem:[%s12053_s15 + $0x32] sm:$0xff] }
 0x14e   : > { %v1719_v61 = vpop.f32.mrf.mxu1  ;;  %v12318_v11 = vadd.f32 %v10050_v0, %v1376_v63  ;;  %v1375_v27 = vadd.f32 %v1328_v22, %v12066_v29  ;;  %v8821_v63 = vld [vmem:[%s14558_s3 + $0x68] sm:$0xff]  ;;  %v12380_v22 = vld [vmem:[%s12053_s15 + $0x38] sm:$0xff] }
 0x14f   : > { %v10003_v5 = vpop.f32.mrf.mxu0  ;;  %10302 = vmatmul.mubr.msk.f32.gmra.mxu0 %vm339_vm1, %v8649_v28  ;;  %v8889_v28 = vld [vmem:[%s14558_s3 + $0x88] sm:$0xff] }
 0x150   : > { %v10053_v12 = vpop.f32.mrf.mxu1  ;;  %10358 = vmatmul.mubr.msk.f32.gmra.mxu1 %vm3794_vm2, %v3788_v10  ;;  %v12323_v20 = vadd.f32 %v1719_v61, %v1375_v27  ;;  %v1378_v23 = vadd.f32 %v10003_v5, %v12070_v25  ;;  %10368 = vmatprep.mubr.msk.f32.mxu0 %vm3794_vm2, %v3721_v24  ;;  %v4442_v61 = vld [vmem:[%s12053_s15 + $0x3a] sm:$0xff]  ;;  %v12384_v27 = vld [vmem:[%s12053_s15 + $0x48] sm:$0xff] }
 0x151   : > { %10424 = vmatprep.mubr.msk.f32.mxu1 %vm3794_vm2, %v4437_v15  ;;  %v1338_v54 = vpop.f32.mrf.mxu0  ;;  %v4443_v5 = vld [vmem:[%s12053_s15 + $0x4a] sm:$0xff] }
 0x152   : > { %v1729_v29 = vpop.f32.mrf.mxu1  ;;  %v12330_v33 = vadd.f32 %v10053_v12, %v1378_v23  ;;  %v1377_v14 = vadd.f32 %v1338_v54, %v12076_v30  ;;  %v8888_v54 = vld [vmem:[%s14558_s3 + $0x80] sm:$0xff] }
 0x153   : > { %v10058_v42 = vpop.f32.mrf.mxu0  ;;  %10369 = vmatmul.mubr.msk.f32.vlgmr.msra.gmra.mxu0 %vm3794_vm2, %v3722_v26 }
 0x154   : > { %v10108_v25 = vpop.f32.mrf.mxu1  ;;  %10425 = vmatmul.mubr.msk.f32.vlgmr.msra.gmra.mxu1 %vm3794_vm2, %v4438_v47  ;;  %v12345_v30 = vadd.f32 %v1729_v29, %v1377_v14  ;;  %v2129_v37 = vadd.f32 %v10058_v42, %v12096_v57  ;;  %10473 = vmatpush3.msra.mxu0 %v12146_v8  ;;  %v8820_v47 = vld [vmem:[%s14558_s3 + $0x60] sm:$0xff]  ;;  %v12406_v14 = vld [vmem:[%s12053_s15 + $0x50] sm:$0xff] }
 0x155   : > { %10529 = vmatpush3.msra.mxu1 %v12151_v50  ;;  %v1969_v46 = vpop.f32.mrf.mxu0  ;;  %10371 = vmatprep.mubr.msk.f32.mxu0 %vm3794_vm2, %v12334_v17 }
 0x156   : > { %v2359_v62 = vpop.f32.mrf.mxu1  ;;  %10427 = vmatprep.mubr.msk.f32.mxu1 %vm3794_vm2, %v4439_v48  ;;  %v12361_v57 = vadd.f32 %v10108_v25, %v2129_v37  ;;  %v2128_v8 = vadd.f32 %v1969_v46, %v12108_v16  ;;  %10474 = vmatprep.subr.mxu0 %v8822_v4  ;;  %v4444_v48 = vld [vmem:[%s12053_s15 + $0x52] sm:$0xff] }
 0x157   : > { %10530 = vmatprep.subr.mxu1 %v8890_v55  ;;  %v10061_v50 = vpop.f32.mrf.mxu0  ;;  %10372 = vmatmul.mubr.msk.f32.gmra.mxu0 %vm3794_vm2, %v12351_v59 }
 0x158   : > { %v10111_v0 = vpop.f32.mrf.mxu1  ;;  %10428 = vmatmul.mubr.msk.f32.gmra.mxu1 %vm3794_vm2, %v4440_v18  ;;  %v12373_v16 = vadd.f32 %v2359_v62, %v2128_v8  ;;  %v2131_v10 = vadd.f32 %v10061_v50, %v12118_v6  ;;  %10374 = vmatprep.mubr.msk.f32.mxu0 %vm3794_vm2, %v12358_v45  ;;  %v12422_v62 = vld [vmem:[%s14558_s3 + $0xb8] sm:$0xff]  ;;  %v12436_v50 = vld [vmem:[%s12053_s15 + $0x68] sm:$0xff] }
 0x159   : > { %10430 = vmatprep.mubr.msk.f32.mxu1 %vm3794_vm2, %v4441_v52  ;;  %v1979_v24 = vpop.f32.mrf.mxu0  ;;  %10475 = vmatpush3.msra.mxu0 %v8822_v4  ;;  %v12410_v4 = vld [vmem:[%s12053_s15 + $0x60] sm:$0xff] }
 0x15a   : > { %v2369_v15 = vpop.f32.mrf.mxu1  ;;  %10531 = vmatpush3.msra.mxu1 %v8890_v55  ;;  %v12387_v12 = vadd.f32 %v10111_v0, %v2131_v10  ;;  %v2130_v6 = vadd.f32 %v1979_v24, %v12129_v31  ;;  %10476 = vmatprep.subr.mxu0 %v8821_v63  ;;  %v4445_v55 = vld [vmem:[%s12053_s15 + $0x62] sm:$0xff]  ;;  %v4446_v0 = vld [vmem:[%s12053_s15 + $0x6a] sm:$0xff]  ;;  %v12440_v10 = vld [vmem:[%s12053_s15 + $0x78] sm:$0xff] }
 0x15b   : > { %10532 = vmatprep.subr.mxu1 %v8889_v28  ;;  %v10064_v23 = vpop.f32.mrf.mxu0  ;;  %10375 = vmatmul.mubr.msk.f32.gmra.mxu0 %vm3794_vm2, %v12380_v22 }
 0x15c   : > { %v10114_v26 = vpop.f32.mrf.mxu1  ;;  %10431 = vmatmul.mubr.msk.f32.gmra.mxu1 %vm3794_vm2, %v4442_v61  ;;  %v12399_v31 = vadd.f32 %v2369_v15, %v2130_v6  ;;  %v2133_v29 = vadd.f32 %v10064_v23, %v12138_v51  ;;  %10377 = vmatprep.mubr.msk.f32.mxu0 %vm3794_vm2, %v12384_v27  ;;  %v4447_v61 = vld [vmem:[%s12053_s15 + $0x7a] sm:$0xff] }
 0x15d   : > { %10433 = vmatprep.mubr.msk.f32.mxu1 %vm3794_vm2, %v4443_v5  ;;  %v1989_v42 = vpop.f32.mrf.mxu0  ;;  %10477 = vmatpush3.msra.mxu0 %v8821_v63 }
 0x15e   : > { %v2379_v25 = vpop.f32.mrf.mxu1  ;;  %10533 = vmatpush3.msra.mxu1 %v8889_v28  ;;  %v12413_v37 = vadd.f32 %v10114_v26, %v2133_v29  ;;  %v2132_v51 = vadd.f32 %v1989_v42, %v12153_v3  ;;  %10478 = vmatprep.subr.mxu0 %v8820_v47  ;;  %v12427_v3 = vld [vmem:[%s14558_s3 + $0xd8] sm:$0xff]  ;;  %v4448_v26 = vld [vmem:[%s12053_s15 + $0x82] sm:$0xff]  ;;  %v12462_v29 = vld [vmem:[%s12053_s15 + $0x90] sm:$0xff] }
 0x15f   : > { %10534 = vmatprep.subr.mxu1 %v8888_v54  ;;  %v10067_v18 = vpop.f32.mrf.mxu0  ;;  %10378 = vmatmul.mubr.msk.f32.gmra.mxu0 %vm3794_vm2, %v12406_v14 }
 0x160   : > { %v10117_v46 = vpop.f32.mrf.mxu1  ;;  %10434 = vmatmul.mubr.msk.f32.gmra.mxu1 %vm3794_vm2, %v4444_v48  ;;  %v12429_v52 = vadd.f32 %v2379_v25, %v2132_v51  ;;  %v2135_v8 = vadd.f32 %v10067_v18, %v12162_v7  ;;  %10380 = vmatprep.mubr.msk.f32.mxu0 %vm3794_vm2, %v12410_v4  ;;  %v4449_v48 = vld [vmem:[%s12053_s15 + $0x92] sm:$0xff] }
 0x161   : > { %10436 = vmatprep.mubr.msk.f32.mxu1 %vm3794_vm2, %v4445_v55  ;;  %v1999_v63 = vpop.f32.mrf.mxu0  ;;  %10479 = vmatpush3.msra.mxu0 %v8820_v47 }
 0x162   : > { %v2389_v28 = vpop.f32.mrf.mxu1  ;;  %10535 = vmatpush3.msra.mxu1 %v8888_v54  ;;  %v12443_v24 = vadd.f32 %v10117_v46, %v2135_v8  ;;  %v2134_v7 = vadd.f32 %v1999_v63, %v12169_v38  ;;  %10584 = vmatprep.subr.mxu0 %v12422_v62  ;;  %v12458_v38 = vld [vmem:[%s12053_s15 + $0x80] sm:$0xff]  ;;  %v12478_v46 = vld [vmem:[%s12053_s15 + $0x98] sm:$0xff]  ;;  %v12482_v63 = vld [vmem:[%s12053_s15 + $0xa8] sm:$0xff] }
 0x163   : > { %10640 = vmatprep.subr.mxu1 %v12427_v3  ;;  %v10070_v15 = vpop.f32.mrf.mxu0  ;;  %10381 = vmatmul.mubr.msk.f32.gmra.mxu0 %vm3794_vm2, %v12436_v50 }
 0x164   : > { %v10120_v5 = vpop.f32.mrf.mxu1  ;;  %10437 = vmatmul.mubr.msk.f32.gmra.mxu1 %vm3794_vm2, %v4446_v0  ;;  %v12451_v6 = vadd.f32 %v2389_v28, %v2134_v7  ;;  %v2137_v23 = vadd.f32 %v10070_v15, %v12178_v58  ;;  %10383 = vmatprep.mubr.msk.f32.mxu0 %vm3794_vm2, %v12440_v10  ;;  %v4451_v28 = vld [vmem:[%s12053_s15 + $0xaa] sm:$0xff] }
 0x165   : > { %10439 = vmatprep.mubr.msk.f32.mxu1 %vm3794_vm2, %v4447_v61  ;;  %v2009_v47 = vpop.f32.mrf.mxu0 }
 0x166   : > { %v2399_v54 = vpop.f32.mrf.mxu1  ;;  %v12465_v42 = vadd.f32 %v10120_v5, %v2137_v23  ;;  %v2136_v58 = vadd.f32 %v2009_v47, %v12183_v41  ;;  %v4450_v41 = vld [vmem:[%s12053_s15 + $0x9a] sm:$0xff] }
 0x167   : > { %v10073_v25 = vpop.f32.mrf.mxu0  ;;  %10384 = vmatmul.mubr.msk.f32.gmra.mxu0 %vm3794_vm2, %v12458_v38 }
 0x168   : > { %v10123_v55 = vpop.f32.mrf.mxu1  ;;  %10440 = vmatmul.mubr.msk.f32.gmra.mxu1 %vm3794_vm2, %v4448_v26  ;;  %v12471_v51 = vadd.f32 %v2399_v54, %v2136_v58  ;;  %v2139_v18 = vadd.f32 %v10073_v25, %v12192_v34  ;;  %10386 = vmatprep.mubr.msk.f32.mxu0 %vm3794_vm2, %v12462_v29  ;;  %v12498_v26 = vld [vmem:[%s12053_s15 + $0xb0] sm:$0xff]  ;;  %v4453_v58 = vld [vmem:[%s12053_s15 + $0xc2] sm:$0xff] }
 0x169   : > { %10442 = vmatprep.mubr.msk.f32.mxu1 %vm3794_vm2, %v4449_v48  ;;  %v2019_v8 = vpop.f32.mrf.mxu0  ;;  %v12502_v48 = vld [vmem:[%s12053_s15 + $0xc0] sm:$0xff] }
 0x16a   : > { %v2409_v0 = vpop.f32.mrf.mxu1  ;;  %v12485_v61 = vadd.f32 %v10123_v55, %v2139_v18  ;;  %v2138_v34 = vadd.f32 %v2019_v8, %v12197_v35  ;;  %v4452_v35 = vld [vmem:[%s12053_s15 + $0xb2] sm:$0xff] }
 0x16b   : > { %v10076_v7 = vpop.f32.mrf.mxu0  ;;  %10387 = vmatmul.mubr.msk.f32.gmra.mxu0 %vm3794_vm2, %v12478_v46 }
 0x16c   : > { %v10126_v15 = vpop.f32.mrf.mxu1  ;;  %10443 = vmatmul.mubr.msk.f32.gmra.mxu1 %vm3794_vm2, %v4450_v41  ;;  %v12491_v5 = vadd.f32 %v2409_v0, %v2138_v34  ;;  %v2141_v23 = vadd.f32 %v10076_v7, %v12206_v1  ;;  %10389 = vmatprep.mubr.msk.f32.mxu0 %vm3794_vm2, %v12482_v63  ;;  %v12518_v0 = vld [vmem:[%s12053_s15 + $0xc8] sm:$0xff]  ;;  %v12522_v7 = vld [vmem:[%s12053_s15 + $0xd8] sm:$0xff] }
 0x16d   : > { %10445 = vmatprep.mubr.msk.f32.mxu1 %vm3794_vm2, %v4451_v28  ;;  %v2029_v47 = vpop.f32.mrf.mxu0 }
 0x16e   : > { %v2419_v54 = vpop.f32.mrf.mxu1  ;;  %v12505_v25 = vadd.f32 %v10126_v15, %v2141_v23  ;;  %v2140_v1 = vadd.f32 %v2029_v47, %v12211_v2  ;;  %v4454_v2 = vld [vmem:[%s12053_s15 + $0xca] sm:$0xff]  ;;  %v4455_v15 = vld [vmem:[%s12053_s15 + $0xda] sm:$0xff] }
 0x16f   : > { %v10079_v55 = vpop.f32.mrf.mxu0  ;;  %10390 = vmatmul.mubr.msk.f32.gmra.mxu0 %vm3794_vm2, %v12498_v26 }
 0x170   : > { %v10129_v18 = vpop.f32.mrf.mxu1  ;;  %10446 = vmatmul.mubr.msk.f32.gmra.mxu1 %vm3794_vm2, %v4452_v35  ;;  %v12511_v41 = vadd.f32 %v2419_v54, %v2140_v1  ;;  %v2143_v8 = vadd.f32 %v10079_v55, %v12220_v39  ;;  %10392 = vmatprep.mubr.msk.f32.mxu0 %vm3794_vm2, %v12502_v48  ;;  %v12538_v1 = vld [vmem:[%s12053_s15 + $0xe0] sm:$0xff] }
 0x171   : > { %10448 = vmatprep.mubr.msk.f32.mxu1 %vm3794_vm2, %v4453_v58  ;;  %v2039_v28 = vpop.f32.mrf.mxu0 }
 0x172   : > { %v2429_v34 = vpop.f32.mrf.mxu1  ;;  %v12525_v23 = vadd.f32 %v10129_v18, %v2143_v8  ;;  %v2142_v39 = vadd.f32 %v2039_v28, %v12225_v43  ;;  %v4456_v43 = vld [vmem:[%s12053_s15 + $0xe2] sm:$0xff]  ;;  %v12542_v8 = vld [vmem:[%s12053_s15 + $0xf0] sm:$0xff] }
 0x173   : > { %v10082_v35 = vpop.f32.mrf.mxu0  ;;  %10393 = vmatmul.mubr.msk.f32.gmra.mxu0 %vm3794_vm2, %v12518_v0 }
 0x174   : > { %v10132_v47 = vpop.f32.mrf.mxu1  ;;  %10449 = vmatmul.mubr.msk.f32.gmra.mxu1 %vm3794_vm2, %v4454_v2  ;;  %v12531_v54 = vadd.f32 %v2429_v34, %v2142_v39  ;;  %v2145_v58 = vadd.f32 %v10082_v35, %v12234_v32  ;;  %10395 = vmatprep.mubr.msk.f32.mxu0 %vm3794_vm2, %v12522_v7  ;;  %v4457_v2 = vld [vmem:[%s12053_s15 + $0xf2] sm:$0xff] }
 0x175   : > { %10451 = vmatprep.mubr.msk.f32.mxu1 %vm3794_vm2, %v4455_v15  ;;  %v2049_v55 = vpop.f32.mrf.mxu0 }
 0x176   : > { %v2439_v18 = vpop.f32.mrf.mxu1  ;;  %v12545_v28 = vadd.f32 %v10132_v47, %v2145_v58  ;;  %v2144_v32 = vadd.f32 %v2049_v55, %v12239_v9  ;;  %v12558_v47 = vld [vmem:[%s12053_s15 + $0xf8] sm:$0xff] }
 0x177   : > { %v10085_v34 = vpop.f32.mrf.mxu0  ;;  %10396 = vmatmul.mubr.msk.f32.gmra.mxu0 %vm3794_vm2, %v12538_v1  ;;  %v4458_v9 = vld [vmem:[%s12053_s15 + $0xfa] sm:$0xff] }
 0x178   : > { %14681 = vst [vmem:[#allocation27_spill] sm:$0xff] %v12545_v28  ;;  %v10135_v39 = vpop.f32.mrf.mxu1  ;;  %10452 = vmatmul.mubr.msk.f32.gmra.mxu1 %vm3794_vm2, %v4456_v43  ;;  %v12551_v15 = vadd.f32 %v2439_v18, %v2144_v32  ;;  %v2147_v35 = vadd.f32 %v10085_v34, %v12248_v36  ;;  %10398 = vmatprep.mubr.msk.f32.mxu0 %vm3794_vm2, %v12542_v8  ;;  %v12562_v28 = vld [vmem:[%s12053_s15 + $0x108] sm:$0xff] }
 0x179   : > { %10454 = vmatprep.mubr.msk.f32.mxu1 %vm3794_vm2, %v4457_v2  ;;  %v2059_v58 = vpop.f32.mrf.mxu0  ;;  %v4459_v43 = vld [vmem:[%s12053_s15 + $0x10a] sm:$0xff] }
 0x17a   : > { %14682 = vst [vmem:[#allocation29_spill] sm:$0xff] %v12551_v15  ;;  %v2449_v55 = vpop.f32.mrf.mxu1  ;;  %v12565_v18 = vadd.f32 %v10135_v39, %v2147_v35  ;;  %v2146_v36 = vadd.f32 %v2059_v58, %v12253_v49  ;;  %v12578_v39 = vld [vmem:[%s12053_s15 + $0x110] sm:$0xff] }
 0x17b   : > { %v10088_v32 = vpop.f32.mrf.mxu0  ;;  %10399 = vmatmul.mubr.msk.f32.gmra.mxu0 %vm3794_vm2, %v12558_v47  ;;  %v4460_v49 = vld [vmem:[%s12053_s15 + $0x112] sm:$0xff] }
 0x17c   : > { %14683 = vst [vmem:[#allocation2_spill] sm:$0xff] %v12565_v18  ;;  %v10138_v34 = vpop.f32.mrf.mxu1  ;;  %10455 = vmatmul.mubr.msk.f32.gmra.mxu1 %vm3794_vm2, %v4458_v9  ;;  %v12571_v2 = vadd.f32 %v2449_v55, %v2146_v36  ;;  %v2149_v15 = vadd.f32 %v10088_v32, %v12262_v40  ;;  %10401 = vmatprep.mubr.msk.f32.mxu0 %vm3794_vm2, %v12562_v28  ;;  %v12582_v18 = vld [vmem:[%s12053_s15 + $0x120] sm:$0xff] }
 0x17d   : > { %10457 = vmatprep.mubr.msk.f32.mxu1 %vm3794_vm2, %v4459_v43  ;;  %v2069_v35 = vpop.f32.mrf.mxu0  ;;  %v4461_v9 = vld [vmem:[%s12053_s15 + $0x122] sm:$0xff] }
 0x17e   : > { %14684 = vst [vmem:[#allocation3_spill] sm:$0xff] %v12571_v2  ;;  %v2459_v58 = vpop.f32.mrf.mxu1  ;;  %v12585_v55 = vadd.f32 %v10138_v34, %v2149_v15  ;;  %v2148_v40 = vadd.f32 %v2069_v35, %v12267_v53  ;;  %v12598_v15 = vld [vmem:[%s12053_s15 + $0x128] sm:$0xff] }
 0x17f   : > { %v10091_v36 = vpop.f32.mrf.mxu0  ;;  %10402 = vmatmul.mubr.msk.f32.gmra.mxu0 %vm3794_vm2, %v12578_v39  ;;  %v4462_v53 = vld [vmem:[%s12053_s15 + $0x12a] sm:$0xff] }
 0x180   : > { %14685 = vst [vmem:[#allocation4_spill] sm:$0xff] %v12585_v55  ;;  %v10141_v32 = vpop.f32.mrf.mxu1  ;;  %10458 = vmatmul.mubr.msk.f32.gmra.mxu1 %vm3794_vm2, %v4460_v49  ;;  %v12591_v43 = vadd.f32 %v2459_v58, %v2148_v40  ;;  %v2151_v2 = vadd.f32 %v10091_v36, %v12276_v44  ;;  %10404 = vmatprep.mubr.msk.f32.mxu0 %vm3794_vm2, %v12582_v18  ;;  %v12602_v55 = vld [vmem:[%s12053_s15 + $0x138] sm:$0xff] }
 0x181   : > { %10460 = vmatprep.mubr.msk.f32.mxu1 %vm3794_vm2, %v4461_v9  ;;  %v2079_v34 = vpop.f32.mrf.mxu0  ;;  %v4463_v49 = vld [vmem:[%s12053_s15 + $0x13a] sm:$0xff] }
 0x182   : > { %14686 = vst [vmem:[#allocation5_spill] sm:$0xff] %v12591_v43  ;;  %v2469_v35 = vpop.f32.mrf.mxu1  ;;  %v12605_v58 = vadd.f32 %v10141_v32, %v2151_v2  ;;  %v2150_v44 = vadd.f32 %v2079_v34, %v12281_v56  ;;  %v12618_v2 = vld [vmem:[%s12053_s15 + $0x140] sm:$0xff] }
 0x183   : > { %v10094_v40 = vpop.f32.mrf.mxu0  ;;  %10405 = vmatmul.mubr.msk.f32.gmra.mxu0 %vm3794_vm2, %v12598_v15  ;;  %v4464_v56 = vld [vmem:[%s12053_s15 + $0x142] sm:$0xff] }
 0x184   : > { %14687 = vst [vmem:[#allocation6_spill] sm:$0xff] %v12605_v58  ;;  %v10144_v36 = vpop.f32.mrf.mxu1  ;;  %10461 = vmatmul.mubr.msk.f32.gmra.mxu1 %vm3794_vm2, %v4462_v53  ;;  %v12611_v9 = vadd.f32 %v2469_v35, %v2150_v44  ;;  %v2153_v43 = vadd.f32 %v10094_v40, %v12289_v19  ;;  %10407 = vmatprep.mubr.msk.f32.mxu0 %vm3794_vm2, %v12602_v55  ;;  %v12622_v58 = vld [vmem:[%s12053_s15 + $0x150] sm:$0xff] }
 0x185   : > { %10463 = vmatprep.mubr.msk.f32.mxu1 %vm3794_vm2, %v4463_v49  ;;  %v2089_v32 = vpop.f32.mrf.mxu0  ;;  %v4465_v53 = vld [vmem:[%s12053_s15 + $0x152] sm:$0xff] }
 0x186   : > { %14688 = vst [vmem:[#allocation7_spill] sm:$0xff] %v12611_v9  ;;  %v2479_v34 = vpop.f32.mrf.mxu1  ;;  %v12625_v35 = vadd.f32 %v10144_v36, %v2153_v43  ;;  %v2152_v19 = vadd.f32 %v2089_v32, %v12294_v60  ;;  %v12638_v43 = vld [vmem:[%s12053_s15 + $0x158] sm:$0xff] }
 0x187   : > { %v10097_v44 = vpop.f32.mrf.mxu0  ;;  %10408 = vmatmul.mubr.msk.f32.gmra.mxu0 %vm3794_vm2, %v12618_v2  ;;  %14691 = vst [vmem:[#allocation10_spill] sm:$0xff] %v12638_v43  ;;  %v4466_v60 = vld [vmem:[%s12053_s15 + $0x15a] sm:$0xff] }
 0x188   : > { %14689 = vst [vmem:[#allocation8_spill] sm:$0xff] %v12625_v35  ;;  %v10147_v40 = vpop.f32.mrf.mxu1  ;;  %10464 = vmatmul.mubr.msk.f32.gmra.mxu1 %vm3794_vm2, %v4464_v56  ;;  %v12631_v49 = vadd.f32 %v2479_v34, %v2152_v19  ;;  %v2155_v9 = vadd.f32 %v10097_v44, %v12303_v13  ;;  %10410 = vmatprep.mubr.msk.f32.mxu0 %vm3794_vm2, %v12622_v58  ;;  %v12642_v35 = vld [vmem:[%s12053_s15 + $0x168] sm:$0xff] }
 0x189   : > { %10466 = vmatprep.mubr.msk.f32.mxu1 %vm3794_vm2, %v4465_v53  ;;  %v2099_v36 = vpop.f32.mrf.mxu0  ;;  %v4467_v56 = vld [vmem:[%s12053_s15 + $0x16a] sm:$0xff] }
 0x18a   : > { %14690 = vst [vmem:[#allocation9_spill] sm:$0xff] %v12631_v49  ;;  %v2489_v32 = vpop.f32.mrf.mxu1  ;;  %v12645_v34 = vadd.f32 %v10147_v40, %v2155_v9  ;;  %v2154_v13 = vadd.f32 %v2099_v36, %v12309_v21  ;;  %v12658_v9 = vld [vmem:[%s12053_s15 + $0x170] sm:$0xff] }
 0x18b   : > { %v10100_v19 = vpop.f32.mrf.mxu0  ;;  %10411 = vmatmul.mubr.msk.f32.gmra.mxu0 %vm3794_vm2, %v12638_v43  ;;  %v4468_v21 = vld [vmem:[%s12053_s15 + $0x172] sm:$0xff] }
 0x18c   : > { %14692 = vst [vmem:[#allocation11_spill] sm:$0xff] %v12645_v34  ;;  %v10150_v44 = vpop.f32.mrf.mxu1  ;;  %10467 = vmatmul.mubr.msk.f32.gmra.mxu1 %vm3794_vm2, %v4466_v60  ;;  %v12651_v53 = vadd.f32 %v2489_v32, %v2154_v13  ;;  %v2157_v49 = vadd.f32 %v10100_v19, %v12318_v11  ;;  %10413 = vmatprep.mubr.msk.f32.mxu0 %vm3794_vm2, %v12642_v35  ;;  %v8856_v34 = vld [vmem:[%s12053_s15 + $0x19] sm:$0xff] }
 0x18d   : > { %10469 = vmatprep.mubr.msk.f32.mxu1 %vm3794_vm2, %v4467_v56  ;;  %v2109_v40 = vpop.f32.mrf.mxu0 }
 0x18e   : > { %v2499_v36 = vpop.f32.mrf.mxu1  ;;  %v12662_v43 = vadd.f32 %v10150_v44, %v2157_v49  ;;  %v2156_v60 = vadd.f32 %v2109_v40, %v12323_v20  ;;  %v8857_v49 = vld [vmem:[%s12053_s15 + $0x21] sm:$0xff] }
 0x18f   : > { %v10103_v32 = vpop.f32.mrf.mxu0  ;;  %10414 = vmatmul.mubr.msk.f32.gmra.mxu0 %vm3794_vm2, %v12658_v9 }
 0x190   : > { %14693 = vst [vmem:[#allocation12_spill] sm:$0xff] %v12662_v43  ;;  %v10153_v13 = vpop.f32.mrf.mxu1  ;;  %10470 = vmatmul.mubr.msk.f32.gmra.mxu1 %vm3794_vm2, %v4468_v21  ;;  %v12668_v11 = vadd.f32 %v2499_v36, %v2156_v60  ;;  %v2159_v56 = vadd.f32 %v10103_v32, %v12330_v33  ;;  %10480 = vmatprep.mubr.msk.f32.mxu0 %vm3794_vm2, %v12334_v17  ;;  %v8858_v43 = vld [vmem:[%s12053_s15 + $0x31] sm:$0xff]  ;;  %v8859_v60 = vld [vmem:[%s12053_s15 + $0x39] sm:$0xff] }
 0x191   : > { %10536 = vmatprep.mubr.msk.f32.mxu1 %vm3794_vm2, %v8856_v34  ;;  %v2119_v19 = vpop.f32.mrf.mxu0  ;;  %v8958_v33 = vld [vmem:[%s14558_s3 + $0xb0] sm:$0xff] }
 0x192   : > { %v2509_v20 = vpop.f32.mrf.mxu1  ;;  %v12675_v44 = vadd.f32 %v10153_v13, %v2159_v56  ;;  %v2158_v40 = vadd.f32 %v2119_v19, %v12345_v30  ;;  %v9026_v17 = vld [vmem:[%s14558_s3 + $0xd0] sm:$0xff] }
 0x193   : > { %v10158_v21 = vpop.f32.mrf.mxu0  ;;  %10481 = vmatmul.mubr.msk.f32.vlgmr.msra.gmra.mxu0 %vm3794_vm2, %v12351_v59  ;;  %v8860_v13 = vld [vmem:[%s12053_s15 + $0x49] sm:$0xff] }
 0x194   : > { %v10208_v36 = vpop.f32.mrf.mxu1  ;;  %10537 = vmatmul.mubr.msk.f32.vlgmr.msra.gmra.mxu1 %vm3794_vm2, %v8857_v49  ;;  %v12688_v34 = vadd.f32 %v2509_v20, %v2158_v40  ;;  %v2910_v30 = vadd.f32 %v10158_v21, %v12361_v57  ;;  %10585 = vmatpush3.msra.mxu0 %v12422_v62  ;;  %v8862_v40 = vld [vmem:[%s12053_s15 + $0x61] sm:$0xff] }
 0x195   : > { %10641 = vmatpush3.msra.mxu1 %v12427_v3  ;;  %v2750_v59 = vpop.f32.mrf.mxu0  ;;  %10483 = vmatprep.mubr.msk.f32.mxu0 %vm3794_vm2, %v12358_v45  ;;  %v8957_v45 = vld [vmem:[%s14558_s3 + $0xa8] sm:$0xff] }
 0x196   : > { %v3140_v32 = vpop.f32.mrf.mxu1  ;;  %10539 = vmatprep.mubr.msk.f32.mxu1 %vm3794_vm2, %v8858_v43  ;;  %v12698_v56 = vadd.f32 %v10208_v36, %v2910_v30  ;;  %v2909_v49 = vadd.f32 %v2750_v59, %v12373_v16  ;;  %10586 = vmatprep.subr.mxu0 %v8958_v33  ;;  %v9025_v3 = vld [vmem:[%s14558_s3 + $0xc8] sm:$0xff] }
 0x197   : > { %10642 = vmatprep.subr.mxu1 %v9026_v17  ;;  %v10161_v57 = vpop.f32.mrf.mxu0  ;;  %10484 = vmatmul.mubr.msk.f32.gmra.mxu0 %vm3794_vm2, %v12380_v22  ;;  %v8861_v22 = vld [vmem:[%s12053_s15 + $0x51] sm:$0xff] }
 0x198   : > { %v10211_v62 = vpop.f32.mrf.mxu1  ;;  %10540 = vmatmul.mubr.msk.f32.gmra.mxu1 %vm3794_vm2, %v8859_v60  ;;  %v12710_v43 = vadd.f32 %v3140_v32, %v2909_v49  ;;  %v2912_v16 = vadd.f32 %v10161_v57, %v12387_v12  ;;  %10486 = vmatprep.mubr.msk.f32.mxu0 %vm3794_vm2, %v12384_v27  ;;  %v8956_v27 = vld [vmem:[%s14558_s3 + $0xa0] sm:$0xff] }
 0x199   : > { %10542 = vmatprep.mubr.msk.f32.mxu1 %vm3794_vm2, %v8860_v13  ;;  %v2760_v19 = vpop.f32.mrf.mxu0  ;;  %10587 = vmatpush3.msra.mxu0 %v8958_v33  ;;  %v9024_v33 = vld [vmem:[%s14558_s3 + $0xc0] sm:$0xff] }
 0x19a   : > { %v3150_v20 = vpop.f32.mrf.mxu1  ;;  %10643 = vmatpush3.msra.mxu1 %v9026_v17  ;;  %v12718_v21 = vadd.f32 %v10211_v62, %v2912_v16  ;;  %v2911_v36 = vadd.f32 %v2760_v19, %v12399_v31  ;;  %10588 = vmatprep.subr.mxu0 %v8957_v45  ;;  %v8864_v32 = vld [vmem:[%s12053_s15 + $0x79] sm:$0xff] }
 0x19b   : > { %10644 = vmatprep.subr.mxu1 %v9025_v3  ;;  %v10164_v12 = vpop.f32.mrf.mxu0  ;;  %10487 = vmatmul.mubr.msk.f32.gmra.mxu0 %vm3794_vm2, %v12406_v14  ;;  %v8863_v14 = vld [vmem:[%s12053_s15 + $0x69] sm:$0xff]  ;;  %v12752_v62 = vld [vmem:[%s14558_s3 + $0x118] sm:$0xff] }
 0x19c   : > { %v10214_v30 = vpop.f32.mrf.mxu1  ;;  %10543 = vmatmul.mubr.msk.f32.gmra.mxu1 %vm3794_vm2, %v8861_v22  ;;  %v12730_v17 = vadd.f32 %v3150_v20, %v2911_v36  ;;  %v2914_v31 = vadd.f32 %v10164_v12, %v12413_v37  ;;  %10489 = vmatprep.mubr.msk.f32.mxu0 %vm3794_vm2, %v12410_v4  ;;  %v12747_v4 = vld [vmem:[%s14558_s3 + $0xf8] sm:$0xff] }
 0x19d   : > { %10545 = vmatprep.mubr.msk.f32.mxu1 %vm3794_vm2, %v8862_v40  ;;  %v2770_v60 = vpop.f32.mrf.mxu0  ;;  %10589 = vmatpush3.msra.mxu0 %v8957_v45  ;;  %v8866_v22 = vld [vmem:[%s12053_s15 + $0x91] sm:$0xff] }
 0x19e   : > { %v3160_v59 = vpop.f32.mrf.mxu1  ;;  %10645 = vmatpush3.msra.mxu1 %v9025_v3  ;;  %v12738_v13 = vadd.f32 %v10214_v30, %v2914_v31  ;;  %v2913_v49 = vadd.f32 %v2770_v60, %v12429_v52  ;;  %10590 = vmatprep.subr.mxu0 %v8956_v27  ;;  %v8869_v60 = vld [vmem:[%s12053_s15 + $0xb1] sm:$0xff] }
 0x19f   : > { %10646 = vmatprep.subr.mxu1 %v9024_v33  ;;  %v10167_v37 = vpop.f32.mrf.mxu0  ;;  %10490 = vmatmul.mubr.msk.f32.gmra.mxu0 %vm3794_vm2, %v12436_v50  ;;  %v8865_v50 = vld [vmem:[%s12053_s15 + $0x81] sm:$0xff] }
 0x1a0   : > { %v10217_v57 = vpop.f32.mrf.mxu1  ;;  %10546 = vmatmul.mubr.msk.f32.gmra.mxu1 %vm3794_vm2, %v8863_v14  ;;  %v12754_v52 = vadd.f32 %v3160_v59, %v2913_v49  ;;  %v2916_v45 = vadd.f32 %v10167_v37, %v12443_v24  ;;  %10492 = vmatprep.mubr.msk.f32.mxu0 %vm3794_vm2, %v12440_v10 }
 0x1a1   : > { %10548 = vmatprep.mubr.msk.f32.mxu1 %vm3794_vm2, %v8864_v32  ;;  %v2780_v3 = vpop.f32.mrf.mxu0  ;;  %10591 = vmatpush3.msra.mxu0 %v8956_v27  ;;  %v8868_v27 = vld [vmem:[%s12053_s15 + $0xa9] sm:$0xff]  ;;  %v8870_v32 = vld [vmem:[%s12053_s15 + $0xc1] sm:$0xff] }
 0x1a2   : > { %v3170_v16 = vpop.f32.mrf.mxu1  ;;  %10647 = vmatpush3.msra.mxu1 %v9024_v33  ;;  %v12762_v19 = vadd.f32 %v10217_v57, %v2916_v45  ;;  %v2915_v20 = vadd.f32 %v2780_v3, %v12451_v6  ;;  %10696 = vmatprep.subr.mxu0 %v12747_v4  ;;  %v8867_v6 = vld [vmem:[%s12053_s15 + $0x99] sm:$0xff]  ;;  %v8871_v45 = vld [vmem:[%s12053_s15 + $0xc9] sm:$0xff] }
 0x1a3   : > { %10752 = vmatprep.subr.mxu1 %v12752_v62  ;;  %v10170_v24 = vpop.f32.mrf.mxu0  ;;  %10493 = vmatmul.mubr.msk.f32.gmra.mxu0 %vm3794_vm2, %v12458_v38  ;;  %v8872_v3 = vld [vmem:[%s12053_s15 + $0xd9] sm:$0xff] }
 0x1a4   : > { %v10220_v10 = vpop.f32.mrf.mxu1  ;;  %10549 = vmatmul.mubr.msk.f32.gmra.mxu1 %vm3794_vm2, %v8865_v50  ;;  %v12770_v40 = vadd.f32 %v3170_v16, %v2915_v20  ;;  %v2918_v36 = vadd.f32 %v10170_v24, %v12465_v42  ;;  %10495 = vmatprep.mubr.msk.f32.mxu0 %vm3794_vm2, %v12462_v29  ;;  %v8873_v24 = vld [vmem:[%s12053_s15 + $0xe1] sm:$0xff] }
 0x1a5   : > { %10551 = vmatprep.mubr.msk.f32.mxu1 %vm3794_vm2, %v8866_v22  ;;  %v2790_v12 = vpop.f32.mrf.mxu0 }
 0x1a6   : > { %v3180_v30 = vpop.f32.mrf.mxu1  ;;  %v12778_v33 = vadd.f32 %v10220_v10, %v2918_v36  ;;  %v2917_v38 = vadd.f32 %v2790_v12, %v12471_v51  ;;  %v8874_v36 = vld [vmem:[%s12053_s15 + $0xf1] sm:$0xff] }
 0x1a7   : > { %v10173_v31 = vpop.f32.mrf.mxu0  ;;  %10496 = vmatmul.mubr.msk.f32.gmra.mxu0 %vm3794_vm2, %v12478_v46 }
 0x1a8   : > { %v10223_v14 = vpop.f32.mrf.mxu1  ;;  %10552 = vmatmul.mubr.msk.f32.gmra.mxu1 %vm3794_vm2, %v8867_v6  ;;  %v12784_v29 = vadd.f32 %v3180_v30, %v2917_v38  ;;  %v2920_v42 = vadd.f32 %v10173_v31, %v12485_v61  ;;  %10498 = vmatprep.mubr.msk.f32.mxu0 %vm3794_vm2, %v12482_v63  ;;  %v8875_v38 = vld [vmem:[%s12053_s15 + $0xf9] sm:$0xff] }
 0x1a9   : > { %10554 = vmatprep.mubr.msk.f32.mxu1 %vm3794_vm2, %v8868_v27  ;;  %v2800_v59 = vpop.f32.mrf.mxu0 }
 0x1aa   : > { %v3190_v51 = vpop.f32.mrf.mxu1  ;;  %v12792_v49 = vadd.f32 %v10223_v14, %v2920_v42  ;;  %v2919_v46 = vadd.f32 %v2800_v59, %v12491_v5  ;;  %v8876_v14 = vld [vmem:[%s12053_s15 + $0x109] sm:$0xff] }
 0x1ab   : > { %v10176_v37 = vpop.f32.mrf.mxu0  ;;  %10499 = vmatmul.mubr.msk.f32.gmra.mxu0 %vm3794_vm2, %v12498_v26 }
 0x1ac   : > { %v10226_v57 = vpop.f32.mrf.mxu1  ;;  %10555 = vmatmul.mubr.msk.f32.gmra.mxu1 %vm3794_vm2, %v8869_v60  ;;  %v12798_v63 = vadd.f32 %v3190_v51, %v2919_v46  ;;  %v2922_v61 = vadd.f32 %v10176_v37, %v12505_v25  ;;  %10501 = vmatprep.mubr.msk.f32.mxu0 %vm3794_vm2, %v12502_v48  ;;  %v8877_v37 = vld [vmem:[%s12053_s15 + $0x111] sm:$0xff] }
 0x1ad   : > { %10557 = vmatprep.mubr.msk.f32.mxu1 %vm3794_vm2, %v8870_v32  ;;  %v2810_v50 = vpop.f32.mrf.mxu0  ;;  %v14696_v32 = vld [vmem:[#allocation2_spill] sm:$0xff] }
 0x1ae   : > { %v3200_v5 = vpop.f32.mrf.mxu1  ;;  %v12806_v16 = vadd.f32 %v10226_v57, %v2922_v61  ;;  %v2921_v26 = vadd.f32 %v2810_v50, %v12511_v41 }
 0x1af   : > { %v10179_v22 = vpop.f32.mrf.mxu0  ;;  %10502 = vmatmul.mubr.msk.f32.gmra.mxu0 %vm3794_vm2, %v12518_v0 }
 0x1b0   : > { %v10229_v20 = vpop.f32.mrf.mxu1  ;;  %10558 = vmatmul.mubr.msk.f32.gmra.mxu1 %vm3794_vm2, %v8871_v45  ;;  %v12812_v48 = vadd.f32 %v3200_v5, %v2921_v26  ;;  %v2924_v25 = vadd.f32 %v10179_v22, %v12525_v23  ;;  %10504 = vmatprep.mubr.msk.f32.mxu0 %vm3794_vm2, %v12522_v7  ;;  %v14694_v23 = vld [vmem:[#allocation27_spill] sm:$0xff]  ;;  %v14698_v22 = vld [vmem:[#allocation4_spill] sm:$0xff] }
 0x1b1   : > { %10560 = vmatprep.mubr.msk.f32.mxu1 %vm3794_vm2, %v8872_v3  ;;  %v2820_v10 = vpop.f32.mrf.mxu0  ;;  %v8878_v45 = vld [vmem:[%s12053_s15 + $0x121] sm:$0xff] }
 0x1b2   : > { %v3210_v41 = vpop.f32.mrf.mxu1  ;;  %v12820_v6 = vadd.f32 %v10229_v20, %v2924_v25  ;;  %v2923_v0 = vadd.f32 %v2820_v10, %v12531_v54  ;;  %v8879_v25 = vld [vmem:[%s12053_s15 + $0x129] sm:$0xff] }
 0x1b3   : > { %v10182_v12 = vpop.f32.mrf.mxu0  ;;  %10505 = vmatmul.mubr.msk.f32.gmra.mxu0 %vm3794_vm2, %v12538_v1  ;;  %v14695_v1 = vld [vmem:[#allocation29_spill] sm:$0xff] }
 0x1b4   : > { %v10232_v30 = vpop.f32.mrf.mxu1  ;;  %10561 = vmatmul.mubr.msk.f32.gmra.mxu1 %vm3794_vm2, %v8873_v24  ;;  %v12826_v7 = vadd.f32 %v3210_v41, %v2923_v0  ;;  %v2926_v27 = vadd.f32 %v10182_v12, %v14694_v23  ;;  %10507 = vmatprep.mubr.msk.f32.mxu0 %vm3794_vm2, %v12542_v8  ;;  %v8880_v41 = vld [vmem:[%s12053_s15 + $0x139] sm:$0xff] }
 0x1b5   : > { %10563 = vmatprep.mubr.msk.f32.mxu1 %vm3794_vm2, %v8874_v36  ;;  %v2830_v31 = vpop.f32.mrf.mxu0  ;;  %v14700_v23 = vld [vmem:[#allocation6_spill] sm:$0xff] }
 0x1b6   : > { %v3220_v54 = vpop.f32.mrf.mxu1  ;;  %v12834_v42 = vadd.f32 %v10232_v30, %v2926_v27  ;;  %v2925_v60 = vadd.f32 %v2830_v31, %v14695_v1 }
 0x1b7   : > { %v10185_v59 = vpop.f32.mrf.mxu0  ;;  %10508 = vmatmul.mubr.msk.f32.gmra.mxu0 %vm3794_vm2, %v12558_v47  ;;  %v14697_v47 = vld [vmem:[#allocation3_spill] sm:$0xff] }
 0x1b8   : > { %v10235_v51 = vpop.f32.mrf.mxu1  ;;  %10564 = vmatmul.mubr.msk.f32.gmra.mxu1 %vm3794_vm2, %v8875_v38  ;;  %v12840_v8 = vadd.f32 %v3220_v54, %v2925_v60  ;;  %v2928_v46 = vadd.f32 %v10185_v59, %v14696_v32  ;;  %10510 = vmatprep.mubr.msk.f32.mxu0 %vm3794_vm2, %v12562_v28  ;;  %v8881_v38 = vld [vmem:[%s12053_s15 + $0x141] sm:$0xff]  ;;  %v14702_v32 = vld [vmem:[#allocation8_spill] sm:$0xff] }
 0x1b9   : > { %10566 = vmatprep.mubr.msk.f32.mxu1 %vm3794_vm2, %v8876_v14  ;;  %v2840_v57 = vpop.f32.mrf.mxu0  ;;  %v8882_v14 = vld [vmem:[%s12053_s15 + $0x151] sm:$0xff] }
 0x1ba   : > { %v3230_v61 = vpop.f32.mrf.mxu1  ;;  %v12848_v50 = vadd.f32 %v10235_v51, %v2928_v46  ;;  %v2927_v5 = vadd.f32 %v2840_v57, %v14697_v47 }
 0x1bb   : > { %v10188_v3 = vpop.f32.mrf.mxu0  ;;  %10511 = vmatmul.mubr.msk.f32.gmra.mxu0 %vm3794_vm2, %v12578_v39  ;;  %v14699_v39 = vld [vmem:[#allocation5_spill] sm:$0xff] }
 0x1bc   : > { %v10238_v26 = vpop.f32.mrf.mxu1  ;;  %10567 = vmatmul.mubr.msk.f32.gmra.mxu1 %vm3794_vm2, %v8877_v37  ;;  %v12854_v28 = vadd.f32 %v3230_v61, %v2927_v5  ;;  %v2930_v20 = vadd.f32 %v10188_v3, %v14698_v22  ;;  %10513 = vmatprep.mubr.msk.f32.mxu0 %vm3794_vm2, %v12582_v18  ;;  %v8883_v37 = vld [vmem:[%s12053_s15 + $0x159] sm:$0xff] }
 0x1bd   : > { %10569 = vmatprep.mubr.msk.f32.mxu1 %vm3794_vm2, %v8878_v45  ;;  %v2850_v24 = vpop.f32.mrf.mxu0  ;;  %v8884_v45 = vld [vmem:[%s12053_s15 + $0x169] sm:$0xff]  ;;  %v14704_v22 = vld [vmem:[#allocation10_spill] sm:$0xff] }
 0x1be   : > { %v3240_v10 = vpop.f32.mrf.mxu1  ;;  %v12862_v36 = vadd.f32 %v10238_v26, %v2930_v20  ;;  %v2929_v0 = vadd.f32 %v2850_v24, %v14699_v39  ;;  %v14705_v20 = vld [vmem:[#allocation11_spill] sm:$0xff]  ;;  %v8885_v24 = vld [vmem:[%s12053_s15 + $0x171] sm:$0xff]  ;;  %v12904_v39 = vld [vmem:[%s12053_s15 + $0x180] sm:$0xff] }
 0x1bf   : > { %v10191_v12 = vpop.f32.mrf.mxu0  ;;  %10514 = vmatmul.mubr.msk.f32.gmra.mxu0 %vm3794_vm2, %v12598_v15  ;;  %v14701_v15 = vld [vmem:[#allocation7_spill] sm:$0xff] }
 0x1c0   : > { %v10241_v30 = vpop.f32.mrf.mxu1  ;;  %10570 = vmatmul.mubr.msk.f32.gmra.mxu1 %vm3794_vm2, %v8879_v25  ;;  %v12868_v18 = vadd.f32 %v3240_v10, %v2929_v0  ;;  %v2932_v27 = vadd.f32 %v10191_v12, %v14700_v23  ;;  %10516 = vmatprep.mubr.msk.f32.mxu0 %vm3794_vm2, %v12602_v55  ;;  %v8886_v0 = vld [vmem:[%s12053_s15 + $0x181] sm:$0xff] }
 0x1c1   : > { %10572 = vmatprep.mubr.msk.f32.mxu1 %vm3794_vm2, %v8880_v41  ;;  %v2860_v31 = vpop.f32.mrf.mxu0 }
 0x1c2   : > { %v3250_v54 = vpop.f32.mrf.mxu1  ;;  %v12876_v1 = vadd.f32 %v10241_v30, %v2932_v27  ;;  %v2931_v60 = vadd.f32 %v2860_v31, %v14701_v15 }
 0x1c3   : > { %v10194_v59 = vpop.f32.mrf.mxu0  ;;  %10517 = vmatmul.mubr.msk.f32.gmra.mxu0 %vm3794_vm2, %v12618_v2  ;;  %v14703_v2 = vld [vmem:[#allocation9_spill] sm:$0xff] }
 0x1c4   : > { %v10244_v51 = vpop.f32.mrf.mxu1  ;;  %10573 = vmatmul.mubr.msk.f32.gmra.mxu1 %vm3794_vm2, %v8881_v38  ;;  %v12882_v55 = vadd.f32 %v3250_v54, %v2931_v60  ;;  %v2934_v46 = vadd.f32 %v10194_v59, %v14702_v32  ;;  %10519 = vmatprep.mubr.msk.f32.mxu0 %vm3794_vm2, %v12622_v58  ;;  %v14706_v38 = vld [vmem:[#allocation12_spill] sm:$0xff]  ;;  %v12920_v54 = vld [vmem:[%s12053_s15 + $0x188] sm:$0xff]  ;;  %v8924_v60 = vld [vmem:[%s12053_s15 + $0x1a] sm:$0xff] }
 0x1c5   : > { %10575 = vmatprep.mubr.msk.f32.mxu1 %vm3794_vm2, %v8882_v14  ;;  %v2870_v57 = vpop.f32.mrf.mxu0 }
 0x1c6   : > { %v3260_v61 = vpop.f32.mrf.mxu1  ;;  %v12890_v47 = vadd.f32 %v10244_v51, %v2934_v46  ;;  %v2933_v5 = vadd.f32 %v2870_v57, %v14703_v2 }
 0x1c7   : > { %v10197_v3 = vpop.f32.mrf.mxu0  ;;  %10520 = vmatmul.mubr.msk.f32.gmra.mxu0 %vm3794_vm2, %v14704_v22  ;;  %v8994_v22 = vld [vmem:[%s12053_s15 + $0x48] sm:$0xff] }
 0x1c8   : > { %v10247_v26 = vpop.f32.mrf.mxu1  ;;  %10576 = vmatmul.mubr.msk.f32.gmra.mxu1 %vm3794_vm2, %v8883_v37  ;;  %v12896_v58 = vadd.f32 %v3260_v61, %v2933_v5  ;;  %v2936_v25 = vadd.f32 %v10197_v3, %v14705_v20  ;;  %10522 = vmatprep.mubr.msk.f32.mxu0 %vm3794_vm2, %v12642_v35  ;;  %v8925_v61 = vld [vmem:[%s12053_s15 + $0x22] sm:$0xff] }
 0x1c9   : > { %10578 = vmatprep.mubr.msk.f32.mxu1 %vm3794_vm2, %v8884_v45  ;;  %v2880_v10 = vpop.f32.mrf.mxu0  ;;  %v8993_v45 = vld [vmem:[%s12053_s15 + $0x38] sm:$0xff] }
 0x1ca   : > { %v3270_v41 = vpop.f32.mrf.mxu1  ;;  %v12907_v12 = vadd.f32 %v10247_v26, %v2936_v25  ;;  %v2935_v30 = vadd.f32 %v2880_v10, %v12651_v53  ;;  %v8887_v53 = vld [vmem:[%s12053_s15 + $0x189] sm:$0xff]  ;;  %v12942_v26 = vld [vmem:[%s12053_s15 + $0x32] sm:$0xff] }
 0x1cb   : > { %v10200_v23 = vpop.f32.mrf.mxu0  ;;  %10523 = vmatmul.mubr.msk.f32.gmra.mxu0 %vm3794_vm2, %v12658_v9  ;;  %v8992_v9 = vld [vmem:[%s12053_s15 + $0x30] sm:$0xff] }
 0x1cc   : > { %v10250_v27 = vpop.f32.mrf.mxu1  ;;  %10579 = vmatmul.mubr.msk.f32.gmra.mxu1 %vm3794_vm2, %v8885_v24  ;;  %v12913_v35 = vadd.f32 %v3270_v41, %v2935_v30  ;;  %v2938_v31 = vadd.f32 %v10200_v23, %v14706_v38  ;;  %10525 = vmatprep.mubr.msk.f32.mxu0 %vm3794_vm2, %v12904_v39  ;;  %v9094_v25 = vld [vmem:[%s14558_s3 + $0xf0] sm:$0xff]  ;;  %v12963_v41 = vld [vmem:[%s12053_s15 + $0x3a] sm:$0xff] }
 0x1cd   : > { %10581 = vmatprep.mubr.msk.f32.mxu1 %vm3794_vm2, %v8886_v0  ;;  %v2890_v14 = vpop.f32.mrf.mxu0  ;;  %v8995_v0 = vld [vmem:[%s12053_s15 + $0x50] sm:$0xff] }
 0x1ce   : > { %v3280_v15 = vpop.f32.mrf.mxu1  ;;  %v12925_v59 = vadd.f32 %v10250_v27, %v2938_v31  ;;  %v2937_v51 = vadd.f32 %v2890_v14, %v12668_v11  ;;  %v12972_v27 = vld [vmem:[%s12053_s15 + $0x4a] sm:$0xff]  ;;  %v12996_v14 = vld [vmem:[%s12053_s15 + $0x52] sm:$0xff] }
 0x1cf   : > { %v10203_v32 = vpop.f32.mrf.mxu0  ;;  %10526 = vmatmul.mubr.msk.f32.gmra.mxu0 %vm3794_vm2, %v12920_v54  ;;  %v9093_v31 = vld [vmem:[%s14558_s3 + $0xe8] sm:$0xff] }
 0x1d0   : > { %v10253_v46 = vpop.f32.mrf.mxu1  ;;  %10582 = vmatmul.mubr.msk.f32.gmra.mxu1 %vm3794_vm2, %v8887_v53  ;;  %v12931_v37 = vadd.f32 %v3280_v15, %v2937_v51  ;;  %v2940_v57 = vadd.f32 %v10203_v32, %v12675_v44  ;;  %10592 = vmatprep.mubr.msk.f32.mxu0 %vm3794_vm2, %v8924_v60  ;;  %v8997_v15 = vld [vmem:[%s12053_s15 + $0x68] sm:$0xff]  ;;  %v8998_v32 = vld [vmem:[%s12053_s15 + $0x78] sm:$0xff] }
 0x1d1   : > { %10648 = vmatprep.mubr.msk.f32.mxu1 %vm3794_vm2, %v8992_v9  ;;  %v2900_v2 = vpop.f32.mrf.mxu0  ;;  %v13002_v51 = vld [vmem:[%s12053_s15 + $0x62] sm:$0xff] }
 0x1d2   : > { %v3290_v11 = vpop.f32.mrf.mxu1  ;;  %v12938_v5 = vadd.f32 %v10253_v46, %v2940_v57  ;;  %v2939_v3 = vadd.f32 %v2900_v2, %v12688_v34  ;;  %v9162_v34 = vld [vmem:[%s14558_s3 + $0x110] sm:$0xff] }
 0x1d3   : > { %v10258_v20 = vpop.f32.mrf.mxu0  ;;  %10593 = vmatmul.mubr.msk.f32.vlgmr.msra.gmra.mxu0 %vm3794_vm2, %v8925_v61  ;;  %v9092_v61 = vld [vmem:[%s14558_s3 + $0xe0] sm:$0xff]  ;;  %v13026_v2 = vld [vmem:[%s12053_s15 + $0x6a] sm:$0xff] }
 0x1d4   : > { %v12945_v44 = vpop.f32.mrf.mxu1  ;;  %10649 = vmatmul.mubr.msk.f32.vlgmr.msra.gmra.mxu1 %vm3794_vm2, %v8993_v45  ;;  %v12955_v24 = vadd.f32 %v3290_v11, %v2939_v3  ;;  %v12958_v10 = vadd.f32 %v10258_v20, %v12698_v56  ;;  %10697 = vmatpush3.msra.mxu0 %v12747_v4  ;;  %v8996_v56 = vld [vmem:[%s12053_s15 + $0x60] sm:$0xff] }
 0x1d5   : > { %10753 = vmatpush3.msra.mxu1 %v12752_v62  ;;  %v3530_v30 = vpop.f32.mrf.mxu0  ;;  %10595 = vmatprep.mubr.msk.f32.mxu0 %vm3794_vm2, %v12942_v26  ;;  %v8999_v11 = vld [vmem:[%s12053_s15 + $0x80] sm:$0xff] }
 0x1d6   : > { %14707 = vst [vmem:[#allocation13_spill] sm:$0xff] %v12958_v10  ;;  %v12966_v23 = vpop.f32.mrf.mxu1  ;;  %10651 = vmatprep.mubr.msk.f32.mxu1 %vm3794_vm2, %v8994_v22  ;;  %v12976_v4 = vadd.f32 %v3530_v30, %v12710_v43  ;;  %10698 = vmatprep.subr.mxu0 %v9094_v25  ;;  %v9161_v43 = vld [vmem:[%s14558_s3 + $0x108] sm:$0xff]  ;;  %v13032_v20 = vld [vmem:[%s12053_s15 + $0x7a] sm:$0xff] }
 0x1d7   : > { %10754 = vmatprep.subr.mxu1 %v9162_v34  ;;  %v10261_v62 = vpop.f32.mrf.mxu0  ;;  %10596 = vmatmul.mubr.msk.f32.gmra.mxu0 %vm3794_vm2, %v12963_v41 }
 0x1d8   : > { %14708 = vst [vmem:[#allocation14_spill] sm:$0xff] %v12976_v4  ;;  %v12978_v38 = vpop.f32.mrf.mxu1  ;;  %10652 = vmatmul.mubr.msk.f32.gmra.mxu1 %vm3794_vm2, %v8995_v0  ;;  %v12990_v53 = vadd.f32 %v10261_v62, %v12718_v21  ;;  %10598 = vmatprep.mubr.msk.f32.mxu0 %vm3794_vm2, %v12972_v27  ;;  %v13200_v4 = vld [vmem:[%s12053_s15 + $0x122] sm:$0xff] }
 0x1d9   : > { %10654 = vmatprep.mubr.msk.f32.mxu1 %vm3794_vm2, %v8996_v56  ;;  %v3540_v60 = vpop.f32.mrf.mxu0  ;;  %10699 = vmatpush3.msra.mxu0 %v9094_v25  ;;  %v9000_v25 = vld [vmem:[%s12053_s15 + $0x90] sm:$0xff]  ;;  %v9001_v56 = vld [vmem:[%s12053_s15 + $0x98] sm:$0xff] }
 0x1da   : > { %14709 = vst [vmem:[#allocation15_spill] sm:$0xff] %v12990_v53  ;;  %v12999_v9 = vpop.f32.mrf.mxu1  ;;  %10755 = vmatpush3.msra.mxu1 %v9162_v34  ;;  %v13006_v21 = vadd.f32 %v3540_v60, %v12730_v17  ;;  %10700 = vmatprep.subr.mxu0 %v9093_v31  ;;  %v9160_v17 = vld [vmem:[%s14558_s3 + $0x100] sm:$0xff] }
 0x1db   : > { %10756 = vmatprep.subr.mxu1 %v9161_v43  ;;  %v10264_v46 = vpop.f32.mrf.mxu0  ;;  %10599 = vmatmul.mubr.msk.f32.gmra.mxu0 %vm3794_vm2, %v12996_v14 }
 0x1dc   : > { %14710 = vst [vmem:[#allocation16_spill] sm:$0xff] %v13006_v21  ;;  %v13008_v57 = vpop.f32.mrf.mxu1  ;;  %10655 = vmatmul.mubr.msk.f32.gmra.mxu1 %vm3794_vm2, %v8997_v15  ;;  %v13020_v45 = vadd.f32 %v10264_v46, %v12738_v13  ;;  %10601 = vmatprep.mubr.msk.f32.mxu0 %vm3794_vm2, %v13002_v51  ;;  %v9002_v15 = vld [vmem:[%s12053_s15 + $0xa8] sm:$0xff] }
 0x1dd   : > { %10657 = vmatprep.mubr.msk.f32.mxu1 %vm3794_vm2, %v8998_v32  ;;  %v3550_v3 = vpop.f32.mrf.mxu0  ;;  %10701 = vmatpush3.msra.mxu0 %v9093_v31  ;;  %v13176_v21 = vld [vmem:[%s12053_s15 + $0x10a] sm:$0xff] }
 0x1de   : > { %14711 = vst [vmem:[#allocation17_spill] sm:$0xff] %v13020_v45  ;;  %v13029_v22 = vpop.f32.mrf.mxu1  ;;  %10757 = vmatpush3.msra.mxu1 %v9161_v43  ;;  %v13036_v13 = vadd.f32 %v3550_v3, %v12754_v52  ;;  %10702 = vmatprep.subr.mxu0 %v9092_v61  ;;  %v13050_v52 = vld [vmem:[%s12053_s15 + $0x82] sm:$0xff]  ;;  %v13056_v43 = vld [vmem:[%s12053_s15 + $0x92] sm:$0xff]  ;;  %v13080_v3 = vld [vmem:[%s12053_s15 + $0xaa] sm:$0xff] }
 0x1df   : > { %10758 = vmatprep.subr.mxu1 %v9160_v17  ;;  %v10267_v34 = vpop.f32.mrf.mxu0  ;;  %10602 = vmatmul.mubr.msk.f32.gmra.mxu0 %vm3794_vm2, %v13026_v2 }
 0x1e0   : > { %14712 = vst [vmem:[#allocation18_spill] sm:$0xff] %v13036_v13  ;;  %v13038_v0 = vpop.f32.mrf.mxu1  ;;  %10658 = vmatmul.mubr.msk.f32.gmra.mxu1 %vm3794_vm2, %v8999_v11  ;;  %v13044_v30 = vadd.f32 %v10267_v34, %v12762_v19  ;;  %10604 = vmatprep.mubr.msk.f32.mxu0 %vm3794_vm2, %v13032_v20  ;;  %v13152_v13 = vld [vmem:[%s12053_s15 + $0xf2] sm:$0xff] }
 0x1e1   : > { %10660 = vmatprep.mubr.msk.f32.mxu1 %vm3794_vm2, %v9000_v25  ;;  %v3560_v62 = vpop.f32.mrf.mxu0  ;;  %10703 = vmatpush3.msra.mxu0 %v9092_v61  ;;  %v9003_v61 = vld [vmem:[%s12053_s15 + $0xb0] sm:$0xff]  ;;  %v9004_v25 = vld [vmem:[%s12053_s15 + $0xc0] sm:$0xff] }
 0x1e2   : > { %14713 = vst [vmem:[#allocation19_spill] sm:$0xff] %v13044_v30  ;;  %v13053_v31 = vpop.f32.mrf.mxu1  ;;  %10759 = vmatpush3.msra.mxu1 %v9160_v17  ;;  %v13060_v19 = vadd.f32 %v3560_v62, %v12770_v40  ;;  %v13074_v40 = vld [vmem:[%s12053_s15 + $0x9a] sm:$0xff] }
 0x1e3   : > { %v10270_v60 = vpop.f32.mrf.mxu0  ;;  %10605 = vmatmul.mubr.msk.f32.gmra.mxu0 %vm3794_vm2, %v13050_v52 }
 0x1e4   : > { %14714 = vst [vmem:[#allocation20_spill] sm:$0xff] %v13060_v19  ;;  %v13062_v32 = vpop.f32.mrf.mxu1  ;;  %10661 = vmatmul.mubr.msk.f32.gmra.mxu1 %vm3794_vm2, %v9001_v56  ;;  %v13068_v46 = vadd.f32 %v10270_v60, %v12778_v33  ;;  %10607 = vmatprep.mubr.msk.f32.mxu0 %vm3794_vm2, %v13056_v43  ;;  %v13128_v19 = vld [vmem:[%s12053_s15 + $0xda] sm:$0xff] }
 0x1e5   : > { %10663 = vmatprep.mubr.msk.f32.mxu1 %vm3794_vm2, %v9002_v15  ;;  %v3570_v17 = vpop.f32.mrf.mxu0  ;;  %v9005_v15 = vld [vmem:[%s12053_s15 + $0xc8] sm:$0xff] }
 0x1e6   : > { %14715 = vst [vmem:[#allocation21_spill] sm:$0xff] %v13068_v46  ;;  %v13077_v11 = vpop.f32.mrf.mxu1  ;;  %v13084_v33 = vadd.f32 %v3570_v17, %v12784_v29  ;;  %v13098_v29 = vld [vmem:[%s12053_s15 + $0xb2] sm:$0xff] }
 0x1e7   : > { %v10273_v34 = vpop.f32.mrf.mxu0  ;;  %10608 = vmatmul.mubr.msk.f32.gmra.mxu0 %vm3794_vm2, %v13074_v40 }
 0x1e8   : > { %14716 = vst [vmem:[#allocation22_spill] sm:$0xff] %v13084_v33  ;;  %v13086_v56 = vpop.f32.mrf.mxu1  ;;  %10664 = vmatmul.mubr.msk.f32.gmra.mxu1 %vm3794_vm2, %v9003_v61  ;;  %v13092_v62 = vadd.f32 %v10273_v34, %v12792_v49  ;;  %10610 = vmatprep.mubr.msk.f32.mxu0 %vm3794_vm2, %v13080_v3  ;;  %v13104_v33 = vld [vmem:[%s12053_s15 + $0xc2] sm:$0xff]  ;;  %v9006_v61 = vld [vmem:[%s12053_s15 + $0xd8] sm:$0xff] }
 0x1e9   : > { %10666 = vmatprep.mubr.msk.f32.mxu1 %vm3794_vm2, %v9004_v25  ;;  %v3580_v60 = vpop.f32.mrf.mxu0 }
 0x1ea   : > { %14717 = vst [vmem:[#allocation23_spill] sm:$0xff] %v13092_v62  ;;  %v13101_v17 = vpop.f32.mrf.mxu1  ;;  %v13108_v49 = vadd.f32 %v3580_v60, %v12798_v63  ;;  %v13122_v63 = vld [vmem:[%s12053_s15 + $0xca] sm:$0xff]  ;;  %v9007_v60 = vld [vmem:[%s12053_s15 + $0xe0] sm:$0xff] }
 0x1eb   : > { %v10276_v34 = vpop.f32.mrf.mxu0  ;;  %10611 = vmatmul.mubr.msk.f32.gmra.mxu0 %vm3794_vm2, %v13098_v29 }
 0x1ec   : > { %14718 = vst [vmem:[#allocation24_spill] sm:$0xff] %v13108_v49  ;;  %v13110_v62 = vpop.f32.mrf.mxu1  ;;  %10667 = vmatmul.mubr.msk.f32.gmra.mxu1 %vm3794_vm2, %v9005_v15  ;;  %v13116_v25 = vadd.f32 %v10276_v34, %v12806_v16  ;;  %10613 = vmatprep.mubr.msk.f32.mxu0 %vm3794_vm2, %v13104_v33  ;;  %v9008_v15 = vld [vmem:[%s12053_s15 + $0xf0] sm:$0xff] }
 0x1ed   : > { %10669 = vmatprep.mubr.msk.f32.mxu1 %vm3794_vm2, %v9006_v61  ;;  %v3590_v49 = vpop.f32.mrf.mxu0 }
 0x1ee   : > { %14719 = vst [vmem:[#allocation25_spill] sm:$0xff] %v13116_v25  ;;  %v13125_v46 = vpop.f32.mrf.mxu1  ;;  %v13132_v16 = vadd.f32 %v3590_v49, %v12812_v48  ;;  %v13146_v48 = vld [vmem:[%s12053_s15 + $0xe2] sm:$0xff]  ;;  %v9009_v49 = vld [vmem:[%s12053_s15 + $0xf8] sm:$0xff] }
 0x1ef   : > { %v10279_v34 = vpop.f32.mrf.mxu0  ;;  %10614 = vmatmul.mubr.msk.f32.gmra.mxu0 %vm3794_vm2, %v13122_v63 }
 0x1f0   : > { %14720 = vst [vmem:[#allocation26_spill] sm:$0xff] %v13132_v16  ;;  %v13134_v25 = vpop.f32.mrf.mxu1  ;;  %10670 = vmatmul.mubr.msk.f32.gmra.mxu1 %vm3794_vm2, %v9007_v60  ;;  %v13140_v61 = vadd.f32 %v10279_v34, %v12820_v6  ;;  %10616 = vmatprep.mubr.msk.f32.mxu0 %vm3794_vm2, %v13128_v19  ;;  %v9010_v60 = vld [vmem:[%s12053_s15 + $0x108] sm:$0xff] }
 0x1f1   : > { %10672 = vmatprep.mubr.msk.f32.mxu1 %vm3794_vm2, %v9008_v15  ;;  %v3600_v16 = vpop.f32.mrf.mxu0 }
 0x1f2   : > { %14721 = vst [vmem:[#allocation28_spill] sm:$0xff] %v13140_v61  ;;  %v13149_v30 = vpop.f32.mrf.mxu1  ;;  %v13156_v6 = vadd.f32 %v3600_v16, %v12826_v7  ;;  %v13170_v7 = vld [vmem:[%s12053_s15 + $0xfa] sm:$0xff]  ;;  %v9011_v16 = vld [vmem:[%s12053_s15 + $0x110] sm:$0xff] }
 0x1f3   : > { %v10282_v34 = vpop.f32.mrf.mxu0  ;;  %10617 = vmatmul.mubr.msk.f32.gmra.mxu0 %vm3794_vm2, %v13146_v48 }
 0x1f4   : > { %14722 = vst [vmem:[#allocation30_spill] sm:$0xff] %v13156_v6  ;;  %v13158_v61 = vpop.f32.mrf.mxu1  ;;  %10673 = vmatmul.mubr.msk.f32.gmra.mxu1 %vm3794_vm2, %v9009_v49  ;;  %v13164_v15 = vadd.f32 %v10282_v34, %v12834_v42  ;;  %10619 = vmatprep.mubr.msk.f32.mxu0 %vm3794_vm2, %v13152_v13  ;;  %v9012_v49 = vld [vmem:[%s12053_s15 + $0x120] sm:$0xff] }
 0x1f5   : > { %10675 = vmatprep.mubr.msk.f32.mxu1 %vm3794_vm2, %v9010_v60  ;;  %v3610_v6 = vpop.f32.mrf.mxu0 }
 0x1f6   : > { %14723 = vst [vmem:[#allocation31_spill] sm:$0xff] %v13164_v15  ;;  %v13173_v45 = vpop.f32.mrf.mxu1  ;;  %v13180_v42 = vadd.f32 %v3610_v6, %v12840_v8  ;;  %v13194_v8 = vld [vmem:[%s12053_s15 + $0x112] sm:$0xff]  ;;  %v9013_v6 = vld [vmem:[%s12053_s15 + $0x128] sm:$0xff] }
 0x1f7   : > { %v10285_v34 = vpop.f32.mrf.mxu0  ;;  %10620 = vmatmul.mubr.msk.f32.gmra.mxu0 %vm3794_vm2, %v13170_v7 }
 0x1f8   : > { %14724 = vst [vmem:[#allocation27_spill] sm:$0xff] %v13180_v42  ;;  %v13182_v15 = vpop.f32.mrf.mxu1  ;;  %10676 = vmatmul.mubr.msk.f32.gmra.mxu1 %vm3794_vm2, %v9011_v16  ;;  %v13188_v60 = vadd.f32 %v10285_v34, %v12848_v50  ;;  %10622 = vmatprep.mubr.msk.f32.mxu0 %vm3794_vm2, %v13176_v21  ;;  %v9014_v16 = vld [vmem:[%s12053_s15 + $0x138] sm:$0xff] }
 0x1f9   : > { %10678 = vmatprep.mubr.msk.f32.mxu1 %vm3794_vm2, %v9012_v49  ;;  %v3620_v42 = vpop.f32.mrf.mxu0 }
 0x1fa   : > { %14725 = vst [vmem:[#allocation29_spill] sm:$0xff] %v13188_v60  ;;  %v13197_v53 = vpop.f32.mrf.mxu1  ;;  %v13204_v50 = vadd.f32 %v3620_v42, %v12854_v28  ;;  %v13218_v28 = vld [vmem:[%s12053_s15 + $0x12a] sm:$0xff]  ;;  %v9015_v42 = vld [vmem:[%s12053_s15 + $0x140] sm:$0xff] }
 0x1fb   : > { %v10288_v34 = vpop.f32.mrf.mxu0  ;;  %10623 = vmatmul.mubr.msk.f32.gmra.mxu0 %vm3794_vm2, %v13194_v8 }
 0x1fc   : > { %14726 = vst [vmem:[#allocation2_spill] sm:$0xff] %v13204_v50  ;;  %v13206_v60 = vpop.f32.mrf.mxu1  ;;  %10679 = vmatmul.mubr.msk.f32.gmra.mxu1 %vm3794_vm2, %v9013_v6  ;;  %v13212_v49 = vadd.f32 %v10288_v34, %v12862_v36  ;;  %10625 = vmatprep.mubr.msk.f32.mxu0 %vm3794_vm2, %v13200_v4  ;;  %v9016_v6 = vld [vmem:[%s12053_s15 + $0x150] sm:$0xff] }
 0x1fd   : > { %14727 = vst [vmem:[#allocation3_spill] sm:$0xff] %v13206_v60  ;;  %10681 = vmatprep.mubr.msk.f32.mxu1 %vm3794_vm2, %v9014_v16  ;;  %v3630_v50 = vpop.f32.mrf.mxu0  ;;  %v13224_v60 = vld [vmem:[%s12053_s15 + $0x13a] sm:$0xff] }
 0x1fe   : > { %14728 = vst [vmem:[#allocation4_spill] sm:$0xff] %v13212_v49  ;;  %v13221_v10 = vpop.f32.mrf.mxu1  ;;  %v13228_v36 = vadd.f32 %v3630_v50, %v12868_v18  ;;  %v13242_v18 = vld [vmem:[%s12053_s15 + $0x142] sm:$0xff]  ;;  %v9017_v50 = vld [vmem:[%s12053_s15 + $0x158] sm:$0xff] }
 0x1ff   : > { %14729 = vst [vmem:[#allocation5_spill] sm:$0xff] %v13221_v10  ;;  %v10291_v34 = vpop.f32.mrf.mxu0  ;;  %10626 = vmatmul.mubr.msk.f32.gmra.mxu0 %vm3794_vm2, %v13218_v28  ;;  %v13248_v10 = vld [vmem:[%s12053_s15 + $0x152] sm:$0xff] }
 0x200   : > { %14730 = vst [vmem:[#allocation6_spill] sm:$0xff] %v13228_v36  ;;  %v13230_v49 = vpop.f32.mrf.mxu1  ;;  %10682 = vmatmul.mubr.msk.f32.gmra.mxu1 %vm3794_vm2, %v9015_v42  ;;  %v13236_v16 = vadd.f32 %v10291_v34, %v12876_v1  ;;  %10628 = vmatprep.mubr.msk.f32.mxu0 %vm3794_vm2, %v13224_v60  ;;  %v9018_v42 = vld [vmem:[%s12053_s15 + $0x168] sm:$0xff] }
 0x201   : > { %14731 = vst [vmem:[#allocation7_spill] sm:$0xff] %v13230_v49  ;;  %10684 = vmatprep.mubr.msk.f32.mxu1 %vm3794_vm2, %v9016_v6  ;;  %v3640_v36 = vpop.f32.mrf.mxu0 }
 0x202   : > { %14732 = vst [vmem:[#allocation8_spill] sm:$0xff] %v13236_v16  ;;  %v13245_v49 = vpop.f32.mrf.mxu1  ;;  %v13252_v1 = vadd.f32 %v3640_v36, %v12882_v55  ;;  %v9019_v55 = vld [vmem:[%s12053_s15 + $0x170] sm:$0xff] }
 0x203   : > { %14733 = vst [vmem:[#allocation9_spill] sm:$0xff] %v13245_v49  ;;  %v10294_v34 = vpop.f32.mrf.mxu0  ;;  %10629 = vmatmul.mubr.msk.f32.gmra.mxu0 %vm3794_vm2, %v13242_v18  ;;  %v13266_v49 = vld [vmem:[%s12053_s15 + $0x15a] sm:$0xff] }
 0x204   : > { %14734 = vst [vmem:[#allocation10_spill] sm:$0xff] %v13252_v1  ;;  %v13254_v16 = vpop.f32.mrf.mxu1  ;;  %10685 = vmatmul.mubr.msk.f32.gmra.mxu1 %vm3794_vm2, %v9017_v50  ;;  %v13260_v6 = vadd.f32 %v10294_v34, %v12890_v47  ;;  %10631 = vmatprep.mubr.msk.f32.mxu0 %vm3794_vm2, %v13248_v10 }
 0x205   : > { %14735 = vst [vmem:[#allocation11_spill] sm:$0xff] %v13254_v16  ;;  %10687 = vmatprep.mubr.msk.f32.mxu1 %vm3794_vm2, %v9018_v42  ;;  %v3650_v36 = vpop.f32.mrf.mxu0  ;;  %v13272_v16 = vld [vmem:[%s12053_s15 + $0x16a] sm:$0xff] }
 0x206   : > { %14736 = vst [vmem:[#allocation12_spill] sm:$0xff] %v13260_v6  ;;  %v13269_v1 = vpop.f32.mrf.mxu1  ;;  %v13275_v50 = vadd.f32 %v3650_v36, %v12896_v58  ;;  %v13290_v58 = vld [vmem:[%s12053_s15 + $0x172] sm:$0xff]  ;;  %v13295_v6 = vld [vmem:[%s12053_s15 + $0x182] sm:$0xff] }
 0x207   : > { %v10297_v47 = vpop.f32.mrf.mxu0  ;;  %10632 = vmatmul.mubr.msk.f32.gmra.mxu0 %vm3794_vm2, %v13266_v49 }
 0x208   : > { %14737 = vst [vmem:[#allocation32_spill] sm:$0xff] %v13275_v50  ;;  %v13277_v34 = vpop.f32.mrf.mxu1  ;;  %10688 = vmatmul.mubr.msk.f32.gmra.mxu1 %vm3794_vm2, %v9019_v55  ;;  %v13283_v42 = vadd.f32 %v10297_v47, %v12907_v12  ;;  %10634 = vmatprep.mubr.msk.f32.mxu0 %vm3794_vm2, %v13272_v16  ;;  %v9022_v55 = vld [vmem:[%s12053_s15 + $0x198] sm:$0xff] }
 0x209   : > { %14738 = vst [vmem:[#allocation33_spill] sm:$0xff] %v13277_v34  ;;  %10690 = vmatprep.mubr.msk.f32.mxu1 %vm3794_vm2, %v12904_v39  ;;  %v3660_v36 = vpop.f32.mrf.mxu0 }
 0x20a   : > { %14739 = vst [vmem:[#allocation34_spill] sm:$0xff] %v13283_v42  ;;  %v13292_v50 = vpop.f32.mrf.mxu1  ;;  %v13299_v12 = vadd.f32 %v3660_v36, %v12913_v35  ;;  %v13314_v35 = vld [vmem:[%s12053_s15 + $0x18a] sm:$0xff]  ;;  %v9023_v36 = vld [vmem:[%s12053_s15 + $0x1a0] sm:$0xff] }
 0x20b   : > { %14740 = vst [vmem:[#allocation35_spill] sm:$0xff] %v13292_v50  ;;  %v10300_v47 = vpop.f32.mrf.mxu0  ;;  %10635 = vmatmul.mubr.msk.f32.gmra.mxu0 %vm3794_vm2, %v13290_v58  ;;  %v9060_v50 = vld [vmem:[%s12053_s15 + $0x31] sm:$0xff] }
 0x20c   : > { %14741 = vst [vmem:[#allocation36_spill] sm:$0xff] %v13299_v12  ;;  %v13301_v42 = vpop.f32.mrf.mxu1  ;;  %10691 = vmatmul.mubr.msk.f32.gmra.mxu1 %vm3794_vm2, %v12920_v54  ;;  %v13308_v39 = vadd.f32 %v10300_v47, %v12925_v59  ;;  %10637 = vmatprep.mubr.msk.f32.mxu0 %vm3794_vm2, %v13295_v6  ;;  %v9061_v47 = vld [vmem:[%s12053_s15 + $0x39] sm:$0xff] }
 0x20d   : > { %14742 = vst [vmem:[#allocation37_spill] sm:$0xff] %v13301_v42  ;;  %10693 = vmatprep.mubr.msk.f32.mxu1 %vm3794_vm2, %v9022_v55  ;;  %v3670_v12 = vpop.f32.mrf.mxu0 }
 0x20e   : > { %14743 = vst [vmem:[#allocation38_spill] sm:$0xff] %v13308_v39  ;;  %v13317_v42 = vpop.f32.mrf.mxu1  ;;  %v13321_v34 = vadd.f32 %v3670_v12, %v12931_v37  ;;  %v9196_v37 = vld [vmem:[%s14559_s4] ss:$0 sm:$0xff]  ;;  %v9062_v39 = vld [vmem:[%s12053_s15 + $0x49] sm:$0xff] }
 0x20f   : > { %v10303_v54 = vpop.f32.mrf.mxu0  ;;  %10638 = vmatmul.mubr.msk.f32.gmra.mxu0 %vm3794_vm2, %v13314_v35 }
 0x210   : > { %14744 = vst [vmem:[#allocation39_spill] sm:$0xff] %v13321_v34  ;;  %v13323_v59 = vpop.f32.mrf.mxu1  ;;  %10694 = vmatmul.mubr.msk.f32.gmra.mxu1 %vm3794_vm2, %v9023_v36  ;;  %v3720_v55 = vadd.f32 %v10303_v54, %v12938_v5  ;;  %10704 = vmatprep.mubr.msk.f32.mxu0 %vm3794_vm2, %v9060_v50 }
 0x211   : > { %14745 = vst [vmem:[#allocation40_spill] sm:$0xff] %v13323_v59  ;;  %10760 = vmatprep.mubr.msk.f32.mxu1 %vm3794_vm2, %v12942_v26  ;;  %v3680_v12 = vpop.f32.mrf.mxu0 }
 0x212   : > { %v13336_v34 = vpop.f32.mrf.mxu1  ;;  %v13339_v59 = vadd.f32 %v9196_v37, %v3720_v55  ;;  %v3719_v5 = vadd.f32 %v3680_v12, %v12955_v24  ;;  %v9063_v55 = vld [vmem:[%s12053_s15 + $0x51] sm:$0xff]  ;;  %v9064_v12 = vld [vmem:[%s12053_s15 + $0x61] sm:$0xff] }
 0x213   : > { %14746 = vst [vmem:[#allocation41_spill] sm:$0xff] %v13336_v34  ;;  %v10370_v36 = vpop.f32.mrf.mxu0  ;;  %10705 = vmatmul.mubr.msk.f32.vlgmr.msra.gmra.mxu0 %vm3794_vm2, %v9061_v47 }
 0x214   : > { %14747 = vst [vmem:[#allocation42_spill] sm:$0xff] %v13339_v59  ;;  %v10426_v50 = vpop.f32.mrf.mxu1  ;;  %10761 = vmatmul.mubr.msk.f32.vlgmr.msra.gmra.mxu1 %vm3794_vm2, %v12963_v41  ;;  %v13345_v26 = vadd.f32 %v9196_v37, %v3719_v5  ;;  %v4284_v54 = vadd.f32 %v10370_v36, %v12945_v44  ;;  %10707 = vmatprep.mubr.msk.f32.mxu0 %vm3794_vm2, %v9062_v39  ;;  %v9065_v39 = vld [vmem:[%s12053_s15 + $0x69] sm:$0xff] }
 0x215   : > { %10763 = vmatprep.mubr.msk.f32.mxu1 %vm3794_vm2, %v12972_v27  ;;  %v4278_v59 = vpop.f32.mrf.mxu0 }
 0x216   : > { %14748 = vst [vmem:[#allocation43_spill] sm:$0xff] %v13345_v26  ;;  %v4636_v24 = vpop.f32.mrf.mxu1  ;;  %v13353_v34 = vadd.f32 %v10426_v50, %v4284_v54  ;;  %v4279_v47 = vadd.f32 %v4278_v59, %v12966_v23  ;;  %v9066_v59 = vld [vmem:[%s12053_s15 + $0x79] sm:$0xff] }
 0x217   : > { %v10373_v41 = vpop.f32.mrf.mxu0  ;;  %10708 = vmatmul.mubr.msk.f32.gmra.mxu0 %vm3794_vm2, %v9063_v55 }
 0x218   : > { %v10429_v37 = vpop.f32.mrf.mxu1  ;;  %10764 = vmatmul.mubr.msk.f32.gmra.mxu1 %vm3794_vm2, %v12996_v14  ;;  %v13359_v44 = vadd.f32 %v4636_v24, %v4279_v47  ;;  %v4294_v27 = vadd.f32 %v10373_v41, %v12978_v38  ;;  %10710 = vmatprep.mubr.msk.f32.mxu0 %vm3794_vm2, %v9064_v12  ;;  %v9068_v12 = vld [vmem:[%s12053_s15 + $0x91] sm:$0xff] }
 0x219   : > { %10766 = vmatprep.mubr.msk.f32.mxu1 %vm3794_vm2, %v13002_v51  ;;  %v4288_v5 = vpop.f32.mrf.mxu0  ;;  %v9067_v51 = vld [vmem:[%s12053_s15 + $0x81] sm:$0xff] }
 0x21a   : > { %v4646_v23 = vpop.f32.mrf.mxu1  ;;  %v13367_v36 = vadd.f32 %v10429_v37, %v4294_v27  ;;  %v4289_v50 = vadd.f32 %v4288_v5, %v12999_v9  ;;  %v9070_v5 = vld [vmem:[%s12053_s15 + $0xa9] sm:$0xff] }
 0x21b   : > { %v10376_v14 = vpop.f32.mrf.mxu0  ;;  %10711 = vmatmul.mubr.msk.f32.gmra.mxu0 %vm3794_vm2, %v9065_v39 }
 0x21c   : > { %v10432_v54 = vpop.f32.mrf.mxu1  ;;  %10767 = vmatmul.mubr.msk.f32.gmra.mxu1 %vm3794_vm2, %v13026_v2  ;;  %v13373_v38 = vadd.f32 %v4646_v23, %v4289_v50  ;;  %v4304_v55 = vadd.f32 %v10376_v14, %v13008_v57  ;;  %10713 = vmatprep.mubr.msk.f32.mxu0 %vm3794_vm2, %v9066_v59 }
 0x21d   : > { %10769 = vmatprep.mubr.msk.f32.mxu1 %vm3794_vm2, %v13032_v20  ;;  %v4298_v24 = vpop.f32.mrf.mxu0  ;;  %v9069_v20 = vld [vmem:[%s12053_s15 + $0x99] sm:$0xff] }
 0x21e   : > { %v4656_v9 = vpop.f32.mrf.mxu1  ;;  %v13381_v47 = vadd.f32 %v10432_v54, %v4304_v55  ;;  %v4299_v41 = vadd.f32 %v4298_v24, %v13029_v22  ;;  %v9072_v55 = vld [vmem:[%s12053_s15 + $0xc1] sm:$0xff] }
 0x21f   : > { %v10379_v2 = vpop.f32.mrf.mxu0  ;;  %10714 = vmatmul.mubr.msk.f32.gmra.mxu0 %vm3794_vm2, %v9067_v51 }
 0x220   : > { %v10435_v37 = vpop.f32.mrf.mxu1  ;;  %10770 = vmatmul.mubr.msk.f32.gmra.mxu1 %vm3794_vm2, %v13050_v52  ;;  %v13387_v57 = vadd.f32 %v4656_v9, %v4299_v41  ;;  %v4314_v27 = vadd.f32 %v10379_v2, %v13038_v0  ;;  %10716 = vmatprep.mubr.msk.f32.mxu0 %vm3794_vm2, %v9068_v12  ;;  %v9074_v2 = vld [vmem:[%s12053_s15 + $0xd9] sm:$0xff] }
 0x221   : > { %10772 = vmatprep.mubr.msk.f32.mxu1 %vm3794_vm2, %v13056_v43  ;;  %v4308_v39 = vpop.f32.mrf.mxu0  ;;  %v9071_v43 = vld [vmem:[%s12053_s15 + $0xb1] sm:$0xff] }
 0x222   : > { %v4666_v22 = vpop.f32.mrf.mxu1  ;;  %v13395_v23 = vadd.f32 %v10435_v37, %v4314_v27  ;;  %v4309_v59 = vadd.f32 %v4308_v39, %v13053_v31 }
 0x223   : > { %v10382_v52 = vpop.f32.mrf.mxu0  ;;  %10717 = vmatmul.mubr.msk.f32.gmra.mxu0 %vm3794_vm2, %v9069_v20 }
 0x224   : > { %v10438_v50 = vpop.f32.mrf.mxu1  ;;  %10773 = vmatmul.mubr.msk.f32.gmra.mxu1 %vm3794_vm2, %v13074_v40  ;;  %v13401_v0 = vadd.f32 %v4666_v22, %v4309_v59  ;;  %v4324_v14 = vadd.f32 %v10382_v52, %v13062_v32  ;;  %10719 = vmatprep.mubr.msk.f32.mxu0 %vm3794_vm2, %v9070_v5  ;;  %v9076_v5 = vld [vmem:[%s12053_s15 + $0xf1] sm:$0xff] }
 0x225   : > { %10775 = vmatprep.mubr.msk.f32.mxu1 %vm3794_vm2, %v13080_v3  ;;  %v4318_v54 = vpop.f32.mrf.mxu0  ;;  %v9073_v3 = vld [vmem:[%s12053_s15 + $0xc9] sm:$0xff] }
 0x226   : > { %v4676_v31 = vpop.f32.mrf.mxu1  ;;  %v13409_v51 = vadd.f32 %v10438_v50, %v4324_v14  ;;  %v4319_v24 = vadd.f32 %v4318_v54, %v13077_v11  ;;  %v9078_v54 = vld [vmem:[%s12053_s15 + $0x109] sm:$0xff] }
 0x227   : > { %v10385_v40 = vpop.f32.mrf.mxu0  ;;  %10720 = vmatmul.mubr.msk.f32.gmra.mxu0 %vm3794_vm2, %v9071_v43 }
 0x228   : > { %v10441_v9 = vpop.f32.mrf.mxu1  ;;  %10776 = vmatmul.mubr.msk.f32.gmra.mxu1 %vm3794_vm2, %v13098_v29  ;;  %v13415_v32 = vadd.f32 %v4676_v31, %v4319_v24  ;;  %v4334_v12 = vadd.f32 %v10385_v40, %v13086_v56  ;;  %10722 = vmatprep.mubr.msk.f32.mxu0 %vm3794_vm2, %v9072_v55 }
 0x229   : > { %10778 = vmatprep.mubr.msk.f32.mxu1 %vm3794_vm2, %v13104_v33  ;;  %v4328_v41 = vpop.f32.mrf.mxu0  ;;  %v9075_v33 = vld [vmem:[%s12053_s15 + $0xe1] sm:$0xff] }
 0x22a   : > { %v4686_v11 = vpop.f32.mrf.mxu1  ;;  %v13423_v37 = vadd.f32 %v10441_v9, %v4334_v12  ;;  %v4329_v27 = vadd.f32 %v4328_v41, %v13101_v17  ;;  %v9080_v12 = vld [vmem:[%s12053_s15 + $0x121] sm:$0xff] }
 0x22b   : > { %v10388_v29 = vpop.f32.mrf.mxu0  ;;  %10723 = vmatmul.mubr.msk.f32.gmra.mxu0 %vm3794_vm2, %v9073_v3 }
 0x22c   : > { %v10444_v20 = vpop.f32.mrf.mxu1  ;;  %10779 = vmatmul.mubr.msk.f32.gmra.mxu1 %vm3794_vm2, %v13122_v63  ;;  %v13429_v56 = vadd.f32 %v4686_v11, %v4329_v27  ;;  %v4344_v39 = vadd.f32 %v10388_v29, %v13110_v62  ;;  %10725 = vmatprep.mubr.msk.f32.mxu0 %vm3794_vm2, %v9074_v2  ;;  %v9082_v29 = vld [vmem:[%s12053_s15 + $0x139] sm:$0xff] }
 0x22d   : > { %10781 = vmatprep.mubr.msk.f32.mxu1 %vm3794_vm2, %v13128_v19  ;;  %v4338_v22 = vpop.f32.mrf.mxu0  ;;  %v9077_v19 = vld [vmem:[%s12053_s15 + $0xf9] sm:$0xff] }
 0x22e   : > { %v4696_v17 = vpop.f32.mrf.mxu1  ;;  %v13437_v59 = vadd.f32 %v10444_v20, %v4344_v39  ;;  %v4339_v52 = vadd.f32 %v4338_v22, %v13125_v46  ;;  %v14749_v22 = vld [vmem:[#allocation3_spill] sm:$0xff] }
 0x22f   : > { %v10391_v63 = vpop.f32.mrf.mxu0  ;;  %10726 = vmatmul.mubr.msk.f32.gmra.mxu0 %vm3794_vm2, %v9075_v33 }
 0x230   : > { %v10447_v50 = vpop.f32.mrf.mxu1  ;;  %10782 = vmatmul.mubr.msk.f32.gmra.mxu1 %vm3794_vm2, %v13146_v48  ;;  %v13443_v62 = vadd.f32 %v4696_v17, %v4339_v52  ;;  %v4354_v14 = vadd.f32 %v10391_v63, %v13134_v25  ;;  %10728 = vmatprep.mubr.msk.f32.mxu0 %vm3794_vm2, %v9076_v5  ;;  %v9084_v52 = vld [vmem:[%s12053_s15 + $0x151] sm:$0xff] }
 0x231   : > { %10784 = vmatprep.mubr.msk.f32.mxu1 %vm3794_vm2, %v13152_v13  ;;  %v4348_v43 = vpop.f32.mrf.mxu0  ;;  %v9079_v13 = vld [vmem:[%s12053_s15 + $0x111] sm:$0xff] }
 0x232   : > { %v4706_v46 = vpop.f32.mrf.mxu1  ;;  %v13451_v31 = vadd.f32 %v10447_v50, %v4354_v14  ;;  %v4349_v55 = vadd.f32 %v4348_v43, %v13149_v30  ;;  %v14750_v50 = vld [vmem:[#allocation5_spill] sm:$0xff] }
 0x233   : > { %v10394_v48 = vpop.f32.mrf.mxu0  ;;  %10729 = vmatmul.mubr.msk.f32.gmra.mxu0 %vm3794_vm2, %v9077_v19 }
 0x234   : > { %v10450_v24 = vpop.f32.mrf.mxu1  ;;  %10785 = vmatmul.mubr.msk.f32.gmra.mxu1 %vm3794_vm2, %v13170_v7  ;;  %v13457_v25 = vadd.f32 %v4706_v46, %v4349_v55  ;;  %v4364_v40 = vadd.f32 %v10394_v48, %v13158_v61  ;;  %10731 = vmatprep.mubr.msk.f32.mxu0 %vm3794_vm2, %v9078_v54  ;;  %v14751_v46 = vld [vmem:[#allocation7_spill] sm:$0xff] }
 0x235   : > { %10787 = vmatprep.mubr.msk.f32.mxu1 %vm3794_vm2, %v13176_v21  ;;  %v4358_v9 = vpop.f32.mrf.mxu0  ;;  %v9081_v21 = vld [vmem:[%s12053_s15 + $0x129] sm:$0xff] }
 0x236   : > { %v4716_v30 = vpop.f32.mrf.mxu1  ;;  %v13465_v3 = vadd.f32 %v10450_v24, %v4364_v40  ;;  %v4359_v41 = vadd.f32 %v4358_v9, %v13173_v45  ;;  %v9086_v24 = vld [vmem:[%s12053_s15 + $0x169] sm:$0xff] }
 0x237   : > { %v10397_v7 = vpop.f32.mrf.mxu0  ;;  %10732 = vmatmul.mubr.msk.f32.gmra.mxu0 %vm3794_vm2, %v9079_v13  ;;  %v14752_v13 = vld [vmem:[#allocation9_spill] sm:$0xff] }
 0x238   : > { %v10453_v11 = vpop.f32.mrf.mxu1  ;;  %10788 = vmatmul.mubr.msk.f32.gmra.mxu1 %vm3794_vm2, %v13194_v8  ;;  %v13471_v61 = vadd.f32 %v4716_v30, %v4359_v41  ;;  %v4374_v2 = vadd.f32 %v10397_v7, %v13182_v15  ;;  %10734 = vmatprep.mubr.msk.f32.mxu0 %vm3794_vm2, %v9080_v12  ;;  %v14753_v41 = vld [vmem:[#allocation11_spill] sm:$0xff] }
 0x239   : > { %10790 = vmatprep.mubr.msk.f32.mxu1 %vm3794_vm2, %v13200_v4  ;;  %v4368_v27 = vpop.f32.mrf.mxu0  ;;  %v9083_v4 = vld [vmem:[%s12053_s15 + $0x141] sm:$0xff] }
 0x23a   : > { %v4726_v45 = vpop.f32.mrf.mxu1  ;;  %v13479_v20 = vadd.f32 %v10453_v11, %v4374_v2  ;;  %v4369_v39 = vadd.f32 %v4368_v27, %v13197_v53 }
 0x23b   : > { %v10400_v8 = vpop.f32.mrf.mxu0  ;;  %10735 = vmatmul.mubr.msk.f32.gmra.mxu0 %vm3794_vm2, %v9081_v21  ;;  %v9088_v21 = vld [vmem:[%s12053_s15 + $0x181] sm:$0xff] }
 0x23c   : > { %v10456_v33 = vpop.f32.mrf.mxu1  ;;  %10791 = vmatmul.mubr.msk.f32.gmra.mxu1 %vm3794_vm2, %v13218_v28  ;;  %v13485_v15 = vadd.f32 %v4726_v45, %v4369_v39  ;;  %v4384_v17 = vadd.f32 %v10400_v8, %v14749_v22  ;;  %10737 = vmatprep.mubr.msk.f32.mxu0 %vm3794_vm2, %v9082_v29  ;;  %v14754_v8 = vld [vmem:[#allocation33_spill] sm:$0xff] }
 0x23d   : > { %10793 = vmatprep.mubr.msk.f32.mxu1 %vm3794_vm2, %v13224_v60  ;;  %v4378_v5 = vpop.f32.mrf.mxu0  ;;  %v9085_v60 = vld [vmem:[%s12053_s15 + $0x159] sm:$0xff] }
 0x23e   : > { %v4736_v53 = vpop.f32.mrf.mxu1  ;;  %v13493_v63 = vadd.f32 %v10456_v33, %v4384_v17  ;;  %v4379_v14 = vadd.f32 %v4378_v5, %v14750_v50  ;;  %v9089_v33 = vld [vmem:[%s12053_s15 + $0x189] sm:$0xff]  ;;  %v9090_v17 = vld [vmem:[%s12053_s15 + $0x199] sm:$0xff] }
 0x23f   : > { %v10403_v28 = vpop.f32.mrf.mxu0  ;;  %10738 = vmatmul.mubr.msk.f32.gmra.mxu0 %vm3794_vm2, %v9083_v4  ;;  %v9158_v4 = vld [vmem:[%s12053_s15 + $0x19a] sm:$0xff] }
 0x240   : > { %v10459_v19 = vpop.f32.mrf.mxu1  ;;  %10794 = vmatmul.mubr.msk.f32.gmra.mxu1 %vm3794_vm2, %v13242_v18  ;;  %v13499_v43 = vadd.f32 %v4736_v53, %v4379_v14  ;;  %v4394_v54 = vadd.f32 %v10403_v28, %v14751_v46  ;;  %10740 = vmatprep.mubr.msk.f32.mxu0 %vm3794_vm2, %v9084_v52  ;;  %v14755_v53 = vld [vmem:[#allocation35_spill] sm:$0xff]  ;;  %v14756_v28 = vld [vmem:[#allocation37_spill] sm:$0xff] }
 0x241   : > { %10796 = vmatprep.mubr.msk.f32.mxu1 %vm3794_vm2, %v13248_v10  ;;  %v4388_v55 = vpop.f32.mrf.mxu0  ;;  %v9087_v10 = vld [vmem:[%s12053_s15 + $0x171] sm:$0xff]  ;;  %v9159_v46 = vld [vmem:[%s12053_s15 + $0x1a2] sm:$0xff] }
 0x242   : > { %v4746_v48 = vpop.f32.mrf.mxu1  ;;  %v13507_v40 = vadd.f32 %v10459_v19, %v4394_v54  ;;  %v4389_v9 = vadd.f32 %v4388_v55, %v14752_v13  ;;  %v9091_v19 = vld [vmem:[%s12053_s15 + $0x1a1] sm:$0xff] }
 0x243   : > { %v10406_v18 = vpop.f32.mrf.mxu0  ;;  %10741 = vmatmul.mubr.msk.f32.gmra.mxu0 %vm3794_vm2, %v9085_v60 }
 0x244   : > { %v10462_v30 = vpop.f32.mrf.mxu1  ;;  %10797 = vmatmul.mubr.msk.f32.gmra.mxu1 %vm3794_vm2, %v13266_v49  ;;  %v13513_v12 = vadd.f32 %v4746_v48, %v4389_v9  ;;  %v4404_v7 = vadd.f32 %v10406_v18, %v14753_v41  ;;  %10743 = vmatprep.mubr.msk.f32.mxu0 %vm3794_vm2, %v9086_v24  ;;  %v14757_v9 = vld [vmem:[#allocation40_spill] sm:$0xff] }
 0x245   : > { %10799 = vmatprep.mubr.msk.f32.mxu1 %vm3794_vm2, %v13272_v16  ;;  %v4398_v11 = vpop.f32.mrf.mxu0 }
 0x246   : > { %v4756_v2 = vpop.f32.mrf.mxu1  ;;  %v13521_v27 = vadd.f32 %v10462_v30, %v4404_v7  ;;  %v4399_v49 = vadd.f32 %v4398_v11, %v13269_v1 }
 0x247   : > { %v10409_v45 = vpop.f32.mrf.mxu0  ;;  %10744 = vmatmul.mubr.msk.f32.gmra.mxu0 %vm3794_vm2, %v9087_v10  ;;  %v14758_v10 = vld [vmem:[#allocation41_spill] sm:$0xff] }
 0x248   : > { %v10465_v29 = vpop.f32.mrf.mxu1  ;;  %10800 = vmatmul.mubr.msk.f32.gmra.mxu1 %vm3794_vm2, %v13290_v58  ;;  %v13527_v39 = vadd.f32 %v4756_v2, %v4399_v49  ;;  %v4414_v16 = vadd.f32 %v10409_v45, %v14754_v8  ;;  %10746 = vmatprep.mubr.msk.f32.mxu0 %vm3794_vm2, %v9088_v21 }
 0x249   : > { %10802 = vmatprep.mubr.msk.f32.mxu1 %vm3794_vm2, %v13295_v6  ;;  %v4408_v1 = vpop.f32.mrf.mxu0 }
 0x24a   : > { %v4766_v22 = vpop.f32.mrf.mxu1  ;;  %v13536_v5 = vadd.f32 %v10465_v29, %v4414_v16  ;;  %v4409_v58 = vadd.f32 %v4408_v1, %v14755_v53 }
 0x24b   : > { %v10412_v52 = vpop.f32.mrf.mxu0  ;;  %10747 = vmatmul.mubr.msk.f32.gmra.mxu0 %vm3794_vm2, %v9089_v33 }
 0x24c   : > { %v10468_v50 = vpop.f32.mrf.mxu1  ;;  %10803 = vmatmul.mubr.msk.f32.gmra.mxu1 %vm3794_vm2, %v13314_v35  ;;  %v13542_v14 = vadd.f32 %v4766_v22, %v4409_v58  ;;  %v4424_v6 = vadd.f32 %v10412_v52, %v14756_v28  ;;  %10749 = vmatprep.mubr.msk.f32.mxu0 %vm3794_vm2, %v9090_v17 }
 0x24d   : > { %10805 = vmatprep.mubr.msk.f32.mxu1 %vm3794_vm2, %v9158_v4  ;;  %v4418_v54 = vpop.f32.mrf.mxu0 }
 0x24e   : > { %v4776_v60 = vpop.f32.mrf.mxu1  ;;  %v13549_v55 = vadd.f32 %v10468_v50, %v4424_v6  ;;  %v4419_v48 = vadd.f32 %v4418_v54, %v13317_v42 }
 0x24f   : > { %v10415_v24 = vpop.f32.mrf.mxu0  ;;  %10750 = vmatmul.mubr.msk.f32.gmra.mxu0 %vm3794_vm2, %v9091_v19 }
 0x250   : > { %v10471_v13 = vpop.f32.mrf.mxu1  ;;  %10806 = vmatmul.mubr.msk.f32.gmra.mxu1 %vm3794_vm2, %v9159_v46  ;;  %v13554_v35 = vadd.f32 %v4776_v60, %v4419_v48  ;;  %v4434_v18 = vadd.f32 %v10415_v24, %v14757_v9 }
 0x251   : > { %v4428_v30 = vpop.f32.mrf.mxu0 }
 0x252   : > { %v4786_v41 = vpop.f32.mrf.mxu1  ;;  %v13557_v7 = vadd.f32 %v10471_v13, %v4434_v18  ;;  %v4429_v11 = vadd.f32 %v4428_v30, %v14758_v10 }
 0x253   : > { %v10482_v2 = vpop.f32.mrf.mxu0 }
 0x254   : > { %v10538_v21 = vpop.f32.mrf.mxu1  ;;  %v13560_v49 = vadd.f32 %v4786_v41, %v4429_v11  ;;  %v5187_v42 = vadd.f32 %v10482_v2, %v13353_v34 }
 0x255   : > { %v5027_v45 = vpop.f32.mrf.mxu0 }
 0x256   : > { %v5417_v29 = vpop.f32.mrf.mxu1  ;;  %v13563_v8 = vadd.f32 %v10538_v21, %v5187_v42  ;;  %v5186_v16 = vadd.f32 %v5027_v45, %v13359_v44 }
 0x257   : > { %v10485_v33 = vpop.f32.mrf.mxu0 }
 0x258   : > { %v10541_v1 = vpop.f32.mrf.mxu1  ;;  %v13566_v22 = vadd.f32 %v5417_v29, %v5186_v16  ;;  %v5189_v17 = vadd.f32 %v10485_v33, %v13367_v36 }
 0x259   : > { %v5037_v4 = vpop.f32.mrf.mxu0 }
 0x25a   : > { %v5427_v53 = vpop.f32.mrf.mxu1  ;;  %v13569_v58 = vadd.f32 %v10541_v1, %v5189_v17  ;;  %v5188_v52 = vadd.f32 %v5037_v4, %v13373_v38 }
 0x25b   : > { %v10488_v50 = vpop.f32.mrf.mxu0 }
 0x25c   : > { %v10544_v34 = vpop.f32.mrf.mxu1  ;;  %v13572_v28 = vadd.f32 %v5427_v53, %v5188_v52  ;;  %v5191_v6 = vadd.f32 %v10488_v50, %v13381_v47 }
 0x25d   : > { %v5047_v19 = vpop.f32.mrf.mxu0 }
 0x25e   : > { %v5437_v44 = vpop.f32.mrf.mxu1  ;;  %v13575_v46 = vadd.f32 %v10544_v34, %v5191_v6  ;;  %v5190_v54 = vadd.f32 %v5047_v19, %v13387_v57 }
 0x25f   : > { %v10491_v60 = vpop.f32.mrf.mxu0 }
 0x260   : > { %v10547_v36 = vpop.f32.mrf.mxu1  ;;  %v13578_v48 = vadd.f32 %v5437_v44, %v5190_v54  ;;  %v5193_v24 = vadd.f32 %v10491_v60, %v13395_v23 }
 0x261   : > { %v5057_v13 = vpop.f32.mrf.mxu0 }
 0x262   : > { %v5447_v38 = vpop.f32.mrf.mxu1  ;;  %v13581_v9 = vadd.f32 %v10547_v36, %v5193_v24  ;;  %v5192_v18 = vadd.f32 %v5057_v13, %v13401_v0 }
 0x263   : > { %v10494_v30 = vpop.f32.mrf.mxu0 }
 0x264   : > { %v10550_v47 = vpop.f32.mrf.mxu1  ;;  %v13584_v41 = vadd.f32 %v5447_v38, %v5192_v18  ;;  %v5195_v10 = vadd.f32 %v10494_v30, %v13409_v51 }
 0x265   : > { %v5067_v11 = vpop.f32.mrf.mxu0 }
 0x266   : > { %v5457_v57 = vpop.f32.mrf.mxu1  ;;  %v13587_v2 = vadd.f32 %v10550_v47, %v5195_v10  ;;  %v5194_v21 = vadd.f32 %v5067_v11, %v13415_v32 }
 0x267   : > { %v10497_v42 = vpop.f32.mrf.mxu0 }
 0x268   : > { %v10553_v23 = vpop.f32.mrf.mxu1  ;;  %v13590_v45 = vadd.f32 %v5457_v57, %v5194_v21  ;;  %v5197_v29 = vadd.f32 %v10497_v42, %v13423_v37 }
 0x269   : > { %v5077_v16 = vpop.f32.mrf.mxu0 }
 0x26a   : > { %v5467_v0 = vpop.f32.mrf.mxu1  ;;  %v13593_v33 = vadd.f32 %v10553_v23, %v5197_v29  ;;  %v5196_v1 = vadd.f32 %v5077_v16, %v13429_v56 }
 0x26b   : > { %v10500_v17 = vpop.f32.mrf.mxu0 }
 0x26c   : > { %v10556_v51 = vpop.f32.mrf.mxu1  ;;  %v13596_v4 = vadd.f32 %v5467_v0, %v5196_v1  ;;  %v5199_v53 = vadd.f32 %v10500_v17, %v13437_v59 }
 0x26d   : > { %v5087_v52 = vpop.f32.mrf.mxu0 }
 0x26e   : > { %v5477_v32 = vpop.f32.mrf.mxu1  ;;  %v13599_v50 = vadd.f32 %v10556_v51, %v5199_v53  ;;  %v5198_v34 = vadd.f32 %v5087_v52, %v13443_v62 }
 0x26f   : > { %v10503_v6 = vpop.f32.mrf.mxu0 }
 0x270   : > { %v10559_v37 = vpop.f32.mrf.mxu1  ;;  %v13602_v19 = vadd.f32 %v5477_v32, %v5198_v34  ;;  %v5201_v44 = vadd.f32 %v10503_v6, %v13451_v31 }
 0x271   : > { %v5097_v54 = vpop.f32.mrf.mxu0 }
 0x272   : > { %v5487_v56 = vpop.f32.mrf.mxu1  ;;  %v13605_v60 = vadd.f32 %v10559_v37, %v5201_v44  ;;  %v5200_v36 = vadd.f32 %v5097_v54, %v13457_v25 }
 0x273   : > { %v10506_v24 = vpop.f32.mrf.mxu0 }
 0x274   : > { %v10562_v59 = vpop.f32.mrf.mxu1  ;;  %v13608_v13 = vadd.f32 %v5487_v56, %v5200_v36  ;;  %v5203_v38 = vadd.f32 %v10506_v24, %v13465_v3 }
 0x275   : > { %v5107_v18 = vpop.f32.mrf.mxu0 }
 0x276   : > { %v5497_v62 = vpop.f32.mrf.mxu1  ;;  %v13611_v30 = vadd.f32 %v10562_v59, %v5203_v38  ;;  %v5202_v47 = vadd.f32 %v5107_v18, %v13471_v61 }
 0x277   : > { %v10509_v10 = vpop.f32.mrf.mxu0 }
 0x278   : > { %v10565_v31 = vpop.f32.mrf.mxu1  ;;  %v13614_v11 = vadd.f32 %v5497_v62, %v5202_v47  ;;  %v5205_v57 = vadd.f32 %v10509_v10, %v13479_v20 }
 0x279   : > { %v5117_v21 = vpop.f32.mrf.mxu0 }
 0x27a   : > { %v5507_v25 = vpop.f32.mrf.mxu1  ;;  %v13617_v42 = vadd.f32 %v10565_v31, %v5205_v57  ;;  %v5204_v23 = vadd.f32 %v5117_v21, %v13485_v15 }
 0x27b   : > { %v10512_v29 = vpop.f32.mrf.mxu0 }
 0x27c   : > { %v10568_v3 = vpop.f32.mrf.mxu1  ;;  %v13620_v16 = vadd.f32 %v5507_v25, %v5204_v23  ;;  %v5207_v0 = vadd.f32 %v10512_v29, %v13493_v63 }
 0x27d   : > { %v5127_v1 = vpop.f32.mrf.mxu0 }
 0x27e   : > { %v5517_v61 = vpop.f32.mrf.mxu1  ;;  %v13623_v17 = vadd.f32 %v10568_v3, %v5207_v0  ;;  %v5206_v51 = vadd.f32 %v5127_v1, %v13499_v43 }
 0x27f   : > { %v10515_v53 = vpop.f32.mrf.mxu0 }
 0x280   : > { %v10571_v20 = vpop.f32.mrf.mxu1  ;;  %v13626_v52 = vadd.f32 %v5517_v61, %v5206_v51  ;;  %v5209_v32 = vadd.f32 %v10515_v53, %v13507_v40 }
 0x281   : > { %v5137_v34 = vpop.f32.mrf.mxu0 }
 0x282   : > { %v5527_v15 = vpop.f32.mrf.mxu1  ;;  %v13629_v6 = vadd.f32 %v10571_v20, %v5209_v32  ;;  %v5208_v37 = vadd.f32 %v5137_v34, %v13513_v12 }
 0x283   : > { %v10518_v44 = vpop.f32.mrf.mxu0 }
 0x284   : > { %v10574_v63 = vpop.f32.mrf.mxu1  ;;  %v13632_v54 = vadd.f32 %v5527_v15, %v5208_v37  ;;  %v5211_v56 = vadd.f32 %v10518_v44, %v13521_v27 }
 0x285   : > { %v5147_v36 = vpop.f32.mrf.mxu0 }
 0x286   : > { %14759 = vst [vmem:[#allocation3_spill] sm:$0xff] %v13632_v54  ;;  %v5537_v43 = vpop.f32.mrf.mxu1  ;;  %v13635_v24 = vadd.f32 %v10574_v63, %v5211_v56  ;;  %v5210_v59 = vadd.f32 %v5147_v36, %v13527_v39 }
 0x287   : > { %v10521_v38 = vpop.f32.mrf.mxu0 }
 0x288   : > { %v10577_v40 = vpop.f32.mrf.mxu1  ;;  %v13638_v18 = vadd.f32 %v5537_v43, %v5210_v59  ;;  %v5213_v62 = vadd.f32 %v10521_v38, %v13536_v5 }
 0x289   : > { %v5157_v47 = vpop.f32.mrf.mxu0 }
 0x28a   : > { %14760 = vst [vmem:[#allocation5_spill] sm:$0xff] %v13638_v18  ;;  %v5547_v12 = vpop.f32.mrf.mxu1  ;;  %v13641_v10 = vadd.f32 %v10577_v40, %v5213_v62  ;;  %v5212_v31 = vadd.f32 %v5157_v47, %v13542_v14 }
 0x28b   : > { %v10524_v57 = vpop.f32.mrf.mxu0 }
 0x28c   : > { %v10580_v27 = vpop.f32.mrf.mxu1  ;;  %v13644_v21 = vadd.f32 %v5547_v12, %v5212_v31  ;;  %v5215_v25 = vadd.f32 %v10524_v57, %v13549_v55 }
 0x28d   : > { %v5167_v23 = vpop.f32.mrf.mxu0 }
 0x28e   : > { %14761 = vst [vmem:[#allocation7_spill] sm:$0xff] %v13644_v21  ;;  %v5557_v39 = vpop.f32.mrf.mxu1  ;;  %v13647_v29 = vadd.f32 %v10580_v27, %v5215_v25  ;;  %v5214_v3 = vadd.f32 %v5167_v23, %v13554_v35 }
 0x28f   : > { %v10527_v0 = vpop.f32.mrf.mxu0 }
 0x290   : > { %v10583_v5 = vpop.f32.mrf.mxu1  ;;  %v13650_v1 = vadd.f32 %v5557_v39, %v5214_v3  ;;  %v5217_v61 = vadd.f32 %v10527_v0, %v13557_v7 }
 0x291   : > { %v5177_v51 = vpop.f32.mrf.mxu0 }
 0x292   : > { %14762 = vst [vmem:[#allocation9_spill] sm:$0xff] %v13650_v1  ;;  %v5567_v14 = vpop.f32.mrf.mxu1  ;;  %v13653_v53 = vadd.f32 %v10583_v5, %v5217_v61  ;;  %v5216_v20 = vadd.f32 %v5177_v51, %v13560_v49 }
 0x293   : > { %v13656_v32 = vpop.f32.mrf.mxu0 }
 0x294   : > { %v13658_v55 = vpop.f32.mrf.mxu1  ;;  %v13660_v34 = vadd.f32 %v5567_v14, %v5216_v20 }
 0x295   : > { %v13662_v15 = vpop.f32.mrf.mxu0 }
 0x296   : > { %14763 = vst [vmem:[#allocation11_spill] sm:$0xff] %v13660_v34  ;;  %v13664_v35 = vpop.f32.mrf.mxu1 }
 0x297   : > { %v13666_v37 = vpop.f32.mrf.mxu0 }
 0x298   : > { %v13668_v44 = vpop.f32.mrf.mxu1 }
 0x299   : > { %v13670_v7 = vpop.f32.mrf.mxu0 }
 0x29a   : > { %v13672_v63 = vpop.f32.mrf.mxu1 }
 0x29b   : > { %v10600_v56 = vpop.f32.mrf.mxu0 }
 0x29c   : > { %v10656_v49 = vpop.f32.mrf.mxu1  ;;  %v5971_v36 = vadd.f32 %v10600_v56, %v13575_v46 }
 0x29d   : > { %v13675_v43 = vpop.f32.mrf.mxu0 }
 0x29e   : > { %v13677_v59 = vpop.f32.mrf.mxu1  ;;  %v13679_v38 = vadd.f32 %v10656_v49, %v5971_v36 }
 0x29f   : > { %v10603_v40 = vpop.f32.mrf.mxu0 }
 0x2a0   : > { %v10659_v62 = vpop.f32.mrf.mxu1  ;;  %v5973_v47 = vadd.f32 %v10603_v40, %v13581_v9 }
 0x2a1   : > { %v13682_v12 = vpop.f32.mrf.mxu0 }
 0x2a2   : > { %v13684_v31 = vpop.f32.mrf.mxu1  ;;  %v13686_v57 = vadd.f32 %v10659_v62, %v5973_v47 }
 0x2a3   : > { %v10606_v27 = vpop.f32.mrf.mxu0 }
 0x2a4   : > { %v10662_v25 = vpop.f32.mrf.mxu1  ;;  %v5975_v46 = vadd.f32 %v10606_v27, %v13587_v2 }
 0x2a5   : > { %v13689_v23 = vpop.f32.mrf.mxu0 }
 0x2a6   : > { %v13691_v39 = vpop.f32.mrf.mxu1  ;;  %v13693_v3 = vadd.f32 %v10662_v25, %v5975_v46 }
 0x2a7   : > { %v10609_v0 = vpop.f32.mrf.mxu0 }
 0x2a8   : > { %v10665_v5 = vpop.f32.mrf.mxu1  ;;  %v5977_v9 = vadd.f32 %v10609_v0, %v13593_v33 }
 0x2a9   : > { %v13696_v61 = vpop.f32.mrf.mxu0 }
 0x2aa   : > { %v13698_v51 = vpop.f32.mrf.mxu1  ;;  %v13700_v14 = vadd.f32 %v10665_v5, %v5977_v9 }
 0x2ab   : > { %v10612_v20 = vpop.f32.mrf.mxu0 }
 0x2ac   : > { %v10668_v56 = vpop.f32.mrf.mxu1  ;;  %v5979_v2 = vadd.f32 %v10612_v20, %v13599_v50 }
 0x2ad   : > { %v13703_v49 = vpop.f32.mrf.mxu0 }
 0x2ae   : > { %v13705_v36 = vpop.f32.mrf.mxu1  ;;  %v13707_v40 = vadd.f32 %v10668_v56, %v5979_v2 }
 0x2af   : > { %v10615_v62 = vpop.f32.mrf.mxu0 }
 0x2b0   : > { %v10671_v47 = vpop.f32.mrf.mxu1  ;;  %v5981_v33 = vadd.f32 %v10615_v62, %v13605_v60 }
 0x2b1   : > { %v13710_v27 = vpop.f32.mrf.mxu0 }
 0x2b2   : > { %v13712_v25 = vpop.f32.mrf.mxu1  ;;  %v13714_v46 = vadd.f32 %v10671_v47, %v5981_v33 }
 0x2b3   : > { %v10618_v0 = vpop.f32.mrf.mxu0 }
 0x2b4   : > { %v10674_v5 = vpop.f32.mrf.mxu1  ;;  %v5983_v50 = vadd.f32 %v10618_v0, %v13611_v30 }
 0x2b5   : > { %v13717_v9 = vpop.f32.mrf.mxu0 }
 0x2b6   : > { %v13719_v20 = vpop.f32.mrf.mxu1  ;;  %v13721_v56 = vadd.f32 %v10674_v5, %v5983_v50 }
 0x2b7   : > { %v10621_v2 = vpop.f32.mrf.mxu0 }
 0x2b8   : > { %v10677_v26 = vpop.f32.mrf.mxu1  ;;  %v5985_v60 = vadd.f32 %v10621_v2, %v13617_v42 }
 0x2b9   : > { %v13724_v62 = vpop.f32.mrf.mxu0 }
 0x2ba   : > { %v13726_v34 = vpop.f32.mrf.mxu1  ;;  %v13728_v47 = vadd.f32 %v10677_v26, %v5985_v60 }
 0x2bb   : > { %v10624_v33 = vpop.f32.mrf.mxu0 }
 0x2bc   : > { %14764 = vst [vmem:[#allocation33_spill] sm:$0xff] %v13728_v47  ;;  %v10680_v1 = vpop.f32.mrf.mxu1  ;;  %v5987_v30 = vadd.f32 %v10624_v33, %v13623_v17 }
 0x2bd   : > { %v13731_v0 = vpop.f32.mrf.mxu0 }
 0x2be   : > { %14765 = vst [vmem:[#allocation35_spill] sm:$0xff] %v13731_v0  ;;  %v13733_v21 = vpop.f32.mrf.mxu1  ;;  %v13735_v5 = vadd.f32 %v10680_v1, %v5987_v30 }
 0x2bf   : > { %v10627_v50 = vpop.f32.mrf.mxu0 }
 0x2c0   : > { %14766 = vst [vmem:[#allocation37_spill] sm:$0xff] %v13735_v5  ;;  %v10683_v18 = vpop.f32.mrf.mxu1  ;;  %v5989_v42 = vadd.f32 %v10627_v50, %v13629_v6 }
 0x2c1   : > { %v13738_v2 = vpop.f32.mrf.mxu0 }
 0x2c2   : > { %14767 = vst [vmem:[#allocation40_spill] sm:$0xff] %v13738_v2  ;;  %v13740_v54 = vpop.f32.mrf.mxu1  ;;  %v13742_v26 = vadd.f32 %v10683_v18, %v5989_v42 }
 0x2c3   : > { %v10630_v60 = vpop.f32.mrf.mxu0 }
 0x2c4   : > { %14768 = vst [vmem:[#allocation41_spill] sm:$0xff] %v13742_v26  ;;  %v10686_v47 = vpop.f32.mrf.mxu1  ;;  %v5991_v17 = vadd.f32 %v10630_v60, %v13635_v24 }
 0x2c5   : > { %v13745_v33 = vpop.f32.mrf.mxu0 }
 0x2c6   : > { %14769 = vst [vmem:[#allocation44_spill] sm:$0xff] %v13745_v33  ;;  %v13747_v0 = vpop.f32.mrf.mxu1  ;;  %v13749_v1 = vadd.f32 %v10686_v47, %v5991_v17  ;;  %v5967_v47 = vadd.f32 %v13656_v32, %v13563_v8  ;;  %v5968_v8 = vadd.f32 %v13670_v7, %v13572_v28  ;;  %v5970_v7 = vadd.f32 %v13675_v43, %v13578_v48 }
 0x2c7   : > { %v10633_v30 = vpop.f32.mrf.mxu0  ;;  %v5972_v48 = vadd.f32 %v13682_v12, %v13584_v41 }
 0x2c8   : > { %v10689_v5 = vpop.f32.mrf.mxu1  ;;  %v5993_v6 = vadd.f32 %v10633_v30, %v13641_v10 }
 0x2c9   : > { %v13752_v50 = vpop.f32.mrf.mxu0  ;;  %v6363_v12 = vadd.f32 %v13684_v31, %v5972_v48  ;;  %v5978_v48 = vadd.f32 %v13703_v49, %v13602_v19 }
 0x2ca   : > { %v13754_v2 = vpop.f32.mrf.mxu1  ;;  %v13756_v18 = vadd.f32 %v10689_v5, %v5993_v6 }
 0x2cb   : > { %14770 = vst [vmem:[#allocation45_spill] sm:$0xff] %v13754_v2  ;;  %v10636_v42 = vpop.f32.mrf.mxu0  ;;  %v5966_v2 = vadd.f32 %v13662_v15, %v13566_v22  ;;  %v6369_v49 = vadd.f32 %v13705_v36, %v5978_v48 }
 0x2cc   : > { %14771 = vst [vmem:[#allocation46_spill] sm:$0xff] %v13756_v18  ;;  %v10692_v26 = vpop.f32.mrf.mxu1  ;;  %v5995_v24 = vadd.f32 %v10636_v42, %v13647_v29  ;;  %v6358_v29 = vadd.f32 %v13658_v55, %v5967_v47  ;;  %v5969_v42 = vadd.f32 %v13666_v37, %v13569_v58  ;;  %v6359_v47 = vadd.f32 %v13672_v63, %v5968_v8 }
 0x2cd   : > { %v13759_v60 = vpop.f32.mrf.mxu0  ;;  %v6357_v22 = vadd.f32 %v13664_v35, %v5966_v2 }
 0x2ce   : > { %v13761_v33 = vpop.f32.mrf.mxu1  ;;  %v13765_v17 = vadd.f32 %v10692_v26, %v5995_v24  ;;  %v6360_v55 = vadd.f32 %v13668_v44, %v5969_v42  ;;  %v6361_v42 = vadd.f32 %v13677_v59, %v5970_v7 }
 0x2cf   : > { %14772 = vst [vmem:[#allocation47_spill] sm:$0xff] %v13761_v33  ;;  %v10639_v10 = vpop.f32.mrf.mxu0 }
 0x2d0   : > { %v10695_v30 = vpop.f32.mrf.mxu1  ;;  %v5997_v5 = vadd.f32 %v10639_v10, %v13653_v53  ;;  %v13785_v10 = vld [vmem:[%s14560_s5] ss:$0 sm:$0xff] }
 0x2d1   : > { %v13770_v6 = vpop.f32.mrf.mxu0 }
 0x2d2   : > { %v13772_v18 = vpop.f32.mrf.mxu1  ;;  %v13777_v33 = vadd.f32 %v10695_v30, %v5997_v5 }
 0x2d3   : > { %14773 = vst [vmem:[#allocation48_spill] sm:$0xff] %v13772_v18  ;;  %v10706_v32 = vpop.f32.mrf.mxu0 }
 0x2d4   : > { %14774 = vst [vmem:[#allocation49_spill] sm:$0xff] %v13777_v33  ;;  %v10762_v26 = vpop.f32.mrf.mxu1  ;;  %v6748_v15 = vadd.f32 %v10706_v32, %v6358_v29 }
 0x2d5   : > { %v6588_v53 = vpop.f32.mrf.mxu0 }
 0x2d6   : > { %v6978_v24 = vpop.f32.mrf.mxu1  ;;  %v7138_v58 = vadd.f32 %v10762_v26, %v6748_v15  ;;  %v6747_v37 = vadd.f32 %v6588_v53, %v6357_v22 }
 0x2d7   : > { %v10709_v30 = vpop.f32.mrf.mxu0 }
 0x2d8   : > { %v10765_v28 = vpop.f32.mrf.mxu1  ;;  %v7137_v35 = vadd.f32 %v6978_v24, %v6747_v37  ;;  %v6750_v2 = vadd.f32 %v10709_v30, %v6360_v55  ;;  %v13792_v5 = vadd.f32 %v13785_v10, %v7138_v58 }
 0x2d9   : > { %v6598_v29 = vpop.f32.mrf.mxu0 }
 0x2da   : > { %v6988_v32 = vpop.f32.mrf.mxu1  ;;  %v7140_v18 = vadd.f32 %v10765_v28, %v6750_v2  ;;  %v6749_v33 = vadd.f32 %v6598_v29, %v6359_v47  ;;  %7505 = vrot.lane.b32.xlu0 %v13792_v5, %s11053_s16  ;;  %v13800_v43 = vadd.f32 %v13785_v10, %v7137_v35 }
 0x2db   : > { %v10712_v44 = vpop.f32.mrf.mxu0 }
 0x2dc   : > { %v10768_v63 = vpop.f32.mrf.mxu1  ;;  %v7139_v8 = vadd.f32 %v6988_v32, %v6749_v33  ;;  %v6752_v26 = vadd.f32 %v10712_v44, %v13679_v38  ;;  %v13804_v15 = vadd.f32 %v13785_v10, %v7140_v18  ;;  %v5974_v33 = vadd.f32 %v13689_v23, %v13590_v45 }
 0x2dd   : > { %v6608_v22 = vpop.f32.mrf.mxu0  ;;  %v5976_v23 = vadd.f32 %v13696_v61, %v13596_v4 }
 0x2de   : > { %v6998_v53 = vpop.f32.mrf.mxu1  ;;  %v6751_v24 = vadd.f32 %v6608_v22, %v6361_v42  ;;  %7503 = vrot.lane.b32.xlu0 %v13800_v43, %s11053_s16  ;;  %7509 = vrot.lane.b32.xlu1 %v13804_v15, %s11053_s16  ;;  %v13814_v55 = vadd.f32 %v13785_v10, %v7139_v8  ;;  %v7142_v18 = vadd.f32 %v10768_v63, %v6752_v26 }
 0x2df   : > { %v10715_v59 = vpop.f32.mrf.mxu0  ;;  %v6365_v45 = vadd.f32 %v13691_v39, %v5974_v33  ;;  %v6367_v61 = vadd.f32 %v13698_v51, %v5976_v23 }
 0x2e0   : > { %v10771_v41 = vpop.f32.mrf.mxu1  ;;  %v7141_v38 = vadd.f32 %v6998_v53, %v6751_v24  ;;  %v6754_v58 = vadd.f32 %v10715_v59, %v13686_v57  ;;  %v13828_v57 = vadd.f32 %v13785_v10, %v7142_v18 }
 0x2e1   : > { %v6618_v37 = vpop.f32.mrf.mxu0 }
 0x2e2   : > { %v7008_v47 = vpop.f32.mrf.mxu1  ;;  %v13818_v30 = vadd.f32 %v13785_v10, %v7141_v38  ;;  %v6753_v28 = vadd.f32 %v6618_v37, %v6363_v12  ;;  %7507 = vrot.lane.b32.xlu1 %v13814_v55, %s11053_s16  ;;  %v7144_v35 = vadd.f32 %v10771_v41, %v6754_v58 }
 0x2e3   : > { %v10718_v31 = vpop.f32.mrf.mxu0 }
 0x2e4   : > { %v10774_v7 = vpop.f32.mrf.mxu1  ;;  %7511 = vrot.lane.b32.xlu0 %v13818_v30, %s11053_s16  ;;  %v6756_v2 = vadd.f32 %v10718_v31, %v13693_v3  ;;  %v7143_v29 = vadd.f32 %v7008_v47, %v6753_v28  ;;  %v13840_v8 = vadd.f32 %v13785_v10, %v7144_v35 }
 0x2e5   : > { %v6628_v32 = vpop.f32.mrf.mxu0 }
 0x2e6   : > { %v7018_v44 = vpop.f32.mrf.mxu1  ;;  %v6755_v63 = vadd.f32 %v6628_v32, %v6365_v45  ;;  %v13832_v42 = vadd.f32 %v13785_v10, %v7143_v29  ;;  %7513 = vrot.lane.b32.xlu1 %v13828_v57, %s11053_s16  ;;  %v7146_v3 = vadd.f32 %v10774_v7, %v6756_v2 }
 0x2e7   : > { %v10721_v4 = vpop.f32.mrf.mxu0 }
 0x2e8   : > { %v10777_v39 = vpop.f32.mrf.mxu1  ;;  %v6758_v26 = vadd.f32 %v10721_v4, %v13700_v14  ;;  %v7145_v22 = vadd.f32 %v7018_v44, %v6755_v63  ;;  %7515 = vrot.lane.b32.xlu0 %v13832_v42, %s11053_s16  ;;  %v5980_v14 = vadd.f32 %v13710_v27, %v13608_v13  ;;  %v13854_v12 = vadd.f32 %v13785_v10, %v7146_v3 }
 0x2e9   : > { %v6638_v53 = vpop.f32.mrf.mxu0  ;;  %v5984_v44 = vadd.f32 %v13724_v62, %v13620_v16 }
 0x2ea   : > { %v7028_v24 = vpop.f32.mrf.mxu1  ;;  %v6757_v59 = vadd.f32 %v6638_v53, %v6367_v61  ;;  %v13846_v41 = vadd.f32 %v13785_v10, %v7145_v22  ;;  %7517 = vrot.lane.b32.xlu1 %v13840_v8, %s11053_s16  ;;  %v7148_v33 = vadd.f32 %v10777_v39, %v6758_v26  ;;  %v6371_v27 = vadd.f32 %v13712_v25, %v5980_v14  ;;  %v14775_v22 = vld [vmem:[#allocation35_spill] sm:$0xff] }
 0x2eb   : > { %v10724_v19 = vpop.f32.mrf.mxu0  ;;  %v6375_v62 = vadd.f32 %v13726_v34, %v5984_v44  ;;  %v5986_v53 = vadd.f32 %v14775_v22, %v13626_v52 }
 0x2ec   : > { %v10780_v51 = vpop.f32.mrf.mxu1  ;;  %v6760_v38 = vadd.f32 %v10724_v19, %v13707_v40  ;;  %v7147_v18 = vadd.f32 %v7028_v24, %v6757_v59  ;;  %7519 = vrot.lane.b32.xlu0 %v13846_v41, %s11053_s16  ;;  %v5982_v40 = vadd.f32 %v13717_v9, %v13614_v11  ;;  %v13868_v7 = vadd.f32 %v13785_v10, %v7148_v33  ;;  %v14776_v59 = vld [vmem:[#allocation33_spill] sm:$0xff] }
 0x2ed   : > { %v6648_v58 = vpop.f32.mrf.mxu0 }
 0x2ee   : > { %v7038_v37 = vpop.f32.mrf.mxu1  ;;  %v6759_v47 = vadd.f32 %v6648_v58, %v6369_v49  ;;  %v13860_v28 = vadd.f32 %v13785_v10, %v7147_v18  ;;  %7521 = vrot.lane.b32.xlu1 %v13854_v12, %s11053_s16  ;;  %v7150_v45 = vadd.f32 %v10780_v51, %v6760_v38  ;;  %v6373_v9 = vadd.f32 %v13719_v20, %v5982_v40  ;;  %v14777_v58 = vld [vmem:[#allocation3_spill] sm:$0xff]  ;;  %v14779_v40 = vld [vmem:[#allocation37_spill] sm:$0xff] }
 0x2ef   : > { %v10727_v13 = vpop.f32.mrf.mxu0  ;;  %v6377_v18 = vadd.f32 %v13733_v21, %v5986_v53 }
 0x2f0   : > { %v10783_v36 = vpop.f32.mrf.mxu1  ;;  %v7149_v31 = vadd.f32 %v7038_v37, %v6759_v47  ;;  %v6762_v23 = vadd.f32 %v10727_v13, %v13714_v46  ;;  %7523 = vrot.lane.b32.xlu0 %v13860_v28, %s11053_s16  ;;  %v13882_v63 = vadd.f32 %v13785_v10, %v7150_v45  ;;  %v14778_v37 = vld [vmem:[#allocation40_spill] sm:$0xff] }
 0x2f1   : > { %v6658_v35 = vpop.f32.mrf.mxu0  ;;  %v5988_v47 = vadd.f32 %v14778_v37, %v14777_v58  ;;  %v14784_v58 = vld [vmem:[#allocation9_spill] sm:$0xff] }
 0x2f2   : > { %v7048_v2 = vpop.f32.mrf.mxu1  ;;  %v13874_v29 = vadd.f32 %v13785_v10, %v7149_v31  ;;  %v6761_v32 = vadd.f32 %v6658_v35, %v6371_v27  ;;  %7525 = vrot.lane.b32.xlu1 %v13868_v7, %s11053_s16  ;;  %v7152_v4 = vadd.f32 %v10783_v36, %v6762_v23  ;;  %v5994_v37 = vadd.f32 %v13759_v60, %v14784_v58 }
 0x2f3   : > { %v10730_v11 = vpop.f32.mrf.mxu0 }
 0x2f4   : > { %v10786_v25 = vpop.f32.mrf.mxu1  ;;  %v7151_v46 = vadd.f32 %v7048_v2, %v6761_v32  ;;  %v6764_v39 = vadd.f32 %v10730_v11, %v13721_v56  ;;  %7527 = vrot.lane.b32.xlu0 %v13874_v29, %s11053_s16  ;;  %v13896_v56 = vadd.f32 %v13785_v10, %v7152_v4  ;;  %v6379_v11 = vadd.f32 %v13740_v54, %v5988_v47 }
 0x2f5   : > { %v6668_v61 = vpop.f32.mrf.mxu0 }
 0x2f6   : > { %v7058_v48 = vpop.f32.mrf.mxu1  ;;  %v13888_v3 = vadd.f32 %v13785_v10, %v7151_v46  ;;  %v6763_v26 = vadd.f32 %v6668_v61, %v6373_v9  ;;  %7529 = vrot.lane.b32.xlu1 %v13882_v63, %s11053_s16  ;;  %v7154_v24 = vadd.f32 %v10786_v25, %v6764_v39  ;;  %v14780_v25 = vld [vmem:[#allocation5_spill] sm:$0xff]  ;;  %v14781_v9 = vld [vmem:[#allocation44_spill] sm:$0xff] }
 0x2f7   : > { %v10733_v16 = vpop.f32.mrf.mxu0  ;;  %v5990_v44 = vadd.f32 %v14781_v9, %v14780_v25  ;;  %v14782_v39 = vld [vmem:[#allocation41_spill] sm:$0xff]  ;;  %v14787_v25 = vld [vmem:[#allocation47_spill] sm:$0xff] }
 0x2f8   : > { %v10789_v20 = vpop.f32.mrf.mxu1  ;;  %v6766_v19 = vadd.f32 %v10733_v16, %v14776_v59  ;;  %v7153_v51 = vadd.f32 %v7058_v48, %v6763_v26  ;;  %7531 = vrot.lane.b32.xlu0 %v13888_v3, %s11053_s16  ;;  %v13910_v36 = vadd.f32 %v13785_v10, %v7154_v24  ;;  %v14783_v59 = vld [vmem:[#allocation7_spill] sm:$0xff]  ;;  %v6385_v9 = vadd.f32 %v14787_v25, %v5994_v37 }
 0x2f9   : > { %v6678_v49 = vpop.f32.mrf.mxu0  ;;  %v6381_v53 = vadd.f32 %v13747_v0, %v5990_v44  ;;  %v14788_v44 = vld [vmem:[#allocation11_spill] sm:$0xff] }
 0x2fa   : > { %v7068_v14 = vpop.f32.mrf.mxu1  ;;  %v6765_v33 = vadd.f32 %v6678_v49, %v6375_v62  ;;  %v13902_v38 = vadd.f32 %v13785_v10, %v7153_v51  ;;  %7533 = vrot.lane.b32.xlu1 %v13896_v56, %s11053_s16  ;;  %v7156_v27 = vadd.f32 %v10789_v20, %v6766_v19  ;;  %v5992_v19 = vadd.f32 %v13752_v50, %v14783_v59 }
 0x2fb   : > { %v10736_v52 = vpop.f32.mrf.mxu0 }
 0x2fc   : > { %v10792_v34 = vpop.f32.mrf.mxu1  ;;  %v7155_v13 = vadd.f32 %v7068_v14, %v6765_v33  ;;  %v6768_v31 = vadd.f32 %v10736_v52, %v14779_v40  ;;  %7535 = vrot.lane.b32.xlu0 %v13902_v38, %s11053_s16  ;;  %v13924_v46 = vadd.f32 %v13785_v10, %v7156_v27 }
 0x2fd   : > { %v6688_v45 = vpop.f32.mrf.mxu0 }
 0x2fe   : > { %v7078_v23 = vpop.f32.mrf.mxu1  ;;  %v13916_v35 = vadd.f32 %v13785_v10, %v7155_v13  ;;  %v6767_v2 = vadd.f32 %v6688_v45, %v6377_v18  ;;  %7537 = vrot.lane.b32.xlu1 %v13910_v36, %s11053_s16  ;;  %v7158_v4 = vadd.f32 %v10792_v34, %v6768_v31  ;;  %v14785_v13 = vld [vmem:[#allocation45_spill] sm:$0xff]  ;;  %v14786_v31 = vld [vmem:[#allocation46_spill] sm:$0xff] }
 0x2ff   : > { %v10739_v21 = vpop.f32.mrf.mxu0 }
 0x300   : > { %v10795_v32 = vpop.f32.mrf.mxu1  ;;  %v6770_v61 = vadd.f32 %v10739_v21, %v14782_v39  ;;  %v7157_v48 = vadd.f32 %v7078_v23, %v6767_v2  ;;  %7539 = vrot.lane.b32.xlu0 %v13916_v35, %s11053_s16  ;;  %v13938_v51 = vadd.f32 %v13785_v10, %v7158_v4  ;;  %v5996_v4 = vadd.f32 %v13770_v6, %v14788_v44 }
 0x301   : > { %v6698_v26 = vpop.f32.mrf.mxu0 }
 0x302   : > { %v7088_v16 = vpop.f32.mrf.mxu1  ;;  %v6769_v20 = vadd.f32 %v6698_v26, %v6379_v11  ;;  %v13930_v62 = vadd.f32 %v13785_v10, %v7157_v48  ;;  %7541 = vrot.lane.b32.xlu1 %v13924_v46, %s11053_s16  ;;  %v7160_v49 = vadd.f32 %v10795_v32, %v6770_v61 }
 0x303   : > { %v10742_v54 = vpop.f32.mrf.mxu0 }
 0x304   : > { %v10798_v22 = vpop.f32.mrf.mxu1  ;;  %v7159_v24 = vadd.f32 %v7088_v16, %v6769_v20  ;;  %v6772_v14 = vadd.f32 %v10742_v54, %v13749_v1  ;;  %7543 = vrot.lane.b32.xlu0 %v13930_v62, %s11053_s16  ;;  %v6383_v1 = vadd.f32 %v14785_v13, %v5992_v19  ;;  %v13952_v27 = vadd.f32 %v13785_v10, %v7160_v49  ;;  %v14790_v49 = vld [vmem:[#allocation48_spill] sm:$0xff] }
 0x305   : > { %v6708_v33 = vpop.f32.mrf.mxu0 }
 0x306   : > { %v7098_v52 = vpop.f32.mrf.mxu1  ;;  %v13944_v34 = vadd.f32 %v13785_v10, %v7159_v24  ;;  %v6771_v18 = vadd.f32 %v6708_v33, %v6381_v53  ;;  %7545 = vrot.lane.b32.xlu1 %v13938_v51, %s11053_s16  ;;  %v7162_v40 = vadd.f32 %v10798_v22, %v6772_v14  ;;  %v14789_v24 = vld [vmem:[#allocation49_spill] sm:$0xff] }
 0x307   : > { %v10745_v0 = vpop.f32.mrf.mxu0 }
 0x308   : > { %v10801_v50 = vpop.f32.mrf.mxu1  ;;  %v7161_v47 = vadd.f32 %v7098_v52, %v6771_v18  ;;  %v6774_v45 = vadd.f32 %v10745_v0, %v14786_v31  ;;  %7547 = vrot.lane.b32.xlu0 %v13944_v34, %s11053_s16  ;;  %v13966_v39 = vadd.f32 %v13785_v10, %v7162_v40  ;;  %v14008_v40 = vld [vmem:[%s14559_s4] ss:$0 sm:$0xff]  ;;  %v14791_v31 = vld [vmem:[#allocation13_spill] sm:$0xff] }
 0x309   : > { %v6718_v23 = vpop.f32.mrf.mxu0 }
 0x30a   : > { %v7108_v2 = vpop.f32.mrf.mxu1  ;;  %v13958_v21 = vadd.f32 %v13785_v10, %v7161_v47  ;;  %v6773_v32 = vadd.f32 %v6718_v23, %v6383_v1  ;;  %7549 = vrot.lane.b32.xlu1 %v13952_v27, %s11053_s16  ;;  %v7164_v61 = vadd.f32 %v10801_v50, %v6774_v45  ;;  %v14012_v45 = vadd.f32 %v14008_v40, %v14791_v31  ;;  %v14792_v23 = vld [vmem:[#allocation14_spill] sm:$0xff] }
 0x30b   : > { %v10748_v60 = vpop.f32.mrf.mxu0 }
 0x30c   : > { %v10804_v11 = vpop.f32.mrf.mxu1  ;;  %v6776_v48 = vadd.f32 %v10748_v60, %v13765_v17  ;;  %v7163_v26 = vadd.f32 %v7108_v2, %v6773_v32  ;;  %7551 = vrot.lane.b32.xlu0 %v13958_v21, %s11053_s16  ;;  %v6387_v17 = vadd.f32 %v14790_v49, %v5996_v4  ;;  %v13979_v14 = vadd.f32 %v13785_v10, %v7164_v61  ;;  %v14793_v32 = vld [vmem:[#allocation15_spill] sm:$0xff]  ;;  %v14794_v4 = vld [vmem:[#allocation16_spill] sm:$0xff] }
 0x30d   : > { %v6728_v16 = vpop.f32.mrf.mxu0  ;;  %v14018_v2 = vadd.f32 %v14008_v40, %v14792_v23  ;;  %v14022_v60 = vadd.f32 %v14008_v40, %v14793_v32  ;;  %v14030_v61 = vadd.f32 %v14008_v40, %v14794_v4  ;;  %v14802_v32 = vld [vmem:[#allocation24_spill] sm:$0xff] }
 0x30e   : > { %v7118_v20 = vpop.f32.mrf.mxu1  ;;  %v6775_v54 = vadd.f32 %v6728_v16, %v6385_v9  ;;  %v13972_v22 = vadd.f32 %v13785_v10, %v7163_v26  ;;  %7553 = vrot.lane.b32.xlu1 %v13966_v39, %s11053_s16  ;;  %v7166_v33 = vadd.f32 %v10804_v11, %v6776_v48  ;;  %v14795_v26 = vld [vmem:[#allocation17_spill] sm:$0xff] }
 0x30f   : > { %v10751_v6 = vpop.f32.mrf.mxu0  ;;  %v7247_v11 = vadd.f32 %v13800_v43, %v14018_v2  ;;  %v7250_v9 = vadd.f32 %v13804_v15, %v14022_v60  ;;  %v7249_v48 = vadd.f32 %v13814_v55, %v14030_v61  ;;  %v14036_v16 = vadd.f32 %v14008_v40, %v14795_v26  ;;  %v14796_v43 = vld [vmem:[#allocation18_spill] sm:$0xff] }
 0x310   : > { %v10807_v53 = vpop.f32.mrf.mxu1  ;;  %v6778_v59 = vadd.f32 %v10751_v6, %v14789_v24  ;;  %v7165_v19 = vadd.f32 %v7118_v20, %v6775_v54  ;;  %7555 = vrot.lane.b32.xlu0 %v13972_v22, %s11053_s16  ;;  %v13989_v37 = vadd.f32 %v13785_v10, %v7166_v33  ;;  %v14040_v20 = vadd.f32 %v14008_v40, %v14796_v43  ;;  %v14798_v24 = vld [vmem:[#allocation20_spill] sm:$0xff]  ;;  %v14799_v33 = vld [vmem:[#allocation21_spill] sm:$0xff] }
 0x311   : > { %v6738_v52 = vpop.f32.mrf.mxu0  ;;  %v9198_v44 = vmul.f32 -1.442695, %v7247_v11  ;;  %v7252_v15 = vadd.f32 %v13828_v57, %v14036_v16  ;;  %v9200_v54 = vmul.f32 -1.442695, %v7249_v48  ;;  %v14076_v11 = vadd.f32 %v14008_v40, %v14802_v32  ;;  %v14804_v48 = vld [vmem:[#allocation26_spill] sm:$0xff] }
 0x312   : > { %v13984_v18 = vadd.f32 %v13785_v10, %v7165_v19  ;;  %v7128_v0 = vpop.f32.mrf.mxu1  ;;  %v6777_v50 = vadd.f32 %v6738_v52, %v6387_v17  ;;  %7557 = vrot.lane.b32.xlu1 %v13979_v14, %s11053_s16  ;;  %v7168_v58 = vadd.f32 %v10807_v53, %v6778_v59  ;;  %v7251_v6 = vadd.f32 %v13818_v30, %v14040_v20  ;;  %v14797_v53 = vld [vmem:[#allocation19_spill] sm:$0xff]  ;;  %v14800_v52 = vld [vmem:[#allocation22_spill] sm:$0xff] }
 0x313   : > { %v14048_v55 = vadd.f32 %v14008_v40, %v14797_v53  ;;  %v14052_v59 = vadd.f32 %v14008_v40, %v14798_v24  ;;  %v9203_v19 = vmul.f32 -1.442695, %v7252_v15  ;;  %v14060_v30 = vadd.f32 %v14008_v40, %v14799_v33  ;;  %v14805_v53 = vld [vmem:[#allocation28_spill] sm:$0xff] }
 0x314   : > { %v7167_v47 = vadd.f32 %v7128_v0, %v6777_v50  ;;  %7559 = vrot.lane.b32.xlu0 %v13984_v18, %s11053_s16  ;;  %v13994_v13 = vadd.f32 %v13785_v10, %v7168_v58  ;;  %v9202_v17 = vmul.f32 -1.442695, %v7251_v6  ;;  %v14064_v0 = vadd.f32 %v14008_v40, %v14800_v52 }
 0x315   : > { %v7254_v49 = vadd.f32 %v13840_v8, %v14048_v55  ;;  %v7253_v57 = vadd.f32 %v13832_v42, %v14052_v59  ;;  %v14801_v8 = vld [vmem:[#allocation23_spill] sm:$0xff]  ;;  %v14086_v26 = vadd.f32 %v14008_v40, %v14804_v48  ;;  %v7257_v43 = vadd.f32 %v13860_v28, %v14076_v11  ;;  %v14810_v48 = vld [vmem:[#allocation2_spill] sm:$0xff] }
 0x316   : > { %v13997_v1 = vadd.f32 %v13785_v10, %v7167_v47  ;;  %7561 = vrot.lane.b32.xlu1 %v13989_v37, %s11053_s16  ;;  %v7248_v10 = vadd.f32 %v13792_v5, %v14012_v45  ;;  %v9201_v5 = vmul.f32 -1.442695, %v7250_v9  ;;  %v7256_v47 = vadd.f32 %v13854_v12, %v14060_v30 }
 0x317   : > { %v9205_v58 = vmul.f32 -1.442695, %v7254_v49  ;;  %v14070_v31 = vadd.f32 %v14008_v40, %v14801_v8  ;;  %v9204_v42 = vmul.f32 -1.442695, %v7253_v57  ;;  %v7259_v6 = vadd.f32 %v13874_v29, %v14086_v26  ;;  %v14806_v49 = vld [vmem:[#allocation30_spill] sm:$0xff]  ;;  %v14808_v8 = vld [vmem:[#allocation27_spill] sm:$0xff] }
 0x318   : > { %7563 = vrot.lane.b32.xlu0 %v13997_v1, %s11053_s16  ;;  %v9199_v25 = vmul.f32 -1.442695, %v7248_v10  ;;  %v7255_v10 = vadd.f32 %v13846_v41, %v14064_v0  ;;  %v9207_v4 = vmul.f32 -1.442695, %v7256_v47  ;;  %v14096_v24 = vadd.f32 %v14008_v40, %v14805_v53  ;;  %v14811_v53 = vld [vmem:[#allocation4_spill] sm:$0xff] }
 0x319   : > { %v7258_v9 = vadd.f32 %v13868_v7, %v14070_v31  ;;  %v9208_v28 = vmul.f32 -1.442695, %v7257_v43  ;;  %v9210_v29 = vmul.f32 -1.442695, %v7259_v6 }
 0x31a   : > { %7565 = vrot.lane.b32.xlu1 %v13994_v13, %s11053_s16  ;;  %10820 = vpow2.f32 %v9199_v25  ;;  %v9206_v41 = vmul.f32 -1.442695, %v7255_v10  ;;  %v7262_v33 = vadd.f32 %v13896_v56, %v14096_v24 }
 0x31b   : > { %10822 = vpow2.f32 %v9198_v44  ;;  %v14803_v44 = vld [vmem:[#allocation25_spill] sm:$0xff] }
 0x31c   : > { %10824 = vpow2.f32 %v9201_v5  ;;  %v14082_v12 = vadd.f32 %v14008_v40, %v14803_v44  ;;  %v9213_v56 = vmul.f32 -1.442695, %v7262_v33 }
 0x31d   : > { %10826 = vpow2.f32 %v9200_v54  ;;  %v9209_v54 = vmul.f32 -1.442695, %v7258_v9  ;;  %v14809_v9 = vld [vmem:[#allocation29_spill] sm:$0xff] }
 0x31e   : > { %10828 = vpow2.f32 %v9203_v19  ;;  %v7260_v7 = vadd.f32 %v13882_v63, %v14082_v12  ;;  %v14120_v44 = vadd.f32 %v14008_v40, %v14809_v9  ;;  %v14813_v9 = vld [vmem:[#allocation8_spill] sm:$0xff] }
 0x31f   : > { %10830 = vpow2.f32 %v9202_v17  ;;  %v14100_v17 = vadd.f32 %v14008_v40, %v14806_v49 }
 0x320   : > { %10832 = vpow2.f32 %v9205_v58  ;;  %v9211_v63 = vmul.f32 -1.442695, %v7260_v7  ;;  %v7266_v7 = vadd.f32 %v13924_v46, %v14120_v44 }
 0x321   : > { %10834 = vpow2.f32 %v9204_v42  ;;  %v7261_v52 = vadd.f32 %v13888_v3, %v14100_v17  ;;  %v14112_v42 = vadd.f32 %v14008_v40, %v14808_v8 }
 0x323   : > { %v9212_v3 = vmul.f32 -1.442695, %v7261_v52  ;;  %v9217_v52 = vmul.f32 -1.442695, %v7266_v7 }
 0x327   : > { %v10821_v50 = vpop.eup %10820 }
 0x328   : > { %v10823_v23 = vpop.eup %10822  ;;  %v7376_v25 = vadd.f32 1.0, %v10821_v50  ;;  %v14807_v50 = vld [vmem:[#allocation31_spill] sm:$0xff] }
 0x329   : > { %v10825_v5 = vpop.eup %10824  ;;  %v7375_v15 = vadd.f32 1.0, %v10823_v23  ;;  %v14108_v58 = vadd.f32 %v14008_v40, %v14807_v50 }
 0x32a   : > { %10836 = vrcp.f32 %v7376_v25  ;;  %v7378_v19 = vadd.f32 1.0, %v10825_v5  ;;  %v10827_v57 = vpop.eup %10826  ;;  %v7263_v25 = vadd.f32 %v13902_v38, %v14112_v42 }
 0x32b   : > { %10838 = vpow2.f32 %v9207_v4  ;;  %v10829_v47 = vpop.eup %10828  ;;  %v7377_v10 = vadd.f32 1.0, %v10827_v57  ;;  %v7264_v32 = vadd.f32 %v13910_v36, %v14108_v58  ;;  %v14812_v57 = vld [vmem:[#allocation6_spill] sm:$0xff] }
 0x32c   : > { %10840 = vpow2.f32 %v9206_v41  ;;  %v10831_v23 = vpop.eup %10830  ;;  %v7380_v4 = vadd.f32 1.0, %v10829_v47  ;;  %v14124_v41 = vadd.f32 %v14008_v40, %v14810_v48  ;;  %v9214_v38 = vmul.f32 -1.442695, %v7263_v25 }
 0x32d   : > { %10842 = vrcp.f32 %v7375_v15  ;;  %v10833_v5 = vpop.eup %10832  ;;  %v7379_v43 = vadd.f32 1.0, %v10831_v23  ;;  %v9215_v36 = vmul.f32 -1.442695, %v7264_v32 }
 0x32e   : > { %10844 = vpow2.f32 %v9209_v54  ;;  %v10835_v15 = vpop.eup %10834  ;;  %v7265_v54 = vadd.f32 %v13916_v35, %v14124_v41  ;;  %v7382_v49 = vadd.f32 1.0, %v10833_v5 }
 0x32f   : > { %10846 = vrcp.f32 %v7378_v19  ;;  %v14134_v19 = vadd.f32 %v14008_v40, %v14811_v53  ;;  %v7381_v46 = vadd.f32 1.0, %v10835_v15  ;;  %v14814_v15 = vld [vmem:[#allocation10_spill] sm:$0xff] }
 0x330   : > { %10848 = vpow2.f32 %v9208_v28  ;;  %v9216_v8 = vmul.f32 -1.442695, %v7265_v54 }
 0x331   : > { %10850 = vpow2.f32 %v9211_v63  ;;  %v14138_v63 = vadd.f32 %v14008_v40, %v14812_v57  ;;  %v7268_v35 = vadd.f32 %v13938_v51, %v14134_v19 }
 0x332   : > { %10852 = vpow2.f32 %v9210_v29 }
 0x333   : > { %10854 = vrcp.f32 %v7377_v10  ;;  %v7267_v10 = vadd.f32 %v13930_v62, %v14138_v63  ;;  %v9219_v5 = vmul.f32 -1.442695, %v7268_v35 }
 0x334   : > { %10856 = vpow2.f32 %v9213_v56 }
 0x335   : > { %10858 = vpow2.f32 %v9212_v3  ;;  %v9218_v7 = vmul.f32 -1.442695, %v7267_v10 }
 0x336   : > { %10860 = vrcp.f32 %v7380_v4  ;;  %v14152_v4 = vadd.f32 %v14008_v40, %v14813_v9 }
 0x337   : > { %v14130_v6 = vpop.eup %10836  ;;  %10862 = vrcp.f32 %v7379_v43 }
 0x338   : > { %v10839_v28 = vpop.eup %10838  ;;  %10864 = vpow2.f32 %v9215_v36  ;;  %v14157_v36 = vadd.f32 %v14008_v40, %v14814_v15  ;;  %v14818_v15 = vld [vmem:[#allocation36_spill] sm:$0xff] }
 0x339   : > { %v10841_v29 = vpop.eup %10840  ;;  %10866 = vpow2.f32 %v9214_v38  ;;  %v7384_v56 = vadd.f32 1.0, %v10839_v28 }
 0x33a   : > { %v14143_v47 = vpop.eup %10842  ;;  %10868 = vrcp.f32 %v7382_v49  ;;  %v7383_v3 = vadd.f32 1.0, %v10841_v29  ;;  %v7270_v49 = vadd.f32 %v13952_v27, %v14152_v4  ;;  %v7269_v57 = vadd.f32 %v13944_v34, %v14157_v36  ;;  %v14816_v27 = vld [vmem:[#allocation32_spill] sm:$0xff] }
 0x33b   : > { %v10845_v23 = vpop.eup %10844  ;;  %10870 = vrcp.f32 %v7381_v46 }
 0x33c   : > { %v14148_v32 = vpop.eup %10846  ;;  %10872 = vpow2.f32 %v9217_v52  ;;  %v7386_v53 = vadd.f32 1.0, %v10845_v23  ;;  %v9220_v9 = vmul.f32 -1.442695, %v7269_v57 }
 0x33d   : > { %v10849_v25 = vpop.eup %10848  ;;  %10874 = vpow2.f32 %v9216_v8  ;;  %v14174_v8 = vadd.f32 %v14008_v40, %v14816_v27 }
 0x33e   : > { %v10851_v43 = vpop.eup %10850  ;;  %10876 = vrcp.f32 %v7384_v56  ;;  %v7385_v28 = vadd.f32 1.0, %v10849_v25 }
 0x33f   : > { %v10853_v54 = vpop.eup %10852  ;;  %10878 = vrcp.f32 %v7383_v3  ;;  %v7388_v52 = vadd.f32 1.0, %v10851_v43  ;;  %v9221_v3 = vmul.f32 -1.442695, %v7270_v49 }
 0x340   : > { %v14166_v46 = vpop.eup %10854  ;;  %10880 = vpow2.f32 %v9219_v5  ;;  %v7387_v10 = vadd.f32 1.0, %v10853_v54  ;;  %v7271_v5 = vadd.f32 %v13958_v21, %v14174_v8 }
 0x341   : > { %10882 = vpow2.f32 %v9218_v7  ;;  %v14192_v7 = vadd.f32 %v14008_v40, %v14818_v15 }
 0x342   : > { %10884 = vrcp.f32 %v7386_v53 }
 0x343   : > { %10886 = vrcp.f32 %v7385_v28 }
 0x34c   : > { %v7506_v33 = vpop.permute.xlu0 %7505 }
 0x34d   : > { %v7600_v50 = vmul.f32 %v14130_v6, %v7506_v33  ;;  %v14815_v33 = vld [vmem:[#allocation12_spill] sm:$0xff] }
 0x34e   : > { %v14170_v29 = vadd.f32 %v14008_v40, %v14815_v33 }
 0x34f   : > { %7665 = vrot.lane.b32.xlu1 %v7600_v50, %s11054_s19  ;;  %v10857_v50 = vpop.eup %10856  ;;  %10888 = vrcp.f32 %v7388_v52  ;;  %v9222_v52 = vmul.f32 -1.442695, %v7271_v5 }
 0x350   : > { %v7504_v51 = vpop.permute.xlu0 %7503  ;;  %v7510_v48 = vpop.permute.xlu1 %7509 }
 0x351   : > { %v7599_v62 = vmul.f32 %v14143_v47, %v7504_v51  ;;  %v7602_v38 = vmul.f32 %v14148_v32, %v7510_v48  ;;  %v10859_v56 = vpop.eup %10858  ;;  %v7272_v51 = vadd.f32 %v13966_v39, %v14170_v29  ;;  %v14817_v48 = vld [vmem:[#allocation34_spill] sm:$0xff]  ;;  %v7390_v39 = vadd.f32 1.0, %v10857_v50 }
 0x352   : > { %v14179_v25 = vpop.eup %10860  ;;  %v14188_v43 = vadd.f32 %v14008_v40, %v14817_v48  ;;  %10890 = vrcp.f32 %v7387_v10  ;;  %v7389_v53 = vadd.f32 1.0, %v10859_v56  ;;  %v7273_v50 = vadd.f32 %v13972_v22, %v14192_v7  ;;  %v14820_v56 = vld [vmem:[#allocation39_spill] sm:$0xff] }
 0x353   : > { %7663 = vrot.lane.b32.xlu0 %v7599_v62, %s11054_s19  ;;  %7669 = vrot.lane.b32.xlu1 %v7602_v38, %s11054_s19  ;;  %v14184_v62 = vpop.eup %10862  ;;  %10892 = vpow2.f32 %v9221_v3  ;;  %v9223_v57 = vmul.f32 -1.442695, %v7272_v51 }
 0x354   : > { %v7508_v35 = vpop.permute.xlu1 %7507  ;;  %v10865_v54 = vpop.eup %10864  ;;  %v7274_v33 = vadd.f32 %v13979_v14, %v14188_v43  ;;  %10894 = vpow2.f32 %v9220_v9  ;;  %v14212_v14 = vadd.f32 %v14008_v40, %v14820_v56 }
 0x355   : > { %v7601_v34 = vmul.f32 %v14166_v46, %v7508_v35  ;;  %v10867_v28 = vpop.eup %10866  ;;  %10896 = vrcp.f32 %v7390_v39  ;;  %v7392_v3 = vadd.f32 1.0, %v10865_v54 }
 0x356   : > { %v7512_v23 = vpop.permute.xlu0 %7511  ;;  %v14198_v27 = vpop.eup %10868  ;;  %10898 = vrcp.f32 %v7389_v53  ;;  %v7391_v22 = vadd.f32 1.0, %v10867_v28  ;;  %v7275_v39 = vadd.f32 %v13984_v18, %v14212_v14  ;;  %v14821_v18 = vld [vmem:[#allocation42_spill] sm:$0xff] }
 0x357   : > { %7667 = vrot.lane.b32.xlu0 %v7601_v34, %s11054_s19  ;;  %v7603_v21 = vmul.f32 %v14184_v62, %v7512_v23  ;;  %v14204_v10 = vpop.eup %10870  ;;  %v14819_v34 = vld [vmem:[#allocation38_spill] sm:$0xff]  ;;  %10900 = vpow2.f32 %v9223_v57  ;;  %v7278_v56 = vadd.f32 %v13994_v13, %v14821_v18 }
 0x358   : > { %v7514_v38 = vpop.permute.xlu1 %7513  ;;  %v14208_v23 = vadd.f32 %v14008_v40, %v14819_v34  ;;  %v10873_v9 = vpop.eup %10872  ;;  %10902 = vpow2.f32 %v9222_v52  ;;  %v9224_v40 = vmul.f32 -1.442695, %v7273_v50 }
 0x359   : > { %v7604_v49 = vmul.f32 %v14179_v25, %v7514_v38  ;;  %v10875_v15 = vpop.eup %10874  ;;  %v9225_v38 = vmul.f32 -1.442695, %v7274_v33  ;;  %10904 = vrcp.f32 %v7392_v3  ;;  %v7394_v53 = vadd.f32 1.0, %v10873_v9  ;;  %v14822_v9 = vld [vmem:[#allocation43_spill] sm:$0xff] }
 0x35a   : > { %v7516_v35 = vpop.permute.xlu0 %7515  ;;  %v14218_v34 = vpop.eup %10876  ;;  %10906 = vrcp.f32 %v7391_v22  ;;  %v9226_v3 = vmul.f32 -1.442695, %v7275_v39 }
 0x35b   : > { %7673 = vrot.lane.b32.xlu1 %v7604_v49, %s11054_s19  ;;  %7671 = vrot.lane.b32.xlu0 %v7603_v21, %s11054_s19  ;;  %v7605_v5 = vmul.f32 %v14204_v10, %v7516_v35  ;;  %v7276_v21 = vadd.f32 %v13989_v37, %v14208_v23  ;;  %v14224_v54 = vpop.eup %10878  ;;  %v7393_v37 = vadd.f32 1.0, %v10875_v15  ;;  %10908 = vpow2.f32 %v9225_v38 }
 0x35c   : > { %v7518_v51 = vpop.permute.xlu1 %7517  ;;  %v10881_v57 = vpop.eup %10880  ;;  %10910 = vpow2.f32 %v9224_v40 }
 0x35d   : > { %v7606_v48 = vmul.f32 %v14198_v27, %v7518_v51  ;;  %v10883_v52 = vpop.eup %10882  ;;  %v9227_v50 = vmul.f32 -1.442695, %v7276_v21  ;;  %10912 = vrcp.f32 %v7394_v53  ;;  %v7396_v15 = vadd.f32 1.0, %v10881_v57 }
 0x35e   : > { %v7520_v49 = vpop.permute.xlu0 %7519  ;;  %10914 = vrcp.f32 %v7393_v37  ;;  %v7395_v13 = vadd.f32 1.0, %v10883_v52 }
 0x35f   : > { %7677 = vrot.lane.b32.xlu1 %v7606_v48, %s11054_s19  ;;  %7675 = vrot.lane.b32.xlu0 %v7605_v5, %s11054_s19  ;;  %v7607_v33 = vmul.f32 %v14224_v54, %v7520_v49  ;;  %v14230_v5 = vpop.eup %10884  ;;  %v7277_v48 = vadd.f32 %v13997_v1, %v14822_v9  ;;  %10916 = vpow2.f32 %v9227_v50  ;;  %v9229_v1 = vmul.f32 -1.442695, %v7278_v56 }
 0x360   : > { %v7522_v28 = vpop.permute.xlu1 %7521  ;;  %v14236_v22 = vpop.eup %10886  ;;  %10918 = vpow2.f32 %v9226_v3 }
 0x361   : > { %v7608_v35 = vmul.f32 %v14218_v34, %v7522_v28  ;;  %v14238_v21 = vpop.eup %10888  ;;  %10920 = vrcp.f32 %v7396_v15 }
 0x362   : > { %v7524_v51 = vpop.permute.xlu0 %7523  ;;  %v14242_v39 = vpop.eup %10890  ;;  %10922 = vrcp.f32 %v7395_v13 }
 0x363   : > { %7681 = vrot.lane.b32.xlu1 %v7608_v35, %s11054_s19  ;;  %7679 = vrot.lane.b32.xlu0 %v7607_v33, %s11054_s19  ;;  %v7609_v49 = vmul.f32 %v14236_v22, %v7524_v51  ;;  %14823 = vst [vmem:[#allocation35_spill] sm:$0xff] %v14242_v39  ;;  %v10893_v35 = vpop.eup %10892  ;;  %v9228_v33 = vmul.f32 -1.442695, %v7277_v48  ;;  %10924 = vpow2.f32 %v9229_v1 }
 0x364   : > { %v7526_v38 = vpop.permute.xlu1 %7525  ;;  %v10895_v53 = vpop.eup %10894  ;;  %v7398_v56 = vadd.f32 1.0, %v10893_v35 }
 0x365   : > { %v7610_v40 = vmul.f32 %v14230_v5, %v7526_v38  ;;  %v14246_v37 = vpop.eup %10896  ;;  %v7397_v38 = vadd.f32 1.0, %v10895_v53  ;;  %10926 = vpow2.f32 %v9228_v33 }
 0x366   : > { %v7528_v28 = vpop.permute.xlu0 %7527  ;;  %14824 = vst [vmem:[#allocation33_spill] sm:$0xff] %v14246_v37  ;;  %v14250_v50 = vpop.eup %10898  ;;  %10928 = vrcp.f32 %v7398_v56 }
 0x367   : > { %7685 = vrot.lane.b32.xlu1 %v7610_v40, %s11054_s19  ;;  %7683 = vrot.lane.b32.xlu0 %v7609_v49, %s11054_s19  ;;  %v7611_v52 = vmul.f32 %v14242_v39, %v7528_v28  ;;  %14825 = vst [vmem:[#allocation3_spill] sm:$0xff] %v14250_v50  ;;  %v10901_v48 = vpop.eup %10900  ;;  %10930 = vrcp.f32 %v7397_v38 }
 0x368   : > { %v7530_v57 = vpop.permute.xlu1 %7529  ;;  %v10903_v15 = vpop.eup %10902  ;;  %v7400_v1 = vadd.f32 1.0, %v10901_v48 }
 0x369   : > { %v7612_v51 = vmul.f32 %v14238_v21, %v7530_v57  ;;  %v14254_v40 = vpop.eup %10904  ;;  %v7399_v33 = vadd.f32 1.0, %v10903_v15 }
 0x36a   : > { %v7532_v3 = vpop.permute.xlu0 %7531  ;;  %14826 = vst [vmem:[#allocation40_spill] sm:$0xff] %v14254_v40  ;;  %v14258_v57 = vpop.eup %10906  ;;  %10932 = vrcp.f32 %v7400_v1 }
 0x36b   : > { %7689 = vrot.lane.b32.xlu1 %v7612_v51, %s11054_s19  ;;  %7687 = vrot.lane.b32.xlu0 %v7611_v52, %s11054_s19  ;;  %v7613_v13 = vmul.f32 %v14250_v50, %v7532_v3  ;;  %14827 = vst [vmem:[#allocation37_spill] sm:$0xff] %v14258_v57  ;;  %v10909_v39 = vpop.eup %10908  ;;  %10934 = vrcp.f32 %v7399_v33 }
 0x36c   : > { %v7534_v49 = vpop.permute.xlu1 %7533  ;;  %v10911_v53 = vpop.eup %10910  ;;  %v7402_v56 = vadd.f32 1.0, %v10909_v39 }
 0x36d   : > { %v7614_v28 = vmul.f32 %v14246_v37, %v7534_v49  ;;  %v14262_v51 = vpop.eup %10912  ;;  %v7401_v38 = vadd.f32 1.0, %v10911_v53 }
 0x36e   : > { %v7536_v35 = vpop.permute.xlu0 %7535  ;;  %14828 = vst [vmem:[#allocation5_spill] sm:$0xff] %v14262_v51  ;;  %v14266_v50 = vpop.eup %10914  ;;  %10936 = vrcp.f32 %v7402_v56 }
 0x36f   : > { %7693 = vrot.lane.b32.xlu1 %v7614_v28, %s11054_s19  ;;  %7691 = vrot.lane.b32.xlu0 %v7613_v13, %s11054_s19  ;;  %v7615_v3 = vmul.f32 %v14258_v57, %v7536_v35  ;;  %14829 = vst [vmem:[#allocation44_spill] sm:$0xff] %v14266_v50  ;;  %v10917_v37 = vpop.eup %10916  ;;  %10938 = vrcp.f32 %v7401_v38 }
 0x370   : > { %v7538_v52 = vpop.permute.xlu1 %7537  ;;  %v10919_v15 = vpop.eup %10918  ;;  %v7404_v39 = vadd.f32 1.0, %v10917_v37 }
 0x371   : > { %v7616_v49 = vmul.f32 %v14254_v40, %v7538_v52  ;;  %v14270_v28 = vpop.eup %10920  ;;  %v7403_v33 = vadd.f32 1.0, %v10919_v15 }
 0x372   : > { %v7540_v48 = vpop.permute.xlu0 %7539  ;;  %v14274_v57 = vpop.eup %10922  ;;  %10940 = vrcp.f32 %v7404_v39 }
 0x373   : > { %7697 = vrot.lane.b32.xlu1 %v7616_v49, %s11054_s19  ;;  %7695 = vrot.lane.b32.xlu0 %v7615_v3, %s11054_s19  ;;  %v7617_v35 = vmul.f32 %v14266_v50, %v7540_v48  ;;  %v10925_v40 = vpop.eup %10924  ;;  %10942 = vrcp.f32 %v7403_v33 }
 0x374   : > { %v7542_v13 = vpop.permute.xlu1 %7541  ;;  %v10927_v53 = vpop.eup %10926 }
 0x375   : > { %v7618_v52 = vmul.f32 %v14262_v51, %v7542_v13  ;;  %v7406_v13 = vadd.f32 1.0, %v10925_v40  ;;  %v14280_v51 = vpop.eup %10928  ;;  %v7405_v37 = vadd.f32 1.0, %v10927_v53 }
 0x376   : > { %v7544_v1 = vpop.permute.xlu0 %7543  ;;  %v14284_v56 = vpop.eup %10930 }
 0x377   : > { %7701 = vrot.lane.b32.xlu1 %v7618_v52, %s11054_s19  ;;  %7699 = vrot.lane.b32.xlu0 %v7617_v35, %s11054_s19  ;;  %v7619_v49 = vmul.f32 %v14274_v57, %v7544_v1  ;;  %10944 = vrcp.f32 %v7406_v13  ;;  %v14288_v39 = vpop.eup %10932 }
 0x378   : > { %v7546_v3 = vpop.permute.xlu1 %7545  ;;  %10946 = vrcp.f32 %v7405_v37  ;;  %v14292_v40 = vpop.eup %10934 }
 0x379   : > { %v7620_v48 = vmul.f32 %v14270_v28, %v7546_v3  ;;  %14830 = vst [vmem:[#allocation41_spill] sm:$0xff] %v14292_v40 }
 0x37a   : > { %v7548_v50 = vpop.permute.xlu0 %7547 }
 0x37b   : > { %7705 = vrot.lane.b32.xlu1 %v7620_v48, %s11054_s19  ;;  %7703 = vrot.lane.b32.xlu0 %v7619_v49, %s11054_s19  ;;  %v7621_v15 = vmul.f32 %v14284_v56, %v7548_v50  ;;  %v14296_v50 = vpop.eup %10936 }
 0x37c   : > { %v7550_v38 = vpop.permute.xlu1 %7549  ;;  %v14300_v49 = vpop.eup %10938 }
 0x37d   : > { %v7622_v35 = vmul.f32 %v14280_v51, %v7550_v38  ;;  %14831 = vst [vmem:[#allocation7_spill] sm:$0xff] %v14300_v49 }
 0x37e   : > { %v7552_v52 = vpop.permute.xlu0 %7551 }
 0x37f   : > { %7709 = vrot.lane.b32.xlu1 %v7622_v35, %s11054_s19  ;;  %7707 = vrot.lane.b32.xlu0 %v7621_v15, %s11054_s19  ;;  %v7623_v33 = vmul.f32 %v14292_v40, %v7552_v52  ;;  %v14304_v15 = vpop.eup %10940 }
 0x380   : > { %v7554_v1 = vpop.permute.xlu1 %7553  ;;  %14832 = vst [vmem:[#allocation9_spill] sm:$0xff] %v14304_v15  ;;  %v14308_v35 = vpop.eup %10942 }
 0x381   : > { %v7624_v53 = vmul.f32 %v14288_v39, %v7554_v1  ;;  %14833 = vst [vmem:[#allocation45_spill] sm:$0xff] %v14308_v35 }
 0x382   : > { %v7556_v3 = vpop.permute.xlu0 %7555 }
 0x383   : > { %7713 = vrot.lane.b32.xlu1 %v7624_v53, %s11054_s19  ;;  %7711 = vrot.lane.b32.xlu0 %v7623_v33, %s11054_s19  ;;  %v7625_v13 = vmul.f32 %v14300_v49, %v7556_v3 }
 0x384   : > { %v7558_v48 = vpop.permute.xlu1 %7557  ;;  %v14312_v40 = vpop.eup %10944 }
 0x385   : > { %v7626_v37 = vmul.f32 %v14296_v50, %v7558_v48  ;;  %v14316_v3 = vpop.eup %10946 }
 0x386   : > { %v7560_v38 = vpop.permute.xlu0 %7559  ;;  %14834 = vst [vmem:[#allocation46_spill] sm:$0xff] %v14316_v3 }
 0x387   : > { %7717 = vrot.lane.b32.xlu1 %v7626_v37, %s11054_s19  ;;  %7715 = vrot.lane.b32.xlu0 %v7625_v13, %s11054_s19  ;;  %v7627_v1 = vmul.f32 %v14308_v35, %v7560_v38 }
 0x388   : > { %v7562_v52 = vpop.permute.xlu1 %7561 }
 0x389   : > { %v7628_v33 = vmul.f32 %v14304_v15, %v7562_v52 }
 0x38a   : > { %v7564_v53 = vpop.permute.xlu0 %7563 }
 0x38b   : > { %7721 = vrot.lane.b32.xlu1 %v7628_v33, %s11054_s19  ;;  %7719 = vrot.lane.b32.xlu0 %v7627_v1, %s11054_s19  ;;  %v7629_v37 = vmul.f32 %v14316_v3, %v7564_v53 }
 0x38c   : > { %v7566_v48 = vpop.permute.xlu1 %7565 }
 0x38d   : > { %v7630_v13 = vmul.f32 %v14312_v40, %v7566_v48 }
 0x38f   : > { %7725 = vrot.lane.b32.xlu1 %v7630_v13, %s11054_s19  ;;  %7723 = vrot.lane.b32.xlu0 %v7629_v37, %s11054_s19 }
 0x3c1   : > { %v7666_v38 = vpop.permute.xlu1 %7665 }
 0x3c2   : > { %v7760_v52 = vadd.f32 %v7666_v38, %v14012_v45 }
 0x3c4   : > { %10948 = vtanh.f32 %v7760_v52 }
 0x3c5   : > { %v7664_v35 = vpop.permute.xlu0 %7663  ;;  %v7670_v15 = vpop.permute.xlu1 %7669 }
 0x3c6   : > { %v7759_v33 = vadd.f32 %v7664_v35, %v14018_v2  ;;  %v7762_v1 = vadd.f32 %v7670_v15, %v14022_v60 }
 0x3c8   : > { %10950 = vtanh.f32 %v7759_v33 }
 0x3c9   : > { %10952 = vtanh.f32 %v7762_v1  ;;  %v7668_v49 = vpop.permute.xlu0 %7667 }
 0x3ca   : > { %v7761_v53 = vadd.f32 %v7668_v49, %v14030_v61 }
 0x3cc   : > { %10954 = vtanh.f32 %v7761_v53 }
 0x3cd   : > { %v7674_v48 = vpop.permute.xlu1 %7673  ;;  %v7672_v13 = vpop.permute.xlu0 %7671 }
 0x3ce   : > { %v7764_v37 = vadd.f32 %v7674_v48, %v14036_v16  ;;  %v7763_v3 = vadd.f32 %v7672_v13, %v14040_v20 }
 0x3d0   : > { %10956 = vtanh.f32 %v7764_v37 }
 0x3d1   : > { %v10949_v45 = vpop.eup %10948  ;;  %10958 = vtanh.f32 %v7763_v3  ;;  %v7678_v38 = vpop.permute.xlu1 %7677 }
 0x3d2   : > { %v7676_v52 = vpop.permute.xlu0 %7675  ;;  %7889 = vrot.lane.b32.xlu1 %v10949_v45, %s11055_s20  ;;  %v7766_v2 = vadd.f32 %v7678_v38, %v14048_v55 }
 0x3d3   : > { %v7765_v60 = vadd.f32 %v7676_v52, %v14052_v59 }
 0x3d4   : > { %10960 = vtanh.f32 %v7766_v2 }
 0x3d5   : > { %v10951_v61 = vpop.eup %10950  ;;  %10962 = vtanh.f32 %v7765_v60  ;;  %v7682_v15 = vpop.permute.xlu1 %7681 }
 0x3d6   : > { %v10953_v49 = vpop.eup %10952  ;;  %v7680_v16 = vpop.permute.xlu0 %7679  ;;  %7887 = vrot.lane.b32.xlu0 %v10951_v61, %s11055_s20  ;;  %v7768_v20 = vadd.f32 %v7682_v15, %v14060_v30 }
 0x3d7   : > { %v7767_v35 = vadd.f32 %v7680_v16, %v14064_v0  ;;  %7893 = vrot.lane.b32.xlu1 %v10953_v49, %s11055_s20 }
 0x3d8   : > { %10964 = vtanh.f32 %v7768_v20 }
 0x3d9   : > { %v10955_v3 = vpop.eup %10954  ;;  %10966 = vtanh.f32 %v7767_v35  ;;  %v7686_v55 = vpop.permute.xlu1 %7685 }
 0x3da   : > { %v7684_v33 = vpop.permute.xlu0 %7683  ;;  %v7770_v59 = vadd.f32 %v7686_v55, %v14070_v31  ;;  %7891 = vrot.lane.b32.xlu0 %v10955_v3, %s11055_s20 }
 0x3db   : > { %v7769_v1 = vadd.f32 %v7684_v33, %v14076_v11 }
 0x3dc   : > { %10968 = vtanh.f32 %v7770_v59 }
 0x3dd   : > { %v10957_v53 = vpop.eup %10956  ;;  %10970 = vtanh.f32 %v7769_v1  ;;  %v7690_v48 = vpop.permute.xlu1 %7689 }
 0x3de   : > { %v7688_v30 = vpop.permute.xlu0 %7687  ;;  %v10959_v13 = vpop.eup %10958  ;;  %v7772_v0 = vadd.f32 %v7690_v48, %v14082_v12  ;;  %7897 = vrot.lane.b32.xlu1 %v10957_v53, %s11055_s20 }
 0x3df   : > { %v7771_v37 = vadd.f32 %v7688_v30, %v14086_v26  ;;  %7895 = vrot.lane.b32.xlu0 %v10959_v13, %s11055_s20 }
 0x3e0   : > { %10972 = vtanh.f32 %v7772_v0 }
 0x3e1   : > { %v10961_v31 = vpop.eup %10960  ;;  %10974 = vtanh.f32 %v7771_v37  ;;  %v7694_v11 = vpop.permute.xlu1 %7693 }
 0x3e2   : > { %v7692_v45 = vpop.permute.xlu0 %7691  ;;  %v10963_v38 = vpop.eup %10962  ;;  %v7774_v52 = vadd.f32 %v7694_v11, %v14096_v24  ;;  %7901 = vrot.lane.b32.xlu1 %v10961_v31, %s11055_s20 }
 0x3e3   : > { %v7773_v2 = vadd.f32 %v7692_v45, %v14100_v17  ;;  %7899 = vrot.lane.b32.xlu0 %v10963_v38, %s11055_s20 }
 0x3e4   : > { %10976 = vtanh.f32 %v7774_v52 }
 0x3e5   : > { %v10965_v12 = vpop.eup %10964  ;;  %10978 = vtanh.f32 %v7773_v2  ;;  %v7698_v26 = vpop.permute.xlu1 %7697 }
 0x3e6   : > { %v7696_v60 = vpop.permute.xlu0 %7695  ;;  %v10967_v61 = vpop.eup %10966  ;;  %v7776_v49 = vadd.f32 %v7698_v26, %v14108_v58  ;;  %7905 = vrot.lane.b32.xlu1 %v10965_v12, %s11055_s20 }
 0x3e7   : > { %v7775_v15 = vadd.f32 %v7696_v60, %v14112_v42  ;;  %7903 = vrot.lane.b32.xlu0 %v10967_v61, %s11055_s20 }
 0x3e8   : > { %10980 = vtanh.f32 %v7776_v49 }
 0x3e9   : > { %v10969_v24 = vpop.eup %10968  ;;  %10982 = vtanh.f32 %v7775_v15  ;;  %v7702_v17 = vpop.permute.xlu1 %7701 }
 0x3ea   : > { %v7700_v16 = vpop.permute.xlu0 %7699  ;;  %v10971_v20 = vpop.eup %10970  ;;  %v7778_v35 = vadd.f32 %v7702_v17, %v14120_v44  ;;  %7909 = vrot.lane.b32.xlu1 %v10969_v24, %s11055_s20 }
 0x3eb   : > { %v7777_v3 = vadd.f32 %v7700_v16, %v14124_v41  ;;  %7907 = vrot.lane.b32.xlu0 %v10971_v20, %s11055_s20 }
 0x3ec   : > { %10984 = vtanh.f32 %v7778_v35 }
 0x3ed   : > { %v10973_v58 = vpop.eup %10972  ;;  %10986 = vtanh.f32 %v7777_v3  ;;  %v7706_v42 = vpop.permute.xlu1 %7705 }
 0x3ee   : > { %v7704_v55 = vpop.permute.xlu0 %7703  ;;  %v10975_v33 = vpop.eup %10974  ;;  %v7780_v59 = vadd.f32 %v7706_v42, %v14134_v19  ;;  %7913 = vrot.lane.b32.xlu1 %v10973_v58, %s11055_s20  ;;  %v7824_v58 = vsub.f32 1.0, %v14130_v6 }
 0x3ef   : > { %v7779_v1 = vadd.f32 %v7704_v55, %v14138_v63  ;;  %7911 = vrot.lane.b32.xlu0 %v10975_v33, %s11055_s20  ;;  %v11013_v55 = vld [vmem:[%s12053_s15 + $0x21] sm:$0xff] }
 0x3f0   : > { %10988 = vtanh.f32 %v7780_v59  ;;  %v8016_v33 = vmul.f32 %v11013_v55, %v14130_v6  ;;  %v11014_v6 = vld [vmem:[%s12053_s15 + $0x19] sm:$0xff] }
 0x3f1   : > { %v10977_v44 = vpop.eup %10976  ;;  %10990 = vtanh.f32 %v7779_v1  ;;  %v7710_v41 = vpop.permute.xlu1 %7709 }
 0x3f2   : > { %v7708_v53 = vpop.permute.xlu0 %7707  ;;  %v10979_v48 = vpop.eup %10978  ;;  %v7782_v30 = vadd.f32 %v7710_v41, %v14152_v4  ;;  %7917 = vrot.lane.b32.xlu1 %v10977_v44, %s11055_s20  ;;  %v7823_v44 = vsub.f32 1.0, %v14143_v47  ;;  %v7826_v41 = vsub.f32 1.0, %v14148_v32 }
 0x3f3   : > { %v7781_v13 = vadd.f32 %v7708_v53, %v14157_v36  ;;  %7915 = vrot.lane.b32.xlu0 %v10979_v48, %s11055_s20 }
 0x3f4   : > { %10992 = vtanh.f32 %v7782_v30  ;;  %v8015_v30 = vmul.f32 %v11014_v6, %v14143_v47  ;;  %v7833_v6 = vsub.f32 1.0, %v14236_v22 }
 0x3f5   : > { %v10981_v19 = vpop.eup %10980  ;;  %10994 = vtanh.f32 %v7781_v13  ;;  %v7714_v63 = vpop.permute.xlu1 %7713 }
 0x3f6   : > { %v7712_v0 = vpop.permute.xlu0 %7711  ;;  %v10983_v37 = vpop.eup %10982  ;;  %v7784_v31 = vadd.f32 %v7714_v63, %v14170_v29  ;;  %7921 = vrot.lane.b32.xlu1 %v10981_v19, %s11055_s20  ;;  %v11015_v19 = vld [vmem:[%s12053_s15 + $0x39] sm:$0xff] }
 0x3f7   : > { %v7783_v11 = vadd.f32 %v7712_v0, %v14174_v8  ;;  %7919 = vrot.lane.b32.xlu0 %v10983_v37, %s11055_s20  ;;  %v8018_v63 = vmul.f32 %v11015_v19, %v14148_v32 }
 0x3f8   : > { %10996 = vtanh.f32 %v7784_v31 }
 0x3f9   : > { %v10985_v4 = vpop.eup %10984  ;;  %10998 = vtanh.f32 %v7783_v11  ;;  %v7718_v36 = vpop.permute.xlu1 %7717  ;;  %v7825_v11 = vsub.f32 1.0, %v14166_v46 }
 0x3fa   : > { %v7716_v45 = vpop.permute.xlu0 %7715  ;;  %v10987_v38 = vpop.eup %10986  ;;  %v7786_v52 = vadd.f32 %v7718_v36, %v14188_v43  ;;  %7925 = vrot.lane.b32.xlu1 %v10985_v4, %s11055_s20  ;;  %v11016_v36 = vld [vmem:[%s12053_s15 + $0x31] sm:$0xff] }
 0x3fb   : > { %v7785_v2 = vadd.f32 %v7716_v45, %v14192_v7  ;;  %7923 = vrot.lane.b32.xlu0 %v10987_v38, %s11055_s20  ;;  %v8017_v47 = vmul.f32 %v11016_v36, %v14166_v46  ;;  %v14835_v36 = vld [vmem:[#allocation35_spill] sm:$0xff] }
 0x3fc   : > { %11000 = vtanh.f32 %v7786_v52  ;;  %v7828_v52 = vsub.f32 1.0, %v14179_v25 }
 0x3fd   : > { %v10989_v29 = vpop.eup %10988  ;;  %11002 = vtanh.f32 %v7785_v2  ;;  %v7722_v8 = vpop.permute.xlu1 %7721  ;;  %v7827_v2 = vsub.f32 1.0, %v14184_v62 }
 0x3fe   : > { %v7720_v12 = vpop.permute.xlu0 %7719  ;;  %v10991_v26 = vpop.eup %10990  ;;  %v7788_v60 = vadd.f32 %v7722_v8, %v14208_v23  ;;  %7929 = vrot.lane.b32.xlu1 %v10989_v29, %s11055_s20  ;;  %v11017_v29 = vld [vmem:[%s12053_s15 + $0x51] sm:$0xff] }
 0x3ff   : > { %v7787_v61 = vadd.f32 %v7720_v12, %v14212_v14  ;;  %7927 = vrot.lane.b32.xlu0 %v10991_v26, %s11055_s20  ;;  %v8020_v8 = vmul.f32 %v11017_v29, %v14179_v25  ;;  %v11019_v25 = vld [vmem:[%s12053_s15 + $0x69] sm:$0xff] }
 0x400   : > { %11004 = vtanh.f32 %v7788_v60  ;;  %v11018_v60 = vld [vmem:[%s12053_s15 + $0x49] sm:$0xff] }
 0x401   : > { %v10993_v43 = vpop.eup %10992  ;;  %11006 = vtanh.f32 %v7787_v61  ;;  %v7726_v7 = vpop.permute.xlu1 %7725  ;;  %v8019_v46 = vmul.f32 %v11018_v60, %v14184_v62  ;;  %v11020_v62 = vld [vmem:[%s12053_s15 + $0x61] sm:$0xff] }
 0x402   : > { %v7724_v49 = vpop.permute.xlu0 %7723  ;;  %v10995_v15 = vpop.eup %10994  ;;  %v7790_v24 = vadd.f32 %v7726_v7, %v14821_v18  ;;  %7933 = vrot.lane.b32.xlu1 %v10993_v43, %s11055_s20  ;;  %v7830_v7 = vsub.f32 1.0, %v14198_v27 }
 0x403   : > { %v7789_v17 = vadd.f32 %v7724_v49, %v14822_v9  ;;  %7931 = vrot.lane.b32.xlu0 %v10995_v15, %s11055_s20 }
 0x404   : > { %11008 = vtanh.f32 %v7790_v24  ;;  %v7829_v24 = vsub.f32 1.0, %v14204_v10 }
 0x405   : > { %v10997_v23 = vpop.eup %10996  ;;  %11010 = vtanh.f32 %v7789_v17  ;;  %v8022_v17 = vmul.f32 %v11019_v25, %v14198_v27  ;;  %v11021_v27 = vld [vmem:[%s12053_s15 + $0x81] sm:$0xff] }
 0x406   : > { %v10999_v14 = vpop.eup %10998  ;;  %7937 = vrot.lane.b32.xlu1 %v10997_v23, %s11055_s20 }
 0x407   : > { %7935 = vrot.lane.b32.xlu0 %v10999_v14, %s11055_s20 }
 0x409   : > { %v11001_v16 = vpop.eup %11000 }
 0x40a   : > { %v11003_v20 = vpop.eup %11002  ;;  %7941 = vrot.lane.b32.xlu1 %v11001_v16, %s11055_s20  ;;  %v8021_v16 = vmul.f32 %v11020_v62, %v14204_v10  ;;  %v11022_v10 = vld [vmem:[%s12053_s15 + $0x79] sm:$0xff] }
 0x40b   : > { %7939 = vrot.lane.b32.xlu0 %v11003_v20, %s11055_s20 }
 0x40d   : > { %v11005_v18 = vpop.eup %11004 }
 0x40e   : > { %v11007_v9 = vpop.eup %11006  ;;  %7945 = vrot.lane.b32.xlu1 %v11005_v18, %s11055_s20 }
 0x40f   : > { %7943 = vrot.lane.b32.xlu0 %v11007_v9, %s11055_s20  ;;  %v7832_v9 = vsub.f32 1.0, %v14218_v34 }
 0x411   : > { %v11009_v35 = vpop.eup %11008 }
 0x412   : > { %v11011_v3 = vpop.eup %11010  ;;  %7949 = vrot.lane.b32.xlu1 %v11009_v35, %s11055_s20 }
 0x413   : > { %7947 = vrot.lane.b32.xlu0 %v11011_v3, %s11055_s20 }
 0x444   : > { %v7890_v42 = vpop.permute.xlu1 %7889 }
 0x445   : > { %v7984_v59 = vmul.f32 %v7890_v42, %v7824_v58  ;;  %v7831_v58 = vsub.f32 1.0, %v14224_v54  ;;  %v8024_v42 = vmul.f32 %v11021_v27, %v14218_v34  ;;  %v11023_v34 = vld [vmem:[%s12053_s15 + $0x99] sm:$0xff] }
 0x446   : > { %v11030_v27 = vld [vmem:[%s12053_s15 + $0xd9] sm:$0xff] }
 0x447   : > { %v8048_v1 = vadd.f32 %v8016_v33, %v7984_v59  ;;  %v8023_v59 = vmul.f32 %v11022_v10, %v14224_v54  ;;  %v11024_v54 = vld [vmem:[%s12053_s15 + $0x91] sm:$0xff] }
 0x448   : > { %v7888_v53 = vpop.permute.xlu0 %7887  ;;  %v14840_v10 = vld [vmem:[#allocation5_spill] sm:$0xff] }
 0x449   : > { %8080 = vst.msk [vmem:[%s14393_s26 + $0x8] sm:$0xff] %vm3794_vm2, %v8048_v1  ;;  %v7894_v48 = vpop.permute.xlu1 %7893  ;;  %v7983_v13 = vmul.f32 %v7888_v53, %v7823_v44 }
 0x44a   : > { %v7986_v0 = vmul.f32 %v7894_v48, %v7826_v41  ;;  %v7834_v41 = vsub.f32 1.0, %v14230_v5 }
 0x44b   : > { %v8047_v37 = vadd.f32 %v8015_v30, %v7983_v13  ;;  %v8026_v30 = vmul.f32 %v11023_v34, %v14230_v5  ;;  %v11025_v5 = vld [vmem:[%s12053_s15 + $0xb1] sm:$0xff] }
 0x44c   : > { %v8050_v31 = vadd.f32 %v8018_v63, %v7986_v0  ;;  %v7892_v4 = vpop.permute.xlu0 %7891  ;;  %v8025_v63 = vmul.f32 %v11024_v54, %v14236_v22  ;;  %v11026_v22 = vld [vmem:[%s12053_s15 + $0xa9] sm:$0xff] }
 0x44d   : > { %8079 = vst.msk [vmem:[%s14393_s26] sm:$0xff] %vm3794_vm2, %v8047_v37  ;;  %v7985_v45 = vmul.f32 %v7892_v4, %v7825_v11 }
 0x44e   : > { %8082 = vst.msk [vmem:[%s14393_s26 + $0x18] sm:$0xff] %vm3794_vm2, %v8050_v31  ;;  %v7836_v31 = vsub.f32 1.0, %v14238_v21 }
 0x44f   : > { %v8049_v38 = vadd.f32 %v8017_v47, %v7985_v45  ;;  %v7835_v47 = vsub.f32 1.0, %v14835_v36  ;;  %v8028_v45 = vmul.f32 %v11025_v5, %v14238_v21  ;;  %v11027_v21 = vld [vmem:[%s12053_s15 + $0xc9] sm:$0xff] }
 0x450   : > { %v7898_v32 = vpop.permute.xlu1 %7897 }
 0x451   : > { %8081 = vst.msk [vmem:[%s14393_s26 + $0x10] sm:$0xff] %vm3794_vm2, %v8049_v38  ;;  %v7988_v12 = vmul.f32 %v7898_v32, %v7828_v52  ;;  %v7896_v26 = vpop.permute.xlu0 %7895  ;;  %v8027_v32 = vmul.f32 %v11026_v22, %v14835_v36 }
 0x452   : > { %v7987_v61 = vmul.f32 %v7896_v26, %v7827_v2 }
 0x453   : > { %v8052_v43 = vadd.f32 %v8020_v8, %v7988_v12  ;;  %v14836_v8 = vld [vmem:[#allocation33_spill] sm:$0xff] }
 0x454   : > { %v8051_v49 = vadd.f32 %v8019_v46, %v7987_v61  ;;  %v7902_v15 = vpop.permute.xlu1 %7901  ;;  %v7838_v12 = vsub.f32 1.0, %v14836_v8  ;;  %v14837_v46 = vld [vmem:[#allocation3_spill] sm:$0xff] }
 0x455   : > { %8084 = vst.msk [vmem:[%s14393_s26 + $0x28] sm:$0xff] %vm3794_vm2, %v8052_v43  ;;  %v7990_v23 = vmul.f32 %v7902_v15, %v7830_v7  ;;  %v7900_v14 = vpop.permute.xlu0 %7899  ;;  %v7837_v61 = vsub.f32 1.0, %v14837_v46  ;;  %v8030_v43 = vmul.f32 %v11027_v21, %v14836_v8  ;;  %v11028_v15 = vld [vmem:[%s12053_s15 + $0xc1] sm:$0xff]  ;;  %v7845_v8 = vsub.f32 1.0, %v14284_v56 }
 0x456   : > { %8083 = vst.msk [vmem:[%s14393_s26 + $0x20] sm:$0xff] %vm3794_vm2, %v8051_v49  ;;  %v7989_v20 = vmul.f32 %v7900_v14, %v7829_v24  ;;  %v8029_v24 = vmul.f32 %v11028_v15, %v14837_v46  ;;  %v14842_v15 = vld [vmem:[#allocation41_spill] sm:$0xff] }
 0x457   : > { %v8054_v18 = vadd.f32 %v8022_v17, %v7990_v23  ;;  %v14838_v23 = vld [vmem:[#allocation40_spill] sm:$0xff] }
 0x458   : > { %v8053_v35 = vadd.f32 %v8021_v16, %v7989_v20  ;;  %v7906_v3 = vpop.permute.xlu1 %7905  ;;  %v7840_v14 = vsub.f32 1.0, %v14838_v23  ;;  %v14839_v20 = vld [vmem:[#allocation37_spill] sm:$0xff] }
 0x459   : > { %8086 = vst.msk [vmem:[%s14393_s26 + $0x38] sm:$0xff] %vm3794_vm2, %v8054_v18  ;;  %v7992_v55 = vmul.f32 %v7906_v3, %v7832_v9  ;;  %v7904_v33 = vpop.permute.xlu0 %7903  ;;  %v7839_v18 = vsub.f32 1.0, %v14839_v20  ;;  %v11029_v9 = vld [vmem:[%s12053_s15 + $0xe1] sm:$0xff] }
 0x45a   : > { %8085 = vst.msk [vmem:[%s14393_s26 + $0x30] sm:$0xff] %vm3794_vm2, %v8053_v35  ;;  %v7991_v1 = vmul.f32 %v7904_v33, %v7831_v58  ;;  %v8032_v35 = vmul.f32 %v11029_v9, %v14838_v23 }
 0x45b   : > { %v8056_v44 = vadd.f32 %v8024_v42, %v7992_v55  ;;  %v8031_v42 = vmul.f32 %v11030_v27, %v14839_v20  ;;  %v7850_v20 = vsub.f32 1.0, %v14296_v50 }
 0x45c   : > { %v8055_v53 = vadd.f32 %v8023_v59, %v7991_v1  ;;  %v7910_v48 = vpop.permute.xlu1 %7909  ;;  %v7842_v59 = vsub.f32 1.0, %v14840_v10 }
 0x45d   : > { %8088 = vst.msk [vmem:[%s14393_s26 + $0x48] sm:$0xff] %vm3794_vm2, %v8056_v44  ;;  %v7994_v13 = vmul.f32 %v7910_v48, %v7834_v41  ;;  %v7908_v19 = vpop.permute.xlu0 %7907  ;;  %v14841_v41 = vld [vmem:[#allocation44_spill] sm:$0xff]  ;;  %v11031_v48 = vld [vmem:[%s12053_s15 + $0xf9] sm:$0xff] }
 0x45e   : > { %8087 = vst.msk [vmem:[%s14393_s26 + $0x40] sm:$0xff] %vm3794_vm2, %v8055_v53  ;;  %v7993_v0 = vmul.f32 %v7908_v19, %v7833_v6  ;;  %v7841_v53 = vsub.f32 1.0, %v14841_v41  ;;  %v8034_v6 = vmul.f32 %v11031_v48, %v14840_v10  ;;  %v14845_v48 = vld [vmem:[#allocation45_spill] sm:$0xff] }
 0x45f   : > { %v8058_v37 = vadd.f32 %v8026_v30, %v7994_v13  ;;  %v11032_v13 = vld [vmem:[%s12053_s15 + $0xf1] sm:$0xff] }
 0x460   : > { %v8057_v11 = vadd.f32 %v8025_v63, %v7993_v0  ;;  %v7914_v4 = vpop.permute.xlu1 %7913  ;;  %v8033_v19 = vmul.f32 %v11032_v13, %v14841_v41  ;;  %v7844_v0 = vsub.f32 1.0, %v14270_v28 }
 0x461   : > { %8090 = vst.msk [vmem:[%s14393_s26 + $0x58] sm:$0xff] %vm3794_vm2, %v8058_v37  ;;  %v7996_v38 = vmul.f32 %v7914_v4, %v7836_v31  ;;  %v7912_v52 = vpop.permute.xlu0 %7911  ;;  %v11033_v4 = vld [vmem:[%s12053_s15 + $0x111] sm:$0xff] }
 0x462   : > { %8089 = vst.msk [vmem:[%s14393_s26 + $0x50] sm:$0xff] %vm3794_vm2, %v8057_v11  ;;  %v7995_v2 = vmul.f32 %v7912_v52, %v7835_v47  ;;  %v7843_v11 = vsub.f32 1.0, %v14274_v57  ;;  %v8036_v36 = vmul.f32 %v11033_v4, %v14270_v28  ;;  %v11035_v28 = vld [vmem:[%s12053_s15 + $0x129] sm:$0xff]  ;;  %v14846_v4 = vld [vmem:[#allocation46_spill] sm:$0xff] }
 0x463   : > { %v8060_v29 = vadd.f32 %v8028_v45, %v7996_v38  ;;  %v11034_v45 = vld [vmem:[%s12053_s15 + $0x109] sm:$0xff] }
 0x464   : > { %v8059_v26 = vadd.f32 %v8027_v32, %v7995_v2  ;;  %v7918_v60 = vpop.permute.xlu1 %7917  ;;  %v8035_v38 = vmul.f32 %v11034_v45, %v14274_v57  ;;  %v7846_v32 = vsub.f32 1.0, %v14280_v51  ;;  %v11036_v57 = vld [vmem:[%s12053_s15 + $0x121] sm:$0xff] }
 0x465   : > { %8092 = vst.msk [vmem:[%s14393_s26 + $0x68] sm:$0xff] %vm3794_vm2, %v8060_v29  ;;  %v7998_v7 = vmul.f32 %v7918_v60, %v7838_v12  ;;  %v7916_v49 = vpop.permute.xlu0 %7915  ;;  %v8038_v12 = vmul.f32 %v11035_v28, %v14280_v51  ;;  %v8037_v46 = vmul.f32 %v11036_v57, %v14284_v56  ;;  %v11037_v51 = vld [vmem:[%s12053_s15 + $0x141] sm:$0xff]  ;;  %v11038_v56 = vld [vmem:[%s12053_s15 + $0x139] sm:$0xff] }
 0x466   : > { %8091 = vst.msk [vmem:[%s14393_s26 + $0x60] sm:$0xff] %vm3794_vm2, %v8059_v26  ;;  %v7997_v25 = vmul.f32 %v7916_v49, %v7837_v61 }
 0x467   : > { %v8062_v17 = vadd.f32 %v8030_v43, %v7998_v7  ;;  %v7848_v43 = vsub.f32 1.0, %v14288_v39 }
 0x468   : > { %v8061_v62 = vadd.f32 %v8029_v24, %v7997_v25  ;;  %v7922_v16 = vpop.permute.xlu1 %7921  ;;  %v7847_v24 = vsub.f32 1.0, %v14842_v15  ;;  %v8040_v25 = vmul.f32 %v11037_v51, %v14288_v39  ;;  %v11039_v39 = vld [vmem:[%s12053_s15 + $0x159] sm:$0xff] }
 0x469   : > { %8094 = vst.msk [vmem:[%s14393_s26 + $0x78] sm:$0xff] %vm3794_vm2, %v8062_v17  ;;  %v8000_v3 = vmul.f32 %v7922_v16, %v7840_v14  ;;  %v7920_v58 = vpop.permute.xlu0 %7919  ;;  %v8039_v14 = vmul.f32 %v11038_v56, %v14842_v15 }
 0x46a   : > { %8093 = vst.msk [vmem:[%s14393_s26 + $0x70] sm:$0xff] %vm3794_vm2, %v8061_v62  ;;  %v7999_v55 = vmul.f32 %v7920_v58, %v7839_v18  ;;  %v8042_v58 = vmul.f32 %v11039_v39, %v14296_v50  ;;  %v11041_v50 = vld [vmem:[%s12053_s15 + $0x171] sm:$0xff] }
 0x46b   : > { %v8064_v33 = vadd.f32 %v8032_v35, %v8000_v3  ;;  %v14843_v35 = vld [vmem:[#allocation7_spill] sm:$0xff] }
 0x46c   : > { %v8063_v1 = vadd.f32 %v8031_v42, %v7999_v55  ;;  %v7926_v44 = vpop.permute.xlu1 %7925  ;;  %v7849_v3 = vsub.f32 1.0, %v14843_v35  ;;  %v11040_v55 = vld [vmem:[%s12053_s15 + $0x151] sm:$0xff] }
 0x46d   : > { %8096 = vst.msk [vmem:[%s14393_s26 + $0x88] sm:$0xff] %vm3794_vm2, %v8064_v33  ;;  %v8002_v34 = vmul.f32 %v7926_v44, %v7842_v59  ;;  %v7924_v30 = vpop.permute.xlu0 %7923  ;;  %v8041_v33 = vmul.f32 %v11040_v55, %v14843_v35 }
 0x46e   : > { %8095 = vst.msk [vmem:[%s14393_s26 + $0x80] sm:$0xff] %vm3794_vm2, %v8063_v1  ;;  %v8001_v54 = vmul.f32 %v7924_v30, %v7841_v53  ;;  %v14844_v1 = vld [vmem:[#allocation9_spill] sm:$0xff] }
 0x46f   : > { %v8066_v63 = vadd.f32 %v8034_v6, %v8002_v34  ;;  %v7852_v44 = vsub.f32 1.0, %v14844_v1  ;;  %v7851_v6 = vsub.f32 1.0, %v14845_v48  ;;  %v8044_v34 = vmul.f32 %v11041_v50, %v14844_v1 }
 0x470   : > { %v8065_v37 = vadd.f32 %v8033_v19, %v8001_v54  ;;  %v7930_v31 = vpop.permute.xlu1 %7929  ;;  %v11042_v19 = vld [vmem:[%s12053_s15 + $0x169] sm:$0xff] }
 0x471   : > { %8098 = vst.msk [vmem:[%s14393_s26 + $0x98] sm:$0xff] %vm3794_vm2, %v8066_v63  ;;  %v8004_v47 = vmul.f32 %v7930_v31, %v7844_v0  ;;  %v7928_v5 = vpop.permute.xlu0 %7927  ;;  %v8043_v54 = vmul.f32 %v11042_v19, %v14845_v48 }
 0x472   : > { %8097 = vst.msk [vmem:[%s14393_s26 + $0x90] sm:$0xff] %vm3794_vm2, %v8065_v37  ;;  %v8003_v52 = vmul.f32 %v7928_v5, %v7843_v11  ;;  %v7854_v37 = vsub.f32 1.0, %v14312_v40 }
 0x473   : > { %v8068_v22 = vadd.f32 %v8036_v36, %v8004_v47  ;;  %v7853_v36 = vsub.f32 1.0, %v14846_v4  ;;  %v11043_v47 = vld [vmem:[%s12053_s15 + $0x189] sm:$0xff] }
 0x474   : > { %v8067_v2 = vadd.f32 %v8035_v38, %v8003_v52  ;;  %v7934_v29 = vpop.permute.xlu1 %7933  ;;  %v8046_v5 = vmul.f32 %v11043_v47, %v14312_v40  ;;  %v11044_v52 = vld [vmem:[%s12053_s15 + $0x181] sm:$0xff] }
 0x475   : > { %8100 = vst.msk [vmem:[%s14393_s26 + $0xa8] sm:$0xff] %vm3794_vm2, %v8068_v22  ;;  %v8006_v26 = vmul.f32 %v7934_v29, %v7846_v32  ;;  %v7932_v60 = vpop.permute.xlu0 %7931  ;;  %v8045_v22 = vmul.f32 %v11044_v52, %v14846_v4 }
 0x476   : > { %8099 = vst.msk [vmem:[%s14393_s26 + $0xa0] sm:$0xff] %vm3794_vm2, %v8067_v2  ;;  %v8005_v61 = vmul.f32 %v7932_v60, %v7845_v8 }
 0x477   : > { %v8070_v21 = vadd.f32 %v8038_v12, %v8006_v26 }
 0x478   : > { %v8069_v7 = vadd.f32 %v8037_v46, %v8005_v61  ;;  %v7938_v49 = vpop.permute.xlu1 %7937 }
 0x479   : > { %8102 = vst.msk [vmem:[%s14393_s26 + $0xb8] sm:$0xff] %vm3794_vm2, %v8070_v21  ;;  %v8008_v17 = vmul.f32 %v7938_v49, %v7848_v43  ;;  %v7936_v23 = vpop.permute.xlu0 %7935 }
 0x47a   : > { %8101 = vst.msk [vmem:[%s14393_s26 + $0xb0] sm:$0xff] %vm3794_vm2, %v8069_v7  ;;  %v8007_v62 = vmul.f32 %v7936_v23, %v7847_v24 }
 0x47b   : > { %v8072_v16 = vadd.f32 %v8040_v25, %v8008_v17 }
 0x47c   : > { %v8071_v18 = vadd.f32 %v8039_v14, %v8007_v62  ;;  %v7942_v9 = vpop.permute.xlu1 %7941 }
 0x47d   : > { %8104 = vst.msk [vmem:[%s14393_s26 + $0xc8] sm:$0xff] %vm3794_vm2, %v8072_v16  ;;  %v8010_v27 = vmul.f32 %v7942_v9, %v7850_v20  ;;  %v7940_v42 = vpop.permute.xlu0 %7939 }
 0x47e   : > { %8103 = vst.msk [vmem:[%s14393_s26 + $0xc0] sm:$0xff] %vm3794_vm2, %v8071_v18  ;;  %v8009_v10 = vmul.f32 %v7940_v42, %v7849_v3 }
 0x47f   : > { %v8074_v59 = vadd.f32 %v8042_v58, %v8010_v27 }
 0x480   : > { %v8073_v41 = vadd.f32 %v8041_v33, %v8009_v10  ;;  %v7946_v53 = vpop.permute.xlu1 %7945 }
 0x481   : > { %8106 = vst.msk [vmem:[%s14393_s26 + $0xd8] sm:$0xff] %vm3794_vm2, %v8074_v59  ;;  %v8012_v30 = vmul.f32 %v7946_v53, %v7852_v44  ;;  %v7944_v13 = vpop.permute.xlu0 %7943 }
 0x482   : > { %8105 = vst.msk [vmem:[%s14393_s26 + $0xd0] sm:$0xff] %vm3794_vm2, %v8073_v41  ;;  %v8011_v63 = vmul.f32 %v7944_v13, %v7851_v6 }
 0x483   : > { %v8076_v0 = vadd.f32 %v8044_v34, %v8012_v30 }
 0x484   : > { %v8075_v31 = vadd.f32 %v8043_v54, %v8011_v63  ;;  %v7950_v11 = vpop.permute.xlu1 %7949 }
 0x485   : > { %8108 = vst.msk [vmem:[%s14393_s26 + $0xe8] sm:$0xff] %vm3794_vm2, %v8076_v0  ;;  %v8014_v45 = vmul.f32 %v7950_v11, %v7854_v37  ;;  %v7948_v38 = vpop.permute.xlu0 %7947 }
 0x486   : > { %8107 = vst.msk [vmem:[%s14393_s26 + $0xe0] sm:$0xff] %vm3794_vm2, %v8075_v31  ;;  %v8013_v32 = vmul.f32 %v7948_v38, %v7853_v36 }
 0x487   : > { %v8078_v2 = vadd.f32 %v8046_v5, %v8014_v45 }
 0x488   : > { %v8077_v29 = vadd.f32 %v8045_v22, %v8013_v32 }
 0x489   : > { %8110 = vst.msk [vmem:[%s14393_s26 + $0xf8] sm:$0xff] %vm3794_vm2, %v8078_v2 }
 0x48a   : > { %8109 = vst.msk [vmem:[%s14393_s26 + $0xf0] sm:$0xff] %vm3794_vm2, %v8077_v29 }
 0x48b PF: > { %s16_s21 = sadd.s32 1, %s11051_s21  }
 0x48c   : > { %p13_p4 = scmp.ge.s32.totalorder %s16_s21, 4  }
 0x48e   :  { %15 = sbr.rel (!%p13_p4) target bundleno = 1 (0x1), region = 97 }

</bundles_post_ra>
